<compile_context>
chip_gen: v5e
topology: v5e:2x2
jax: 0.10.0
libtpu: 0.0.40
codegen_flags: <defaults>
</compile_context>

<pallas_src>
import math

import jax
import jax.numpy as jnp
from jax import lax
from jax.experimental import pallas as pl
from jax.experimental.pallas import tpu as pltpu


# ----------------------------------------------------------------------------- #
# Host-side helpers: shift matrices, parameter init, block-diagonal packing
# ----------------------------------------------------------------------------- #
def make_shift_mats(H, W):
    """(9, HW, HW) matrices: S_tap @ a == activation shifted by tap with zero pad."""
    HW = H * W
    idx = jnp.arange(HW)
    y, x = idx // W, idx % W
    cols = jnp.arange(HW)
    mats = []
    for dy in (-1, 0, 1):
        for dx in (-1, 0, 1):
            ys, xs = y + dy, x + dx
            valid = (ys >= 0) & (ys < H) & (xs >= 0) & (xs < W)
            src = jnp.where(valid, ys * W + xs, -1)          # -1 -> all-zero row
            mats.append((src[:, None] == cols[None, :]).astype(jnp.float32))
    return jnp.stack(mats)


def _xavier_uniform(key, shape, fan_in, fan_out):
    bound = math.sqrt(6.0 / (fan_in + fan_out))
    return jax.random.uniform(key, shape, jnp.float32, -bound, bound)


def init_encoder_params(key, cin, hid, out, n_hidden):
    keys = jax.random.split(key, 2 + max(n_hidden, 1))
    w_in = _xavier_uniform(keys[0], (cin, hid), cin, hid)              # 1x1 conv
    b_in = jnp.zeros((1, hid), jnp.float32)
    if n_hidden > 0:
        w_hid = jnp.stack([_xavier_uniform(keys[1 + l], (3, 3, hid, hid),
                                           hid * 9, hid * 9)           # 3x3 HWIO
                           for l in range(n_hidden)])
    else:
        w_hid = jnp.zeros((0, 3, 3, hid, hid), jnp.float32)
    b_hid = jnp.zeros((n_hidden, hid), jnp.float32)
    w_out = _xavier_uniform(keys[1 + max(n_hidden, 1)], (hid, out), hid, out)
    b_out = jnp.zeros((1, out), jnp.float32)
    return (w_in, b_in, w_hid, b_hid, w_out, b_out)


def init_what_encoder_params(key, z_what_size, n_hidden, feature_channels,
                             feature_maps, z_what_scale_const=None, background=True):
    hid = 2 * z_what_size
    feature_idx = feature_maps.index(min(feature_maps))
    keys = iter(jax.random.split(key, 4 * len(feature_channels) + 4))
    params = {"loc": [init_encoder_params(next(keys), c, hid, z_what_size, n_hidden)
                      for c in feature_channels]}
    if background:
        params["bg_loc"] = init_encoder_params(
            next(keys), feature_channels[feature_idx], hid, z_what_size, n_hidden)
    if z_what_scale_const is None:
        params["scale"] = [init_encoder_params(next(keys), c, hid, z_what_size, n_hidden)
                           for c in feature_channels]
        if background:
            params["bg_scale"] = init_encoder_params(
                next(keys), feature_channels[feature_idx], hid, z_what_size, n_hidden)
    return params


def _block_diag(blocks):
    rows = sum(b.shape[0] for b in blocks)
    cols = sum(b.shape[1] for b in blocks)
    out = jnp.zeros((rows, cols), blocks[0].dtype)
    r = c = 0
    for b in blocks:
        out = out.at[r:r + b.shape[0], c:c + b.shape[1]].set(b)
        r += b.shape[0]
        c += b.shape[1]
    return out


def pack_group(enc_params, enc_meta, H, W):
    """Pack K encoders sharing one feature map into block-diagonal weights.

    enc_meta : list of (is_scale, anchor_offset) per encoder (packed column order).
    """
    K = len(enc_params)
    hid = enc_params[0][0].shape[1]
    z = enc_params[0][4].shape[1]
    n_hidden = enc_params[0][2].shape[0]
    Khid = K * hid

    w_in = jnp.concatenate([p[0] for p in enc_params], axis=1)          # (Cin, Khid)
    b_in = jnp.concatenate([p[1] for p in enc_params], axis=1)          # (1, Khid)

    taps = []
    for l in range(n_hidden):
        for ky in range(3):
            for kx in range(3):
                taps.append(_block_diag([p[2][l, ky, kx] for p in enc_params]))
    if n_hidden > 0:
        w_hid = jnp.stack(taps)                                         # (n_hid*9, Khid, Khid)
        b_hid = jnp.concatenate([p[3] for p in enc_params], axis=1)     # (n_hid, Khid)
    else:
        w_hid = jnp.zeros((1, Khid, Khid), jnp.float32)                 # unused dummy
        b_hid = jnp.zeros((1, Khid), jnp.float32)

    w_out = _block_diag([p[4] for p in enc_params])                     # (Khid, K*z)
    b_out = jnp.concatenate([p[5] for p in enc_params], axis=1)         # (1, K*z)
    smat = make_shift_mats(H, W)                                        # (9, HW, HW)

    arrays = dict(w_in=w_in, b_in=b_in, w_hid=w_hid, b_hid=b_hid,
                  w_out=w_out, b_out=b_out, smat=smat)
    meta = dict(hw=H * W, khid=Khid, z=z, n_hidden=int(n_hidden), encoders=enc_meta)
    return arrays, meta


def pack_what_encoder_params(params, feature_channels, feature_maps,
                             z_what_scale_const=None, background=True):
    """Group encoders by the feature map they consume; pack each group."""
    n = len(feature_channels)
    offsets, off = [], 0
    for g in feature_maps:
        offsets.append(off)
        off += g * g
    bg_off = off
    bg_idx = feature_maps.index(min(feature_maps)) if background else -1

    groups = []
    for i in range(n):
        enc = [params["loc"][i]]
        meta = [(False, offsets[i])]
        if z_what_scale_const is None:
            enc.append(params["scale"][i]); meta.append((True, offsets[i]))
        if background and i == bg_idx:
            enc.append(params["bg_loc"]); meta.append((False, bg_off))
            if z_what_scale_const is None:
                enc.append(params["bg_scale"]); meta.append((True, bg_off))
        H = W = feature_maps[i]
        groups.append(pack_group(enc, meta, H, W))

    n_anchors = off + (feature_maps[bg_idx] ** 2 if background else 0)
    return groups, n_anchors


# ----------------------------------------------------------------------------- #
# Fused forward: one pallas_call, grid over batch ("parallel"), final layout out
# ----------------------------------------------------------------------------- #
GROUP_ARRAY_ORDER = ("w_in", "b_in", "w_hid", "b_hid", "w_out", "b_out", "smat")


def make_what_encoder(groups, n_anchors, z_what_size, z_what_scale_const=None):
    metas = [m for _, m in groups]
    arrays = [a for a, _ in groups]
    n_in = len(groups) * (1 + len(GROUP_ARRAY_ORDER))

    def kernel(*refs):
        in_refs = refs[:n_in]
        loc_ref, scale_ref = refs[n_in], refs[n_in + 1]

        if z_what_scale_const is not None:
            scale_ref[...] = jnp.full(scale_ref.shape, z_what_scale_const,
                                      scale_ref.dtype)

        p = 0
        for meta in metas:
            (x_ref, w_in_ref, b_in_ref, w_hid_ref, b_hid_ref,
             w_out_ref, b_out_ref, s_ref) = in_refs[p:p + 8]
            p += 8
            HW, Khid, z = meta["hw"], meta["khid"], meta["z"]
            n_hidden = meta["n_hidden"]

            # fused 1x1 input convs of all packed encoders (per batch element)
            a = jnp.dot(x_ref[0], w_in_ref[...],
                        preferred_element_type=jnp.float32) + b_in_ref[...]

            # hidden 3x3 "same" convs + ReLU: 9 accumulated dots per layer,
            # spatial shift + zero border folded into the precomputed S matrices
            for l in range(n_hidden):
                acc = jnp.zeros((HW, Khid), jnp.float32)
                for tap in range(9):
                    shifted = jnp.dot(s_ref[tap], a,
                                      preferred_element_type=jnp.float32)
                    acc = acc + jnp.dot(shifted, w_hid_ref[l * 9 + tap],
                                        preferred_element_type=jnp.float32)
                a = jnp.maximum(acc + b_hid_ref[l:l + 1, :], 0.0)

            # fused (block-diagonal) 1x1 output convs
            o = jnp.dot(a, w_out_ref[...],
                        preferred_element_type=jnp.float32) + b_out_ref[...]

            # write each encoder's slice straight into the final layout;
            # exp only on scale encoders (static flag, no mask / select)
            for k, (is_scale, off) in enumerate(meta["encoders"]):
                val = o[:, k * z:(k + 1) * z]
                if is_scale:
                    scale_ref[0, off:off + HW, :] = jnp.exp(val)
                else:
                    loc_ref[0, off:off + HW, :] = val

    def forward(*features_nchw):
        B = features_nchw[0].shape[0]
        args, in_specs = [], []
        for arrs, feat in zip(arrays, features_nchw):
            Bf, C, H, W = feat.shape
            x = jnp.transpose(feat, (0, 2, 3, 1)).reshape(Bf, H * W, C)
            args.append(x)
            in_specs.append(pl.BlockSpec((1, H * W, C), lambda b: (b, 0, 0)))
            for name in GROUP_ARRAY_ORDER:
                arr = arrs[name]
                args.append(arr)
                in_specs.append(
                    pl.BlockSpec(arr.shape, lambda b, _nd=arr.ndim: (0,) * _nd))

        out_sds = jax.ShapeDtypeStruct((B, n_anchors, z_what_size), jnp.float32)
        out_spec = pl.BlockSpec((1, n_anchors, z_what_size), lambda b: (b, 0, 0))
        loc, scale = pl.pallas_call(
            kernel,
            out_shape=(out_sds, out_sds),
            grid_spec=pltpu.PrefetchScalarGridSpec(
                num_scalar_prefetch=0,
                grid=(B,),
                in_specs=in_specs,
                out_specs=[out_spec,
                           pl.BlockSpec((1, n_anchors, z_what_size),
                                        lambda b: (b, 0, 0))]),
            compiler_params=pltpu.CompilerParams(
                dimension_semantics=("parallel",)),
        )(*args)
        return loc, scale

    return jax.jit(forward)


# ----------------------------------------------------------------------------- #
# Pure-JAX reference (for correctness check)
# ----------------------------------------------------------------------------- #
def _ref_encoder(x_nhwc, params, apply_exp):
    w_in, b_in, w_hid, b_hid, w_out, b_out = params
    a = jnp.einsum("bhwc,cd->bhwd", x_nhwc, w_in) + b_in[0]
    for l in range(w_hid.shape[0]):
        a = lax.conv_general_dilated(
            a, w_hid[l], window_strides=(1, 1), padding="SAME",
            dimension_numbers=("NHWC", "HWIO", "NHWC")) + b_hid[l]
        a = jnp.maximum(a, 0.0)
    o = jnp.einsum("bhwd,de->bhwe", a, w_out) + b_out[0]
    if apply_exp:
        o = jnp.exp(o)
    return o.reshape(x_nhwc.shape[0], -1, o.shape[-1])


def _ref_forward(features_nchw, params, feature_maps,
                 z_what_scale_const=None, background=True):
    locs, scales = [], []
    for i, feat in enumerate(features_nchw):
        x = jnp.transpose(feat, (0, 2, 3, 1))
        loc = _ref_encoder(x, params["loc"][i], False)
        locs.append(loc)
        if z_what_scale_const is None:
            scales.append(_ref_encoder(x, params["scale"][i], True))
        else:
            scales.append(jnp.full_like(loc, z_what_scale_const))
    if background:
        bg_idx = feature_maps.index(min(feature_maps))
        x = jnp.transpose(features_nchw[bg_idx], (0, 2, 3, 1))
        bg_loc = _ref_encoder(x, params["bg_loc"], False)
        locs.append(bg_loc)
        if z_what_scale_const is None:
            scales.append(_ref_encoder(x, params["bg_scale"], True))
        else:
            scales.append(jnp.full_like(bg_loc, z_what_scale_const))
    return jnp.concatenate(locs, axis=1), jnp.concatenate(scales, axis=1)


if __name__ == "__main__":
    # small configuration consistent with WhatEncoder.__init__
    z_what_size = 16
    n_hidden = 1
    feature_channels = [8, 16]
    feature_maps = [8, 4]          # grid sizes of each feature map
    background = True
    batch = 2

    key = jax.random.PRNGKey(0)
    kp, kf0, kf1 = jax.random.split(key, 3)

    # PyTorch-style NCHW feature maps
    features = [
        jax.random.normal(kf0, (batch, feature_channels[0],
                                feature_maps[0], feature_maps[0]), jnp.float32),
        jax.random.normal(kf1, (batch, feature_channels[1],
                                feature_maps[1], feature_maps[1]), jnp.float32),
    ]
    n_expected = sum(g * g for g in feature_maps) + min(feature_maps) ** 2

    # --- learned-scale configuration (z_what_scale_const=None) -------------- #
    params = init_what_encoder_params(kp, z_what_size, n_hidden, feature_channels,
                                      feature_maps, z_what_scale_const=None,
                                      background=background)
    groups, n_anchors = pack_what_encoder_params(
        params, feature_channels, feature_maps,
        z_what_scale_const=None, background=background)
    fwd = make_what_encoder(groups, n_anchors, z_what_size, z_what_scale_const=None)
    locs, scales = fwd(*features)
    jax.block_until_ready((locs, scales))
    assert n_anchors == n_expected
    assert locs.shape == (batch, n_anchors, z_what_size), locs.shape
    assert scales.shape == (batch, n_anchors, z_what_size), scales.shape

    ref_locs, ref_scales = _ref_forward(features, params, feature_maps,
                                        z_what_scale_const=None, background=background)
    assert jnp.allclose(locs, ref_locs, atol=2e-4, rtol=2e-4)
    assert jnp.allclose(scales, ref_scales, atol=2e-4, rtol=2e-4)

    # --- constant-scale configuration (only loc / bg_loc encoders) ---------- #
    const = 0.3
    params_c = init_what_encoder_params(kp, z_what_size, n_hidden, feature_channels,
                                        feature_maps, z_what_scale_const=const,
                                        background=background)
    groups_c, n_anchors_c = pack_what_encoder_params(
        params_c, feature_channels, feature_maps,
        z_what_scale_const=const, background=background)
    fwd_c = make_what_encoder(groups_c, n_anchors_c, z_what_size,
                              z_what_scale_const=const)
    locs_c, scales_c = fwd_c(*features)
    jax.block_until_ready((locs_c, scales_c))
    ref_locs_c, ref_scales_c = _ref_forward(features, params_c, feature_maps,
                                            z_what_scale_const=const,
                                            background=background)
    assert jnp.allclose(locs_c, ref_locs_c, atol=2e-4, rtol=2e-4)
    assert jnp.allclose(scales_c, ref_scales_c, atol=2e-4, rtol=2e-4)

    print("KERNEL_OK")
</pallas_src>

<mosaic_0001>
module attributes {stable_mosaic.version = 11 : i64} {
  func.func @kernel(%arg0: i32, %arg1: memref<1x64x8xf32, #tpu.memory_space<vmem>>, %arg2: memref<8x64xf32, #tpu.memory_space<vmem>>, %arg3: memref<1x64xf32, #tpu.memory_space<vmem>>, %arg4: memref<9x64x64xf32, #tpu.memory_space<vmem>>, %arg5: memref<1x64xf32, #tpu.memory_space<vmem>>, %arg6: memref<64x32xf32, #tpu.memory_space<vmem>>, %arg7: memref<1x32xf32, #tpu.memory_space<vmem>>, %arg8: memref<9x64x64xf32, #tpu.memory_space<vmem>>, %arg9: memref<1x16x16xf32, #tpu.memory_space<vmem>>, %arg10: memref<16x128xf32, #tpu.memory_space<vmem>>, %arg11: memref<1x128xf32, #tpu.memory_space<vmem>>, %arg12: memref<9x128x128xf32, #tpu.memory_space<vmem>>, %arg13: memref<1x128xf32, #tpu.memory_space<vmem>>, %arg14: memref<128x64xf32, #tpu.memory_space<vmem>>, %arg15: memref<1x64xf32, #tpu.memory_space<vmem>>, %arg16: memref<9x16x16xf32, #tpu.memory_space<vmem>>, %arg17: memref<1x96x16xf32, #tpu.memory_space<vmem>>, %arg18: memref<1x96x16xf32, #tpu.memory_space<vmem>>) attributes {dimension_semantics = [#tpu.dimension_semantics<parallel>], iteration_bounds = array<i64: 2>, scalar_prefetch = 0 : i64, scratch_operands = 0 : i64, tpu.core_type = #tpu.core_type<tc>, window_params = [{transform_indices = @transform_0, window_bounds = array<i64: 1, 64, 8>}, {pipeline_mode = #tpu.pipeline_mode<synchronous>, transform_indices = @transform_1, window_bounds = array<i64: 8, 64>}, {pipeline_mode = #tpu.pipeline_mode<synchronous>, transform_indices = @transform_2, window_bounds = array<i64: 1, 64>}, {pipeline_mode = #tpu.pipeline_mode<synchronous>, transform_indices = @transform_3, window_bounds = array<i64: 9, 64, 64>}, {pipeline_mode = #tpu.pipeline_mode<synchronous>, transform_indices = @transform_4, window_bounds = array<i64: 1, 64>}, {pipeline_mode = #tpu.pipeline_mode<synchronous>, transform_indices = @transform_5, window_bounds = array<i64: 64, 32>}, {pipeline_mode = #tpu.pipeline_mode<synchronous>, transform_indices = @transform_6, window_bounds = array<i64: 1, 32>}, {pipeline_mode = #tpu.pipeline_mode<synchronous>, transform_indices = @transform_7, window_bounds = array<i64: 9, 64, 64>}, {transform_indices = @transform_8, window_bounds = array<i64: 1, 16, 16>}, {pipeline_mode = #tpu.pipeline_mode<synchronous>, transform_indices = @transform_9, window_bounds = array<i64: 16, 128>}, {pipeline_mode = #tpu.pipeline_mode<synchronous>, transform_indices = @transform_10, window_bounds = array<i64: 1, 128>}, {pipeline_mode = #tpu.pipeline_mode<synchronous>, transform_indices = @transform_11, window_bounds = array<i64: 9, 128, 128>}, {pipeline_mode = #tpu.pipeline_mode<synchronous>, transform_indices = @transform_12, window_bounds = array<i64: 1, 128>}, {pipeline_mode = #tpu.pipeline_mode<synchronous>, transform_indices = @transform_13, window_bounds = array<i64: 128, 64>}, {pipeline_mode = #tpu.pipeline_mode<synchronous>, transform_indices = @transform_14, window_bounds = array<i64: 1, 64>}, {pipeline_mode = #tpu.pipeline_mode<synchronous>, transform_indices = @transform_15, window_bounds = array<i64: 9, 16, 16>}, {transform_indices = @transform_16, window_bounds = array<i64: 1, 96, 16>}, {transform_indices = @transform_17, window_bounds = array<i64: 1, 96, 16>}]} {
    %c0 = arith.constant 0 : index
    %c0_0 = arith.constant 0 : index
    %c0_1 = arith.constant 0 : index
    %0 = vector.load %arg1[%c0, %c0_0, %c0_1] : memref<1x64x8xf32, #tpu.memory_space<vmem>>, vector<1x64x8xf32>
    %1 = vector.shape_cast %0 : vector<1x64x8xf32> to vector<64x8xf32>
    %c0_2 = arith.constant 0 : index
    %c0_3 = arith.constant 0 : index
    %2 = vector.load %arg2[%c0_2, %c0_3] : memref<8x64xf32, #tpu.memory_space<vmem>>, vector<8x64xf32>
    %cst = arith.constant dense<0.000000e+00> : vector<64x64xf32>
    %3 = tpu.matmul %1, %2, %cst {dimension_numbers = #tpu.dot_dimension_numbers<[1], [0], [0], [1], [0, 0, 1, 1], [], []>} : vector<64x8xf32>, vector<8x64xf32>, vector<64x64xf32> -> vector<64x64xf32>
    %c0_4 = arith.constant 0 : index
    %c0_5 = arith.constant 0 : index
    %4 = vector.load %arg3[%c0_4, %c0_5] : memref<1x64xf32, #tpu.memory_space<vmem>>, vector<1x64xf32>
    %5 = vector.broadcast %4 : vector<1x64xf32> to vector<64x64xf32>
    %6 = arith.addf %3, %5 : vector<64x64xf32>
    %cst_6 = arith.constant 0.000000e+00 : f32
    %7 = vector.broadcast %cst_6 : f32 to vector<64x64xf32>
    %c0_7 = arith.constant 0 : index
    %c0_8 = arith.constant 0 : index
    %c0_9 = arith.constant 0 : index
    %8 = vector.load %arg8[%c0_7, %c0_8, %c0_9] : memref<9x64x64xf32, #tpu.memory_space<vmem>>, vector<1x64x64xf32>
    %9 = vector.shape_cast %8 : vector<1x64x64xf32> to vector<64x64xf32>
    %cst_10 = arith.constant dense<0.000000e+00> : vector<64x64xf32>
    %10 = tpu.matmul %9, %6, %cst_10 {dimension_numbers = #tpu.dot_dimension_numbers<[1], [0], [0], [1], [0, 0, 1, 1], [], []>} : vector<64x64xf32>, vector<64x64xf32>, vector<64x64xf32> -> vector<64x64xf32>
    %c0_11 = arith.constant 0 : index
    %c0_12 = arith.constant 0 : index
    %c0_13 = arith.constant 0 : index
    %11 = vector.load %arg4[%c0_11, %c0_12, %c0_13] : memref<9x64x64xf32, #tpu.memory_space<vmem>>, vector<1x64x64xf32>
    %12 = vector.shape_cast %11 : vector<1x64x64xf32> to vector<64x64xf32>
    %cst_14 = arith.constant dense<0.000000e+00> : vector<64x64xf32>
    %13 = tpu.matmul %10, %12, %cst_14 {dimension_numbers = #tpu.dot_dimension_numbers<[1], [0], [0], [1], [0, 0, 1, 1], [], []>} : vector<64x64xf32>, vector<64x64xf32>, vector<64x64xf32> -> vector<64x64xf32>
    %14 = arith.addf %7, %13 : vector<64x64xf32>
    %c1 = arith.constant 1 : index
    %c0_15 = arith.constant 0 : index
    %c0_16 = arith.constant 0 : index
    %15 = vector.load %arg8[%c1, %c0_15, %c0_16] : memref<9x64x64xf32, #tpu.memory_space<vmem>>, vector<1x64x64xf32>
    %16 = vector.shape_cast %15 : vector<1x64x64xf32> to vector<64x64xf32>
    %cst_17 = arith.constant dense<0.000000e+00> : vector<64x64xf32>
    %17 = tpu.matmul %16, %6, %cst_17 {dimension_numbers = #tpu.dot_dimension_numbers<[1], [0], [0], [1], [0, 0, 1, 1], [], []>} : vector<64x64xf32>, vector<64x64xf32>, vector<64x64xf32> -> vector<64x64xf32>
    %c1_18 = arith.constant 1 : index
    %c0_19 = arith.constant 0 : index
    %c0_20 = arith.constant 0 : index
    %18 = vector.load %arg4[%c1_18, %c0_19, %c0_20] : memref<9x64x64xf32, #tpu.memory_space<vmem>>, vector<1x64x64xf32>
    %19 = vector.shape_cast %18 : vector<1x64x64xf32> to vector<64x64xf32>
    %cst_21 = arith.constant dense<0.000000e+00> : vector<64x64xf32>
    %20 = tpu.matmul %17, %19, %cst_21 {dimension_numbers = #tpu.dot_dimension_numbers<[1], [0], [0], [1], [0, 0, 1, 1], [], []>} : vector<64x64xf32>, vector<64x64xf32>, vector<64x64xf32> -> vector<64x64xf32>
    %21 = arith.addf %14, %20 : vector<64x64xf32>
    %c2 = arith.constant 2 : index
    %c0_22 = arith.constant 0 : index
    %c0_23 = arith.constant 0 : index
    %22 = vector.load %arg8[%c2, %c0_22, %c0_23] : memref<9x64x64xf32, #tpu.memory_space<vmem>>, vector<1x64x64xf32>
    %23 = vector.shape_cast %22 : vector<1x64x64xf32> to vector<64x64xf32>
    %cst_24 = arith.constant dense<0.000000e+00> : vector<64x64xf32>
    %24 = tpu.matmul %23, %6, %cst_24 {dimension_numbers = #tpu.dot_dimension_numbers<[1], [0], [0], [1], [0, 0, 1, 1], [], []>} : vector<64x64xf32>, vector<64x64xf32>, vector<64x64xf32> -> vector<64x64xf32>
    %c2_25 = arith.constant 2 : index
    %c0_26 = arith.constant 0 : index
    %c0_27 = arith.constant 0 : index
    %25 = vector.load %arg4[%c2_25, %c0_26, %c0_27] : memref<9x64x64xf32, #tpu.memory_space<vmem>>, vector<1x64x64xf32>
    %26 = vector.shape_cast %25 : vector<1x64x64xf32> to vector<64x64xf32>
    %cst_28 = arith.constant dense<0.000000e+00> : vector<64x64xf32>
    %27 = tpu.matmul %24, %26, %cst_28 {dimension_numbers = #tpu.dot_dimension_numbers<[1], [0], [0], [1], [0, 0, 1, 1], [], []>} : vector<64x64xf32>, vector<64x64xf32>, vector<64x64xf32> -> vector<64x64xf32>
    %28 = arith.addf %21, %27 : vector<64x64xf32>
    %c3 = arith.constant 3 : index
    %c0_29 = arith.constant 0 : index
    %c0_30 = arith.constant 0 : index
    %29 = vector.load %arg8[%c3, %c0_29, %c0_30] : memref<9x64x64xf32, #tpu.memory_space<vmem>>, vector<1x64x64xf32>
    %30 = vector.shape_cast %29 : vector<1x64x64xf32> to vector<64x64xf32>
    %cst_31 = arith.constant dense<0.000000e+00> : vector<64x64xf32>
    %31 = tpu.matmul %30, %6, %cst_31 {dimension_numbers = #tpu.dot_dimension_numbers<[1], [0], [0], [1], [0, 0, 1, 1], [], []>} : vector<64x64xf32>, vector<64x64xf32>, vector<64x64xf32> -> vector<64x64xf32>
    %c3_32 = arith.constant 3 : index
    %c0_33 = arith.constant 0 : index
    %c0_34 = arith.constant 0 : index
    %32 = vector.load %arg4[%c3_32, %c0_33, %c0_34] : memref<9x64x64xf32, #tpu.memory_space<vmem>>, vector<1x64x64xf32>
    %33 = vector.shape_cast %32 : vector<1x64x64xf32> to vector<64x64xf32>
    %cst_35 = arith.constant dense<0.000000e+00> : vector<64x64xf32>
    %34 = tpu.matmul %31, %33, %cst_35 {dimension_numbers = #tpu.dot_dimension_numbers<[1], [0], [0], [1], [0, 0, 1, 1], [], []>} : vector<64x64xf32>, vector<64x64xf32>, vector<64x64xf32> -> vector<64x64xf32>
    %35 = arith.addf %28, %34 : vector<64x64xf32>
    %c4 = arith.constant 4 : index
    %c0_36 = arith.constant 0 : index
    %c0_37 = arith.constant 0 : index
    %36 = vector.load %arg8[%c4, %c0_36, %c0_37] : memref<9x64x64xf32, #tpu.memory_space<vmem>>, vector<1x64x64xf32>
    %37 = vector.shape_cast %36 : vector<1x64x64xf32> to vector<64x64xf32>
    %cst_38 = arith.constant dense<0.000000e+00> : vector<64x64xf32>
    %38 = tpu.matmul %37, %6, %cst_38 {dimension_numbers = #tpu.dot_dimension_numbers<[1], [0], [0], [1], [0, 0, 1, 1], [], []>} : vector<64x64xf32>, vector<64x64xf32>, vector<64x64xf32> -> vector<64x64xf32>
    %c4_39 = arith.constant 4 : index
    %c0_40 = arith.constant 0 : index
    %c0_41 = arith.constant 0 : index
    %39 = vector.load %arg4[%c4_39, %c0_40, %c0_41] : memref<9x64x64xf32, #tpu.memory_space<vmem>>, vector<1x64x64xf32>
    %40 = vector.shape_cast %39 : vector<1x64x64xf32> to vector<64x64xf32>
    %cst_42 = arith.constant dense<0.000000e+00> : vector<64x64xf32>
    %41 = tpu.matmul %38, %40, %cst_42 {dimension_numbers = #tpu.dot_dimension_numbers<[1], [0], [0], [1], [0, 0, 1, 1], [], []>} : vector<64x64xf32>, vector<64x64xf32>, vector<64x64xf32> -> vector<64x64xf32>
    %42 = arith.addf %35, %41 : vector<64x64xf32>
    %c5 = arith.constant 5 : index
    %c0_43 = arith.constant 0 : index
    %c0_44 = arith.constant 0 : index
    %43 = vector.load %arg8[%c5, %c0_43, %c0_44] : memref<9x64x64xf32, #tpu.memory_space<vmem>>, vector<1x64x64xf32>
    %44 = vector.shape_cast %43 : vector<1x64x64xf32> to vector<64x64xf32>
    %cst_45 = arith.constant dense<0.000000e+00> : vector<64x64xf32>
    %45 = tpu.matmul %44, %6, %cst_45 {dimension_numbers = #tpu.dot_dimension_numbers<[1], [0], [0], [1], [0, 0, 1, 1], [], []>} : vector<64x64xf32>, vector<64x64xf32>, vector<64x64xf32> -> vector<64x64xf32>
    %c5_46 = arith.constant 5 : index
    %c0_47 = arith.constant 0 : index
    %c0_48 = arith.constant 0 : index
    %46 = vector.load %arg4[%c5_46, %c0_47, %c0_48] : memref<9x64x64xf32, #tpu.memory_space<vmem>>, vector<1x64x64xf32>
    %47 = vector.shape_cast %46 : vector<1x64x64xf32> to vector<64x64xf32>
    %cst_49 = arith.constant dense<0.000000e+00> : vector<64x64xf32>
    %48 = tpu.matmul %45, %47, %cst_49 {dimension_numbers = #tpu.dot_dimension_numbers<[1], [0], [0], [1], [0, 0, 1, 1], [], []>} : vector<64x64xf32>, vector<64x64xf32>, vector<64x64xf32> -> vector<64x64xf32>
    %49 = arith.addf %42, %48 : vector<64x64xf32>
    %c6 = arith.constant 6 : index
    %c0_50 = arith.constant 0 : index
    %c0_51 = arith.constant 0 : index
    %50 = vector.load %arg8[%c6, %c0_50, %c0_51] : memref<9x64x64xf32, #tpu.memory_space<vmem>>, vector<1x64x64xf32>
    %51 = vector.shape_cast %50 : vector<1x64x64xf32> to vector<64x64xf32>
    %cst_52 = arith.constant dense<0.000000e+00> : vector<64x64xf32>
    %52 = tpu.matmul %51, %6, %cst_52 {dimension_numbers = #tpu.dot_dimension_numbers<[1], [0], [0], [1], [0, 0, 1, 1], [], []>} : vector<64x64xf32>, vector<64x64xf32>, vector<64x64xf32> -> vector<64x64xf32>
    %c6_53 = arith.constant 6 : index
    %c0_54 = arith.constant 0 : index
    %c0_55 = arith.constant 0 : index
    %53 = vector.load %arg4[%c6_53, %c0_54, %c0_55] : memref<9x64x64xf32, #tpu.memory_space<vmem>>, vector<1x64x64xf32>
    %54 = vector.shape_cast %53 : vector<1x64x64xf32> to vector<64x64xf32>
    %cst_56 = arith.constant dense<0.000000e+00> : vector<64x64xf32>
    %55 = tpu.matmul %52, %54, %cst_56 {dimension_numbers = #tpu.dot_dimension_numbers<[1], [0], [0], [1], [0, 0, 1, 1], [], []>} : vector<64x64xf32>, vector<64x64xf32>, vector<64x64xf32> -> vector<64x64xf32>
    %56 = arith.addf %49, %55 : vector<64x64xf32>
    %c7 = arith.constant 7 : index
    %c0_57 = arith.constant 0 : index
    %c0_58 = arith.constant 0 : index
    %57 = vector.load %arg8[%c7, %c0_57, %c0_58] : memref<9x64x64xf32, #tpu.memory_space<vmem>>, vector<1x64x64xf32>
    %58 = vector.shape_cast %57 : vector<1x64x64xf32> to vector<64x64xf32>
    %cst_59 = arith.constant dense<0.000000e+00> : vector<64x64xf32>
    %59 = tpu.matmul %58, %6, %cst_59 {dimension_numbers = #tpu.dot_dimension_numbers<[1], [0], [0], [1], [0, 0, 1, 1], [], []>} : vector<64x64xf32>, vector<64x64xf32>, vector<64x64xf32> -> vector<64x64xf32>
    %c7_60 = arith.constant 7 : index
    %c0_61 = arith.constant 0 : index
    %c0_62 = arith.constant 0 : index
    %60 = vector.load %arg4[%c7_60, %c0_61, %c0_62] : memref<9x64x64xf32, #tpu.memory_space<vmem>>, vector<1x64x64xf32>
    %61 = vector.shape_cast %60 : vector<1x64x64xf32> to vector<64x64xf32>
    %cst_63 = arith.constant dense<0.000000e+00> : vector<64x64xf32>
    %62 = tpu.matmul %59, %61, %cst_63 {dimension_numbers = #tpu.dot_dimension_numbers<[1], [0], [0], [1], [0, 0, 1, 1], [], []>} : vector<64x64xf32>, vector<64x64xf32>, vector<64x64xf32> -> vector<64x64xf32>
    %63 = arith.addf %56, %62 : vector<64x64xf32>
    %c8 = arith.constant 8 : index
    %c0_64 = arith.constant 0 : index
    %c0_65 = arith.constant 0 : index
    %64 = vector.load %arg8[%c8, %c0_64, %c0_65] : memref<9x64x64xf32, #tpu.memory_space<vmem>>, vector<1x64x64xf32>
    %65 = vector.shape_cast %64 : vector<1x64x64xf32> to vector<64x64xf32>
    %cst_66 = arith.constant dense<0.000000e+00> : vector<64x64xf32>
    %66 = tpu.matmul %65, %6, %cst_66 {dimension_numbers = #tpu.dot_dimension_numbers<[1], [0], [0], [1], [0, 0, 1, 1], [], []>} : vector<64x64xf32>, vector<64x64xf32>, vector<64x64xf32> -> vector<64x64xf32>
    %c8_67 = arith.constant 8 : index
    %c0_68 = arith.constant 0 : index
    %c0_69 = arith.constant 0 : index
    %67 = vector.load %arg4[%c8_67, %c0_68, %c0_69] : memref<9x64x64xf32, #tpu.memory_space<vmem>>, vector<1x64x64xf32>
    %68 = vector.shape_cast %67 : vector<1x64x64xf32> to vector<64x64xf32>
    %cst_70 = arith.constant dense<0.000000e+00> : vector<64x64xf32>
    %69 = tpu.matmul %66, %68, %cst_70 {dimension_numbers = #tpu.dot_dimension_numbers<[1], [0], [0], [1], [0, 0, 1, 1], [], []>} : vector<64x64xf32>, vector<64x64xf32>, vector<64x64xf32> -> vector<64x64xf32>
    %70 = arith.addf %63, %69 : vector<64x64xf32>
    %c0_71 = arith.constant 0 : index
    %c0_72 = arith.constant 0 : index
    %71 = vector.load %arg5[%c0_71, %c0_72] : memref<1x64xf32, #tpu.memory_space<vmem>>, vector<1x64xf32>
    %72 = vector.broadcast %71 : vector<1x64xf32> to vector<64x64xf32>
    %73 = arith.addf %70, %72 : vector<64x64xf32>
    %cst_73 = arith.constant 0.000000e+00 : f32
    %74 = vector.broadcast %cst_73 : f32 to vector<64x64xf32>
    %75 = arith.maximumf %73, %74 : vector<64x64xf32>
    %c0_74 = arith.constant 0 : index
    %c0_75 = arith.constant 0 : index
    %76 = vector.load %arg6[%c0_74, %c0_75] : memref<64x32xf32, #tpu.memory_space<vmem>>, vector<64x32xf32>
    %cst_76 = arith.constant dense<0.000000e+00> : vector<64x32xf32>
    %77 = tpu.matmul %75, %76, %cst_76 {dimension_numbers = #tpu.dot_dimension_numbers<[1], [0], [0], [1], [0, 0, 1, 1], [], []>} : vector<64x64xf32>, vector<64x32xf32>, vector<64x32xf32> -> vector<64x32xf32>
    %c0_77 = arith.constant 0 : index
    %c0_78 = arith.constant 0 : index
    %78 = vector.load %arg7[%c0_77, %c0_78] : memref<1x32xf32, #tpu.memory_space<vmem>>, vector<1x32xf32>
    %79 = vector.broadcast %78 : vector<1x32xf32> to vector<64x32xf32>
    %80 = arith.addf %77, %79 : vector<64x32xf32>
    %81 = vector.extract_strided_slice %80 {offsets = [0, 0], sizes = [64, 16], strides = [1, 1]} : vector<64x32xf32> to vector<64x16xf32>
    %c0_79 = arith.constant 0 : index
    %c0_80 = arith.constant 0 : index
    %c0_81 = arith.constant 0 : index
    %82 = vector.load %arg17[%c0_79, %c0_80, %c0_81] : memref<1x96x16xf32, #tpu.memory_space<vmem>>, vector<1x64x16xf32>
    %83 = vector.shape_cast %82 : vector<1x64x16xf32> to vector<64x16xf32>
    %84 = vector.shape_cast %81 : vector<64x16xf32> to vector<1x64x16xf32>
    tpu.vector_store %arg17[%c0_79, %c0_80, %c0_81], %84 {strides = array<i32>} : memref<1x96x16xf32, #tpu.memory_space<vmem>>, vector<1x64x16xf32>,
    %85 = vector.extract_strided_slice %80 {offsets = [0, 16], sizes = [64, 16], strides = [1, 1]} : vector<64x32xf32> to vector<64x16xf32>
    %86 = math.exp %85 : vector<64x16xf32>
    %c0_82 = arith.constant 0 : index
    %c0_83 = arith.constant 0 : index
    %c0_84 = arith.constant 0 : index
    %87 = vector.load %arg18[%c0_82, %c0_83, %c0_84] : memref<1x96x16xf32, #tpu.memory_space<vmem>>, vector<1x64x16xf32>
    %88 = vector.shape_cast %87 : vector<1x64x16xf32> to vector<64x16xf32>
    %89 = vector.shape_cast %86 : vector<64x16xf32> to vector<1x64x16xf32>
    tpu.vector_store %arg18[%c0_82, %c0_83, %c0_84], %89 {strides = array<i32>} : memref<1x96x16xf32, #tpu.memory_space<vmem>>, vector<1x64x16xf32>,
    %c0_85 = arith.constant 0 : index
    %c0_86 = arith.constant 0 : index
    %c0_87 = arith.constant 0 : index
    %90 = vector.load %arg9[%c0_85, %c0_86, %c0_87] : memref<1x16x16xf32, #tpu.memory_space<vmem>>, vector<1x16x16xf32>
    %91 = vector.shape_cast %90 : vector<1x16x16xf32> to vector<16x16xf32>
    %c0_88 = arith.constant 0 : index
    %c0_89 = arith.constant 0 : index
    %92 = vector.load %arg10[%c0_88, %c0_89] : memref<16x128xf32, #tpu.memory_space<vmem>>, vector<16x128xf32>
    %cst_90 = arith.constant dense<0.000000e+00> : vector<16x128xf32>
    %93 = tpu.matmul %91, %92, %cst_90 {dimension_numbers = #tpu.dot_dimension_numbers<[1], [0], [0], [1], [0, 0, 1, 1], [], []>} : vector<16x16xf32>, vector<16x128xf32>, vector<16x128xf32> -> vector<16x128xf32>
    %c0_91 = arith.constant 0 : index
    %c0_92 = arith.constant 0 : index
    %94 = vector.load %arg11[%c0_91, %c0_92] : memref<1x128xf32, #tpu.memory_space<vmem>>, vector<1x128xf32>
    %95 = vector.broadcast %94 : vector<1x128xf32> to vector<16x128xf32>
    %96 = arith.addf %93, %95 : vector<16x128xf32>
    %cst_93 = arith.constant 0.000000e+00 : f32
    %97 = vector.broadcast %cst_93 : f32 to vector<16x128xf32>
    %c0_94 = arith.constant 0 : index
    %c0_95 = arith.constant 0 : index
    %c0_96 = arith.constant 0 : index
    %98 = vector.load %arg16[%c0_94, %c0_95, %c0_96] : memref<9x16x16xf32, #tpu.memory_space<vmem>>, vector<1x16x16xf32>
    %99 = vector.shape_cast %98 : vector<1x16x16xf32> to vector<16x16xf32>
    %cst_97 = arith.constant dense<0.000000e+00> : vector<16x128xf32>
    %100 = tpu.matmul %99, %96, %cst_97 {dimension_numbers = #tpu.dot_dimension_numbers<[1], [0], [0], [1], [0, 0, 1, 1], [], []>} : vector<16x16xf32>, vector<16x128xf32>, vector<16x128xf32> -> vector<16x128xf32>
    %c0_98 = arith.constant 0 : index
    %c0_99 = arith.constant 0 : index
    %c0_100 = arith.constant 0 : index
    %101 = vector.load %arg12[%c0_98, %c0_99, %c0_100] : memref<9x128x128xf32, #tpu.memory_space<vmem>>, vector<1x128x128xf32>
    %102 = vector.shape_cast %101 : vector<1x128x128xf32> to vector<128x128xf32>
    %cst_101 = arith.constant dense<0.000000e+00> : vector<16x128xf32>
    %103 = tpu.matmul %100, %102, %cst_101 {dimension_numbers = #tpu.dot_dimension_numbers<[1], [0], [0], [1], [0, 0, 1, 1], [], []>} : vector<16x128xf32>, vector<128x128xf32>, vector<16x128xf32> -> vector<16x128xf32>
    %104 = arith.addf %97, %103 : vector<16x128xf32>
    %c1_102 = arith.constant 1 : index
    %c0_103 = arith.constant 0 : index
    %c0_104 = arith.constant 0 : index
    %105 = vector.load %arg16[%c1_102, %c0_103, %c0_104] : memref<9x16x16xf32, #tpu.memory_space<vmem>>, vector<1x16x16xf32>
    %106 = vector.shape_cast %105 : vector<1x16x16xf32> to vector<16x16xf32>
    %cst_105 = arith.constant dense<0.000000e+00> : vector<16x128xf32>
    %107 = tpu.matmul %106, %96, %cst_105 {dimension_numbers = #tpu.dot_dimension_numbers<[1], [0], [0], [1], [0, 0, 1, 1], [], []>} : vector<16x16xf32>, vector<16x128xf32>, vector<16x128xf32> -> vector<16x128xf32>
    %c1_106 = arith.constant 1 : index
    %c0_107 = arith.constant 0 : index
    %c0_108 = arith.constant 0 : index
    %108 = vector.load %arg12[%c1_106, %c0_107, %c0_108] : memref<9x128x128xf32, #tpu.memory_space<vmem>>, vector<1x128x128xf32>
    %109 = vector.shape_cast %108 : vector<1x128x128xf32> to vector<128x128xf32>
    %cst_109 = arith.constant dense<0.000000e+00> : vector<16x128xf32>
    %110 = tpu.matmul %107, %109, %cst_109 {dimension_numbers = #tpu.dot_dimension_numbers<[1], [0], [0], [1], [0, 0, 1, 1], [], []>} : vector<16x128xf32>, vector<128x128xf32>, vector<16x128xf32> -> vector<16x128xf32>
    %111 = arith.addf %104, %110 : vector<16x128xf32>
    %c2_110 = arith.constant 2 : index
    %c0_111 = arith.constant 0 : index
    %c0_112 = arith.constant 0 : index
    %112 = vector.load %arg16[%c2_110, %c0_111, %c0_112] : memref<9x16x16xf32, #tpu.memory_space<vmem>>, vector<1x16x16xf32>
    %113 = vector.shape_cast %112 : vector<1x16x16xf32> to vector<16x16xf32>
    %cst_113 = arith.constant dense<0.000000e+00> : vector<16x128xf32>
    %114 = tpu.matmul %113, %96, %cst_113 {dimension_numbers = #tpu.dot_dimension_numbers<[1], [0], [0], [1], [0, 0, 1, 1], [], []>} : vector<16x16xf32>, vector<16x128xf32>, vector<16x128xf32> -> vector<16x128xf32>
    %c2_114 = arith.constant 2 : index
    %c0_115 = arith.constant 0 : index
    %c0_116 = arith.constant 0 : index
    %115 = vector.load %arg12[%c2_114, %c0_115, %c0_116] : memref<9x128x128xf32, #tpu.memory_space<vmem>>, vector<1x128x128xf32>
    %116 = vector.shape_cast %115 : vector<1x128x128xf32> to vector<128x128xf32>
    %cst_117 = arith.constant dense<0.000000e+00> : vector<16x128xf32>
    %117 = tpu.matmul %114, %116, %cst_117 {dimension_numbers = #tpu.dot_dimension_numbers<[1], [0], [0], [1], [0, 0, 1, 1], [], []>} : vector<16x128xf32>, vector<128x128xf32>, vector<16x128xf32> -> vector<16x128xf32>
    %118 = arith.addf %111, %117 : vector<16x128xf32>
    %c3_118 = arith.constant 3 : index
    %c0_119 = arith.constant 0 : index
    %c0_120 = arith.constant 0 : index
    %119 = vector.load %arg16[%c3_118, %c0_119, %c0_120] : memref<9x16x16xf32, #tpu.memory_space<vmem>>, vector<1x16x16xf32>
    %120 = vector.shape_cast %119 : vector<1x16x16xf32> to vector<16x16xf32>
    %cst_121 = arith.constant dense<0.000000e+00> : vector<16x128xf32>
    %121 = tpu.matmul %120, %96, %cst_121 {dimension_numbers = #tpu.dot_dimension_numbers<[1], [0], [0], [1], [0, 0, 1, 1], [], []>} : vector<16x16xf32>, vector<16x128xf32>, vector<16x128xf32> -> vector<16x128xf32>
    %c3_122 = arith.constant 3 : index
    %c0_123 = arith.constant 0 : index
    %c0_124 = arith.constant 0 : index
    %122 = vector.load %arg12[%c3_122, %c0_123, %c0_124] : memref<9x128x128xf32, #tpu.memory_space<vmem>>, vector<1x128x128xf32>
    %123 = vector.shape_cast %122 : vector<1x128x128xf32> to vector<128x128xf32>
    %cst_125 = arith.constant dense<0.000000e+00> : vector<16x128xf32>
    %124 = tpu.matmul %121, %123, %cst_125 {dimension_numbers = #tpu.dot_dimension_numbers<[1], [0], [0], [1], [0, 0, 1, 1], [], []>} : vector<16x128xf32>, vector<128x128xf32>, vector<16x128xf32> -> vector<16x128xf32>
    %125 = arith.addf %118, %124 : vector<16x128xf32>
    %c4_126 = arith.constant 4 : index
    %c0_127 = arith.constant 0 : index
    %c0_128 = arith.constant 0 : index
    %126 = vector.load %arg16[%c4_126, %c0_127, %c0_128] : memref<9x16x16xf32, #tpu.memory_space<vmem>>, vector<1x16x16xf32>
    %127 = vector.shape_cast %126 : vector<1x16x16xf32> to vector<16x16xf32>
    %cst_129 = arith.constant dense<0.000000e+00> : vector<16x128xf32>
    %128 = tpu.matmul %127, %96, %cst_129 {dimension_numbers = #tpu.dot_dimension_numbers<[1], [0], [0], [1], [0, 0, 1, 1], [], []>} : vector<16x16xf32>, vector<16x128xf32>, vector<16x128xf32> -> vector<16x128xf32>
    %c4_130 = arith.constant 4 : index
    %c0_131 = arith.constant 0 : index
    %c0_132 = arith.constant 0 : index
    %129 = vector.load %arg12[%c4_130, %c0_131, %c0_132] : memref<9x128x128xf32, #tpu.memory_space<vmem>>, vector<1x128x128xf32>
    %130 = vector.shape_cast %129 : vector<1x128x128xf32> to vector<128x128xf32>
    %cst_133 = arith.constant dense<0.000000e+00> : vector<16x128xf32>
    %131 = tpu.matmul %128, %130, %cst_133 {dimension_numbers = #tpu.dot_dimension_numbers<[1], [0], [0], [1], [0, 0, 1, 1], [], []>} : vector<16x128xf32>, vector<128x128xf32>, vector<16x128xf32> -> vector<16x128xf32>
    %132 = arith.addf %125, %131 : vector<16x128xf32>
    %c5_134 = arith.constant 5 : index
    %c0_135 = arith.constant 0 : index
    %c0_136 = arith.constant 0 : index
    %133 = vector.load %arg16[%c5_134, %c0_135, %c0_136] : memref<9x16x16xf32, #tpu.memory_space<vmem>>, vector<1x16x16xf32>
    %134 = vector.shape_cast %133 : vector<1x16x16xf32> to vector<16x16xf32>
    %cst_137 = arith.constant dense<0.000000e+00> : vector<16x128xf32>
    %135 = tpu.matmul %134, %96, %cst_137 {dimension_numbers = #tpu.dot_dimension_numbers<[1], [0], [0], [1], [0, 0, 1, 1], [], []>} : vector<16x16xf32>, vector<16x128xf32>, vector<16x128xf32> -> vector<16x128xf32>
    %c5_138 = arith.constant 5 : index
    %c0_139 = arith.constant 0 : index
    %c0_140 = arith.constant 0 : index
    %136 = vector.load %arg12[%c5_138, %c0_139, %c0_140] : memref<9x128x128xf32, #tpu.memory_space<vmem>>, vector<1x128x128xf32>
    %137 = vector.shape_cast %136 : vector<1x128x128xf32> to vector<128x128xf32>
    %cst_141 = arith.constant dense<0.000000e+00> : vector<16x128xf32>
    %138 = tpu.matmul %135, %137, %cst_141 {dimension_numbers = #tpu.dot_dimension_numbers<[1], [0], [0], [1], [0, 0, 1, 1], [], []>} : vector<16x128xf32>, vector<128x128xf32>, vector<16x128xf32> -> vector<16x128xf32>
    %139 = arith.addf %132, %138 : vector<16x128xf32>
    %c6_142 = arith.constant 6 : index
    %c0_143 = arith.constant 0 : index
    %c0_144 = arith.constant 0 : index
    %140 = vector.load %arg16[%c6_142, %c0_143, %c0_144] : memref<9x16x16xf32, #tpu.memory_space<vmem>>, vector<1x16x16xf32>
    %141 = vector.shape_cast %140 : vector<1x16x16xf32> to vector<16x16xf32>
    %cst_145 = arith.constant dense<0.000000e+00> : vector<16x128xf32>
    %142 = tpu.matmul %141, %96, %cst_145 {dimension_numbers = #tpu.dot_dimension_numbers<[1], [0], [0], [1], [0, 0, 1, 1], [], []>} : vector<16x16xf32>, vector<16x128xf32>, vector<16x128xf32> -> vector<16x128xf32>
    %c6_146 = arith.constant 6 : index
    %c0_147 = arith.constant 0 : index
    %c0_148 = arith.constant 0 : index
    %143 = vector.load %arg12[%c6_146, %c0_147, %c0_148] : memref<9x128x128xf32, #tpu.memory_space<vmem>>, vector<1x128x128xf32>
    %144 = vector.shape_cast %143 : vector<1x128x128xf32> to vector<128x128xf32>
    %cst_149 = arith.constant dense<0.000000e+00> : vector<16x128xf32>
    %145 = tpu.matmul %142, %144, %cst_149 {dimension_numbers = #tpu.dot_dimension_numbers<[1], [0], [0], [1], [0, 0, 1, 1], [], []>} : vector<16x128xf32>, vector<128x128xf32>, vector<16x128xf32> -> vector<16x128xf32>
    %146 = arith.addf %139, %145 : vector<16x128xf32>
    %c7_150 = arith.constant 7 : index
    %c0_151 = arith.constant 0 : index
    %c0_152 = arith.constant 0 : index
    %147 = vector.load %arg16[%c7_150, %c0_151, %c0_152] : memref<9x16x16xf32, #tpu.memory_space<vmem>>, vector<1x16x16xf32>
    %148 = vector.shape_cast %147 : vector<1x16x16xf32> to vector<16x16xf32>
    %cst_153 = arith.constant dense<0.000000e+00> : vector<16x128xf32>
    %149 = tpu.matmul %148, %96, %cst_153 {dimension_numbers = #tpu.dot_dimension_numbers<[1], [0], [0], [1], [0, 0, 1, 1], [], []>} : vector<16x16xf32>, vector<16x128xf32>, vector<16x128xf32> -> vector<16x128xf32>
    %c7_154 = arith.constant 7 : index
    %c0_155 = arith.constant 0 : index
    %c0_156 = arith.constant 0 : index
    %150 = vector.load %arg12[%c7_154, %c0_155, %c0_156] : memref<9x128x128xf32, #tpu.memory_space<vmem>>, vector<1x128x128xf32>
    %151 = vector.shape_cast %150 : vector<1x128x128xf32> to vector<128x128xf32>
    %cst_157 = arith.constant dense<0.000000e+00> : vector<16x128xf32>
    %152 = tpu.matmul %149, %151, %cst_157 {dimension_numbers = #tpu.dot_dimension_numbers<[1], [0], [0], [1], [0, 0, 1, 1], [], []>} : vector<16x128xf32>, vector<128x128xf32>, vector<16x128xf32> -> vector<16x128xf32>
    %153 = arith.addf %146, %152 : vector<16x128xf32>
    %c8_158 = arith.constant 8 : index
    %c0_159 = arith.constant 0 : index
    %c0_160 = arith.constant 0 : index
    %154 = vector.load %arg16[%c8_158, %c0_159, %c0_160] : memref<9x16x16xf32, #tpu.memory_space<vmem>>, vector<1x16x16xf32>
    %155 = vector.shape_cast %154 : vector<1x16x16xf32> to vector<16x16xf32>
    %cst_161 = arith.constant dense<0.000000e+00> : vector<16x128xf32>
    %156 = tpu.matmul %155, %96, %cst_161 {dimension_numbers = #tpu.dot_dimension_numbers<[1], [0], [0], [1], [0, 0, 1, 1], [], []>} : vector<16x16xf32>, vector<16x128xf32>, vector<16x128xf32> -> vector<16x128xf32>
    %c8_162 = arith.constant 8 : index
    %c0_163 = arith.constant 0 : index
    %c0_164 = arith.constant 0 : index
    %157 = vector.load %arg12[%c8_162, %c0_163, %c0_164] : memref<9x128x128xf32, #tpu.memory_space<vmem>>, vector<1x128x128xf32>
    %158 = vector.shape_cast %157 : vector<1x128x128xf32> to vector<128x128xf32>
    %cst_165 = arith.constant dense<0.000000e+00> : vector<16x128xf32>
    %159 = tpu.matmul %156, %158, %cst_165 {dimension_numbers = #tpu.dot_dimension_numbers<[1], [0], [0], [1], [0, 0, 1, 1], [], []>} : vector<16x128xf32>, vector<128x128xf32>, vector<16x128xf32> -> vector<16x128xf32>
    %160 = arith.addf %153, %159 : vector<16x128xf32>
    %c0_166 = arith.constant 0 : index
    %c0_167 = arith.constant 0 : index
    %161 = vector.load %arg13[%c0_166, %c0_167] : memref<1x128xf32, #tpu.memory_space<vmem>>, vector<1x128xf32>
    %162 = vector.broadcast %161 : vector<1x128xf32> to vector<16x128xf32>
    %163 = arith.addf %160, %162 : vector<16x128xf32>
    %cst_168 = arith.constant 0.000000e+00 : f32
    %164 = vector.broadcast %cst_168 : f32 to vector<16x128xf32>
    %165 = arith.maximumf %163, %164 : vector<16x128xf32>
    %c0_169 = arith.constant 0 : index
    %c0_170 = arith.constant 0 : index
    %166 = vector.load %arg14[%c0_169, %c0_170] : memref<128x64xf32, #tpu.memory_space<vmem>>, vector<128x64xf32>
    %cst_171 = arith.constant dense<0.000000e+00> : vector<16x64xf32>
    %167 = tpu.matmul %165, %166, %cst_171 {dimension_numbers = #tpu.dot_dimension_numbers<[1], [0], [0], [1], [0, 0, 1, 1], [], []>} : vector<16x128xf32>, vector<128x64xf32>, vector<16x64xf32> -> vector<16x64xf32>
    %c0_172 = arith.constant 0 : index
    %c0_173 = arith.constant 0 : index
    %168 = vector.load %arg15[%c0_172, %c0_173] : memref<1x64xf32, #tpu.memory_space<vmem>>, vector<1x64xf32>
    %169 = vector.broadcast %168 : vector<1x64xf32> to vector<16x64xf32>
    %170 = arith.addf %167, %169 : vector<16x64xf32>
    %171 = vector.extract_strided_slice %170 {offsets = [0, 0], sizes = [16, 16], strides = [1, 1]} : vector<16x64xf32> to vector<16x16xf32>
    %c0_174 = arith.constant 0 : index
    %c64 = arith.constant 64 : index
    %c0_175 = arith.constant 0 : index
    %172 = vector.load %arg17[%c0_174, %c64, %c0_175] : memref<1x96x16xf32, #tpu.memory_space<vmem>>, vector<1x16x16xf32>
    %173 = vector.shape_cast %172 : vector<1x16x16xf32> to vector<16x16xf32>
    %174 = vector.shape_cast %171 : vector<16x16xf32> to vector<1x16x16xf32>
    tpu.vector_store %arg17[%c0_174, %c64, %c0_175], %174 {strides = array<i32>} : memref<1x96x16xf32, #tpu.memory_space<vmem>>, vector<1x16x16xf32>,
    %175 = vector.extract_strided_slice %170 {offsets = [0, 16], sizes = [16, 16], strides = [1, 1]} : vector<16x64xf32> to vector<16x16xf32>
    %176 = math.exp %175 : vector<16x16xf32>
    %c0_176 = arith.constant 0 : index
    %c64_177 = arith.constant 64 : index
    %c0_178 = arith.constant 0 : index
    %177 = vector.load %arg18[%c0_176, %c64_177, %c0_178] : memref<1x96x16xf32, #tpu.memory_space<vmem>>, vector<1x16x16xf32>
    %178 = vector.shape_cast %177 : vector<1x16x16xf32> to vector<16x16xf32>
    %179 = vector.shape_cast %176 : vector<16x16xf32> to vector<1x16x16xf32>
    tpu.vector_store %arg18[%c0_176, %c64_177, %c0_178], %179 {strides = array<i32>} : memref<1x96x16xf32, #tpu.memory_space<vmem>>, vector<1x16x16xf32>,
    %180 = vector.extract_strided_slice %170 {offsets = [0, 32], sizes = [16, 16], strides = [1, 1]} : vector<16x64xf32> to vector<16x16xf32>
    %c0_179 = arith.constant 0 : index
    %c80 = arith.constant 80 : index
    %c0_180 = arith.constant 0 : index
    %181 = vector.load %arg17[%c0_179, %c80, %c0_180] : memref<1x96x16xf32, #tpu.memory_space<vmem>>, vector<1x16x16xf32>
    %182 = vector.shape_cast %181 : vector<1x16x16xf32> to vector<16x16xf32>
    %183 = vector.shape_cast %180 : vector<16x16xf32> to vector<1x16x16xf32>
    tpu.vector_store %arg17[%c0_179, %c80, %c0_180], %183 {strides = array<i32>} : memref<1x96x16xf32, #tpu.memory_space<vmem>>, vector<1x16x16xf32>,
    %184 = vector.extract_strided_slice %170 {offsets = [0, 48], sizes = [16, 16], strides = [1, 1]} : vector<16x64xf32> to vector<16x16xf32>
    %185 = math.exp %184 : vector<16x16xf32>
    %c0_181 = arith.constant 0 : index
    %c80_182 = arith.constant 80 : index
    %c0_183 = arith.constant 0 : index
    %186 = vector.load %arg18[%c0_181, %c80_182, %c0_183] : memref<1x96x16xf32, #tpu.memory_space<vmem>>, vector<1x16x16xf32>
    %187 = vector.shape_cast %186 : vector<1x16x16xf32> to vector<16x16xf32>
    %188 = vector.shape_cast %185 : vector<16x16xf32> to vector<1x16x16xf32>
    tpu.vector_store %arg18[%c0_181, %c80_182, %c0_183], %188 {strides = array<i32>} : memref<1x96x16xf32, #tpu.memory_space<vmem>>, vector<1x16x16xf32>,
    return
  }
  func.func @transform_0(%arg0: i32) -> (i32, i32, i32) {
    %c0_i32 = arith.constant 0 : i32
    %c0_i32_0 = arith.constant 0 : i32
    %c0_i32_1 = arith.constant 0 : i32
    return %arg0, %c0_i32, %c0_i32_0 : i32, i32, i32
  }
  func.func @transform_1(%arg0: i32) -> (i32, i32) {
    %c0_i32 = arith.constant 0 : i32
    %c0_i32_0 = arith.constant 0 : i32
    %c0_i32_1 = arith.constant 0 : i32
    return %c0_i32, %c0_i32_0 : i32, i32
  }
  func.func @transform_2(%arg0: i32) -> (i32, i32) {
    %c0_i32 = arith.constant 0 : i32
    %c0_i32_0 = arith.constant 0 : i32
    %c0_i32_1 = arith.constant 0 : i32
    return %c0_i32, %c0_i32_0 : i32, i32
  }
  func.func @transform_3(%arg0: i32) -> (i32, i32, i32) {
    %c0_i32 = arith.constant 0 : i32
    %c0_i32_0 = arith.constant 0 : i32
    %c0_i32_1 = arith.constant 0 : i32
    %c0_i32_2 = arith.constant 0 : i32
    return %c0_i32, %c0_i32_0, %c0_i32_1 : i32, i32, i32
  }
  func.func @transform_4(%arg0: i32) -> (i32, i32) {
    %c0_i32 = arith.constant 0 : i32
    %c0_i32_0 = arith.constant 0 : i32
    %c0_i32_1 = arith.constant 0 : i32
    return %c0_i32, %c0_i32_0 : i32, i32
  }
  func.func @transform_5(%arg0: i32) -> (i32, i32) {
    %c0_i32 = arith.constant 0 : i32
    %c0_i32_0 = arith.constant 0 : i32
    %c0_i32_1 = arith.constant 0 : i32
    return %c0_i32, %c0_i32_0 : i32, i32
  }
  func.func @transform_6(%arg0: i32) -> (i32, i32) {
    %c0_i32 = arith.constant 0 : i32
    %c0_i32_0 = arith.constant 0 : i32
    %c0_i32_1 = arith.constant 0 : i32
    return %c0_i32, %c0_i32_0 : i32, i32
  }
  func.func @transform_7(%arg0: i32) -> (i32, i32, i32) {
    %c0_i32 = arith.constant 0 : i32
    %c0_i32_0 = arith.constant 0 : i32
    %c0_i32_1 = arith.constant 0 : i32
    %c0_i32_2 = arith.constant 0 : i32
    return %c0_i32, %c0_i32_0, %c0_i32_1 : i32, i32, i32
  }
  func.func @transform_8(%arg0: i32) -> (i32, i32, i32) {
    %c0_i32 = arith.constant 0 : i32
    %c0_i32_0 = arith.constant 0 : i32
    %c0_i32_1 = arith.constant 0 : i32
    return %arg0, %c0_i32, %c0_i32_0 : i32, i32, i32
  }
  func.func @transform_9(%arg0: i32) -> (i32, i32) {
    %c0_i32 = arith.constant 0 : i32
    %c0_i32_0 = arith.constant 0 : i32
    %c0_i32_1 = arith.constant 0 : i32
    return %c0_i32, %c0_i32_0 : i32, i32
  }
  func.func @transform_10(%arg0: i32) -> (i32, i32) {
    %c0_i32 = arith.constant 0 : i32
    %c0_i32_0 = arith.constant 0 : i32
    %c0_i32_1 = arith.constant 0 : i32
    return %c0_i32, %c0_i32_0 : i32, i32
  }
  func.func @transform_11(%arg0: i32) -> (i32, i32, i32) {
    %c0_i32 = arith.constant 0 : i32
    %c0_i32_0 = arith.constant 0 : i32
    %c0_i32_1 = arith.constant 0 : i32
    %c0_i32_2 = arith.constant 0 : i32
    return %c0_i32, %c0_i32_0, %c0_i32_1 : i32, i32, i32
  }
  func.func @transform_12(%arg0: i32) -> (i32, i32) {
    %c0_i32 = arith.constant 0 : i32
    %c0_i32_0 = arith.constant 0 : i32
    %c0_i32_1 = arith.constant 0 : i32
    return %c0_i32, %c0_i32_0 : i32, i32
  }
  func.func @transform_13(%arg0: i32) -> (i32, i32) {
    %c0_i32 = arith.constant 0 : i32
    %c0_i32_0 = arith.constant 0 : i32
    %c0_i32_1 = arith.constant 0 : i32
    return %c0_i32, %c0_i32_0 : i32, i32
  }
  func.func @transform_14(%arg0: i32) -> (i32, i32) {
    %c0_i32 = arith.constant 0 : i32
    %c0_i32_0 = arith.constant 0 : i32
    %c0_i32_1 = arith.constant 0 : i32
    return %c0_i32, %c0_i32_0 : i32, i32
  }
  func.func @transform_15(%arg0: i32) -> (i32, i32, i32) {
    %c0_i32 = arith.constant 0 : i32
    %c0_i32_0 = arith.constant 0 : i32
    %c0_i32_1 = arith.constant 0 : i32
    %c0_i32_2 = arith.constant 0 : i32
    return %c0_i32, %c0_i32_0, %c0_i32_1 : i32, i32, i32
  }
  func.func @transform_16(%arg0: i32) -> (i32, i32, i32) {
    %c0_i32 = arith.constant 0 : i32
    %c0_i32_0 = arith.constant 0 : i32
    %c0_i32_1 = arith.constant 0 : i32
    return %arg0, %c0_i32, %c0_i32_0 : i32, i32, i32
  }
  func.func @transform_17(%arg0: i32) -> (i32, i32, i32) {
    %c0_i32 = arith.constant 0 : i32
    %c0_i32_0 = arith.constant 0 : i32
    %c0_i32_1 = arith.constant 0 : i32
    return %arg0, %c0_i32, %c0_i32_0 : i32, i32, i32
  }
}

</mosaic_0001>

<bundles_post_ra>
// kernel: forward.1
= control target key start
LH: loop header
LB: loop body
LE: loop exit
PB: predicated region body
PF: predicated region fallthrough
CT: control target
= control target key end

     0   :  { %s4865_s0 = inlined_call_operand.vmem [shape: f32[2,64,8], index: 0, kind: input, shape index: {}]   ;;  %s4866_s1 = inlined_call_operand.hbm [shape: f32[8,64], index: 1, kind: input, shape index: {}]   ;;  %s4867_s2 = inlined_call_operand.vmem [shape: f32[1,64], index: 2, kind: input, shape index: {}, may-alias: {2,4,14}]   ;;  %s4868_s3 = inlined_call_operand.hbm [shape: f32[9,64,64], index: 3, kind: input, shape index: {}]   ;;  %s4869_s4 = inlined_call_operand.vmem [shape: f32[1,64], index: 4, kind: input, shape index: {}, may-alias: {2,4,14}]   ;;  %s4870_s5 = inlined_call_operand.hbm [shape: f32[64,32], index: 5, kind: input, shape index: {}]   ;;  %s4871_s6 = inlined_call_operand.vmem [shape: f32[1,32], index: 6, kind: input, shape index: {}]   ;;  %s4872_s7 = inlined_call_operand.hbm [shape: f32[9,64,64], index: 7, kind: input, shape index: {}]   ;;  %s4873_s8 = inlined_call_operand.hbm [shape: f32[2,16,16], index: 8, kind: input, shape index: {}]   ;;  %s4874_s9 = inlined_call_operand.hbm [shape: f32[16,128], index: 9, kind: input, shape index: {}]   ;;  %s4875_s10 = inlined_call_operand.vmem [shape: f32[1,128], index: 10, kind: input, shape index: {}, may-alias: {10,12}]   ;;  %s4876_s11 = inlined_call_operand.hbm [shape: f32[9,128,128], index: 11, kind: input, shape index: {}]   ;;  %s4877_s12 = inlined_call_operand.vmem [shape: f32[1,128], index: 12, kind: input, shape index: {}, may-alias: {10,12}]   ;;  %s4878_s13 = inlined_call_operand.vmem [shape: f32[128,64], index: 13, kind: input, shape index: {}]   ;;  %s4879_s14 = inlined_call_operand.vmem [shape: f32[1,64], index: 14, kind: input, shape index: {}, may-alias: {2,4,14}]   ;;  %s4880_s15 = inlined_call_operand.vmem [shape: f32[9,16,16], index: 15, kind: input, shape index: {}]   ;;  %s4881_s16 = inlined_call_operand.vmem [shape: f32[2,96,16], index: 16, kind: output, shape index: {0}]   ;;  %s4882_s17 = inlined_call_operand.vmem [shape: f32[2,96,16], index: 17, kind: output, shape index: {1}]  }
   0x1   :  { %4886 = sst [smem:[#allocation21_spill]] %s4865_s0 }
   0x2   :  { %4887 = sst [smem:[#allocation22_spill]] %s4866_s1 }
   0x3   :  { %4888 = sst [smem:[#allocation23_spill]] %s4868_s3 }
   0x4   :  { %4889 = sst [smem:[#allocation24_spill]] %s4870_s5 }
   0x5   :  { %4890 = sst [smem:[#allocation25_spill]] %s4877_s12 }
   0x6   :  { %4891 = sst [smem:[#allocation26_spill]] %s4878_s13 }
   0x7   :  { %4892 = sst [smem:[#allocation27_spill]] %s4879_s14 }
   0x8   :  { %4893 = sst [smem:[#allocation28_spill]] %s4882_s17 }
   0x9   :  { %23 = vsyncpa [#allocation3], 0 }
   0xa   :  { %24 = vsyncpa [#allocation5], 0 }
   0xb   :  { %25 = vsyncpa [#allocation8], 0  ;;  %s4007_s24 = smov 0   ;;  %s4009_s25 = smov 0  }
   0xc   :  { %s4011_s26 = smov 0   ;;  %s4013_s27 = smov 0  }
   0xd LB: > { %s4894_s3 = sld [smem:[#allocation23_spill]]  ;;  %s4031_s30 = sadd.s32 4294967295, %s3904_s27   ;;  %s3904_s27 = sphi %s4013_s27, %s4917_s27   ;;  %s3900_s26 = sphi %s4011_s26, %s4916_s26   ;;  %s3896_s25 = sphi %s4009_s25, %s4915_s25   ;;  %s3892_s24 = sphi %s4007_s24, %s4914_s24  }
   0xe   : > { %p3277_p0 = scmp.ge.s32.totalorder %s3904_s27, 1  ;;  %p225_p1 = scmp.eq.s32.totalorder %s4031_s30, 0 }
   0xf   : > { %p434_p2 = scmp.lt.s32.totalorder %s3904_s27, 3  ;;  %s3906_s19 = smov [#allocation4]  }
  0x10   : > { %s462_s1 = sshll.u32 %s3906_s19, 4  ;;  %s4896_s22 = sld [smem:[#allocation22_spill]]  ;;  %s463_s1 = int_to_ptr.vmem [resolvable:$true] %s462_s1 }
  0x11   : > { %p4036_p3 = pnand %p3277_p0, %p434_p2  ;;  %s4898_s5 = sld [smem:[#allocation24_spill]] }
  0x12   : > { %s3907_s14 = smov [#allocation2]   ;;  %s4884_s13 = smov 128  }
  0x13   : > { %s460_s0 = sshll.u32 %s4894_s3, 4  ;;  %p3535_p4 = pneg %p4036_p3  ;;  %s461_s0 = int_to_ptr.hbm [resolvable:$true] %s460_s0 }
  0x14   : > { %s448_s12 = sshll.u32 %s3907_s14, 4  ;;  %s4885_s17 = smov 8   ;;  %s449_s12 = int_to_ptr.vmem [resolvable:$true] %s448_s12 }
  0x15   : > { %p4047_p5 = pnand %p3535_p4, %p225_p1  ;;  %s3910_s3 = smov [#allocation6]  }
  0x16   : > { %s446_s23 = sshll.u32 %s4896_s22, 4  ;;  %s494_s22 = sshll.u32 %s4872_s7, 4  ;;  %s447_s23 = int_to_ptr.hbm [resolvable:$true] %s446_s23  ;;  %s495_s22 = int_to_ptr.hbm [resolvable:$true] %s494_s22 }
  0x17   : > { %s477_s19 = sshll.u32 %s4898_s5, 4  ;;  %s479_s29 = sshll.u32 %s3910_s3, 4  ;;  %s478_s19 = int_to_ptr.hbm [resolvable:$true] %s477_s19  ;;  %s480_s29 = int_to_ptr.vmem [resolvable:$true] %s479_s29 }
  0x18   : > { %3541 = dma.hbm_to_vmem [thread:$0]  (!%p4047_p5), %s461_s0, 9216, %s463_s1, [#allocation5], %s4884_s13, %s4884_s13, %s4885_s17  }
  0x19   : > { %3538 = dma.hbm_to_vmem [thread:$0]  (!%p4047_p5), %s447_s23, 128, %s449_s12, [#allocation3]  }
  0x1a   : > { %3544 = dma.hbm_to_vmem [thread:$0]  (!%p4047_p5), %s478_s19, 1024, %s480_s29, [#allocation5], %s4884_s13, %s4884_s13, %s4885_s17  }
  0x1b   : > { %s3911_s14 = smov [#allocation7]   ;;  %s508_s23 = sshll.u32 %s4874_s9, 4  ;;  %s509_s23 = int_to_ptr.hbm [resolvable:$true] %s508_s23 }
  0x1c   : > { %s496_s0 = sshll.u32 %s3911_s14, 4  ;;  %s525_s21 = sshll.u32 %s4876_s11, 4  ;;  %s497_s0 = int_to_ptr.vmem [resolvable:$true] %s496_s0  ;;  %s526_s21 = int_to_ptr.hbm [resolvable:$true] %s525_s21 }
  0x1d   : > { %3547 = dma.hbm_to_vmem [thread:$0]  (!%p4047_p5), %s495_s22, 9216, %s497_s0, [#allocation8], %s4884_s13, %s4884_s13, %s4885_s17  }
  0x1e   : > { %s3912_s3 = smov [#allocation10]   ;;  %s3913_s22 = smov [#allocation11]  }
  0x1f   : > { %s510_s29 = sshll.u32 %s3912_s3, 4  ;;  %s527_s14 = sshll.u32 %s3913_s22, 4  ;;  %s511_s29 = int_to_ptr.vmem [resolvable:$true] %s510_s29  ;;  %s528_s14 = int_to_ptr.vmem [resolvable:$true] %s527_s14 }
  0x20   : > { %3550 = dma.hbm_to_vmem [thread:$0]  (!%p4047_p5), %s509_s23, 256, %s511_s29, [#allocation5], %s4884_s13, %s4884_s13, %s4885_s17  }
  0x21   : > { %3553 = dma.hbm_to_vmem [thread:$0]  (!%p4047_p5), %s526_s21, 18432, %s528_s14, [#allocation8], %s4884_s13, %s4884_s13, %s4885_s17  }
  0x22   : > { %s4091_s0 = sadd.s32 1, %s3904_s27   ;;  %s211_s1 = sadd.s32 1, %s3900_s26 }
  0x23   : > { %s208_s12 = ssub.s32 %s3904_s27, %s4091_s0  ;;  %p218_p6 = scmp.ne.s32.totalorder %s3900_s26, %s3896_s25 }
  0x24   : > { %p209_p7 = scmp.eq.s32.totalorder %s208_s12, 0  ;;  %p219_p8 = scmp.eq.s32.totalorder %s3904_s27, 0 }
  0x25   : > { %p224_p9 = scmp.ne.s32.totalorder %s3896_s25, %s3892_s24  ;;  %p3564_p10 = scmp.lt.s32.totalorder %s3904_s27, 2 }
  0x26   : > { %s4103_s23 = scalar_select %p209_p7, %s3900_s26, %s211_s1  }
  0x27   : > { %p220_p11 = por %p219_p8, %p218_p6  ;;  %p4107_p12 = por %p225_p1, %p224_p9 }
  0x28   : > { %s561_s19 = sand.u32 1, %s3904_s27   ;;  %s563_s20 = sand.u32 1, %s3900_s26  }
  0x29   : > { %s3285_s21 = sshll.u32 %s563_s20, 4  ;;  %s3498_s3 = sshll.u32 %s3904_s27, 4 }
  0x2a   : > { %s570_s14 = scalar_lea.hbm %s4873_s8, %s3498_s3  ;;  %s565_s12 = scalar_lea.vmem [#allocation9], %s3285_s21 }
  0x2b   : > { %s573_s13 = sshll.u32 %s565_s12, 4  ;;  %s571_s24 = sshll.u32 %s570_s14, 4  ;;  %s574_s13 = int_to_ptr.vmem [resolvable:$true] %s573_s13  ;;  %s572_s24 = int_to_ptr.hbm [resolvable:$true] %s571_s24 }
  0x2c   : > { %p4119_p13 = pnand %p3564_p10, %p220_p11  ;;  %s562_s17 = scalar_lea.sflag [#allocation3], %s561_s19 }
  0x2d   : > { %s3820_s5 = sshra.s32 %s572_s24, 4  ;;  %s3827_s29 = scalar_lea.hbm %s4873_s8, 32  ;;  %s3821_s5 = int_to_ptr.hbm [resolvable:$true] %s3820_s5 }
  0x2e   : > { %s3822_s20 = scalar_lea.hbm %s3821_s5, 16  ;;  %p3824_p2 = pneg %p4119_p13 }
  0x2f   : > { %p3823_p0 = scmp.ne.s32.totalorder %s3821_s5, %s3822_s20  ;;  %p3828_p6 = scmp.lt.s32.totalorder %s3821_s5, %s4873_s8 }
  0x30   : > { %p3829_p7 = scmp.lt.s32.totalorder %s3827_s29, %s3822_s20 }
  0x31   : > { %p3825_p4 = pnand %p3824_p2, %p3823_p0 }
  0x32   : > { %p3830_p8 = por %p3829_p7, %p3828_p6 }
  0x33   : > { %p3826_p5 = pneg %p3825_p4 }
  0x35   : > { %p3831_p9 = pnand %p3830_p8, %p3826_p5 }
  0x37   : > { %3834 = shalt.err (!%p3831_p9)
}
  0x38   : > { %s4901_s19 = smov 8   ;;  %s4902_s14 = smov 128  }
  0x39   : > { %3557 = dma.hbm_to_vmem [thread:$0]  (!%p4119_p13), %s572_s24, 256, %s574_s13, %s562_s17, %s4902_s14, %s4902_s14, %s4901_s19  }
  0x3a   : > { %585 = sbr.rel (%p4036_p3) target bundleno = 1791 (0x6ff), region = 84 }
  0x3f   : > { %3867 = dma.done.wait (%p225_p1), [#allocation3], 128  }
  0x40   : > { %3869 = vsyncadd (%p225_p1), [#allocation3], 4294967168 }
  0x41   : > { %3871 = dma.done.wait (%p225_p1), [#allocation5], 10240  }
  0x42   : > { %3873 = vsyncadd (%p225_p1), [#allocation5], 4294957056 }
  0x43   : > { %3875 = dma.done.wait (%p225_p1), [#allocation8], 9216  }
  0x44   : > { %3877 = vsyncadd (%p225_p1), [#allocation8], 4294958080  ;;  %s607_s5 = sand.u32 1, %s4031_s30   ;;  %s609_s13 = sand.u32 1, %s3896_s25  }
  0x45   : > { %s4152_s17 = sshll.u32 %s609_s13, 4  ;;  %s608_s18 = scalar_lea.sflag [#allocation3], %s607_s5 }
  0x46   : > { %s611_s12 = scalar_lea.vmem [#allocation9], %s4152_s17 }
  0x47   : > { %3879 = dma.done.wait (%p4107_p12), %s608_s18, 256  }
  0x48   : > { %3881 = vsyncadd (%p4107_p12), %s608_s18, 4294967040 }
  0x49   : > { %3883 = dma.done.wait (%p225_p1), [#allocation5], 256  }
  0x4a   : > { %3885 = vsyncadd (%p225_p1), [#allocation5], 4294967040 }
  0x4b   : > { %3887 = dma.done.wait (%p225_p1), [#allocation8], 18432  }
  0x4c   : > { %3889 = vsyncadd (%p225_p1), [#allocation8], 4294948864  ;;  %p683_p3 = scmp.lt.s32.totalorder %s4031_s30, 1  ;;  %s4903_s20 = sld [smem:[#allocation21_spill]]  ;;  %vm711_vm0 = vcmask 64512   ;;  %v706_v0 = vld [vmem:[#allocation2] sm:$0xff] }
  0x4d   : > { %751 = vmatpush.msra.mxu0 %v706_v0  ;;  %v3614_v16 = vld [vmem:[%s4867_s2] ss:$0 sm:$0xff]  ;;  %v777_v26 = vld [vmem:[#allocation7] sm:$0xff]  ;;  %vm785_vm1 = vcmask 523264   ;;  %v866_v29 = vld [vmem:[#allocation7 + $0x70] sm:$0xff]  ;;  %vm2261_vm2 = vcmask 130048  }
  0x4e   : > { %s4919_s30 = smov (!%p683_p3, %s4031_s30), 1  ;;  %v860_v27 = vld [vmem:[#allocation7 + $0x40] sm:$0xff]  ;;  %v941_v28 = vld [vmem:[#allocation4 + $0x78] sm:$0xff]  ;;  %v940_v30 = vld [vmem:[#allocation4 + $0x70] sm:$0xff]  ;;  %s3914_s17 = smov 112  }
  0x4f   : > { %s3499_s28 = sshll.u32 %s4919_s30, 6  ;;  %v939_v31 = vld [vmem:[#allocation4 + $0x68] sm:$0xff]  ;;  %v938_v32 = vld [vmem:[#allocation4 + $0x60] sm:$0xff]  ;;  %v937_v35 = vld [vmem:[#allocation4 + $0x58] sm:$0xff]  ;;  %s3508_s22 = smul.u32 96, %s4919_s30 }
  0x50   : > { %v778_v33 = vld [vmem:[#allocation7 + $0x8] sm:$0xff]  ;;  %v936_v36 = vld [vmem:[#allocation4 + $0x50] sm:$0xff]  ;;  %v934_v38 = vld [vmem:[#allocation4 + $0x40] sm:$0xff]  ;;  %s4911_s30 = sld [smem:[#allocation26_spill]]  ;;  %s3915_s5 = smov 96  }
  0x51   : > { %v861_v34 = vld [vmem:[#allocation7 + $0x48] sm:$0xff]  ;;  %v779_v39 = vld [vmem:[#allocation7 + $0x10] sm:$0xff]  ;;  %v780_v41 = vld [vmem:[#allocation7 + $0x18] sm:$0xff]  ;;  %s4663_s13 = scalar_lea.vmem %s4881_s16, %s3508_s22  ;;  %s4912_s29 = sld [smem:[#allocation25_spill]] }
  0x52   : > { %s687_s21 = scalar_lea.vmem %s4903_s20, %s3499_s28  ;;  %v935_v37 = vld [vmem:[#allocation4 + $0x48] sm:$0xff]  ;;  %v862_v40 = vld [vmem:[#allocation7 + $0x50] sm:$0xff]  ;;  %v863_v42 = vld [vmem:[#allocation7 + $0x58] sm:$0xff]  ;;  %s4913_s14 = sld [smem:[#allocation27_spill]] }
  0x53   : > { %v698_v1 = vld [vmem:[%s687_s21] sm:$0xff]  ;;  %v699_v2 = vld [vmem:[%s687_s21 + $0x8] sm:$0xff]  ;;  %v700_v3 = vld [vmem:[%s687_s21 + $0x10] sm:$0xff]  ;;  %s3916_s18 = smov 80  }
  0x54   : > { %3300 = vmatmul.msk.f32.vlgmr.msra.gmra.mxu0 %vm711_vm0, %v698_v1  ;;  %v701_v4 = vld [vmem:[%s687_s21 + $0x18] sm:$0xff]  ;;  %v702_v5 = vld [vmem:[%s687_s21 + $0x20] sm:$0xff]  ;;  %v703_v6 = vld [vmem:[%s687_s21 + $0x28] sm:$0xff] }
  0x55   : > { %v704_v7 = vld [vmem:[%s687_s21 + $0x30] sm:$0xff]  ;;  %v705_v8 = vld [vmem:[%s687_s21 + $0x38] sm:$0xff]  ;;  %v867_v43 = vld [vmem:[#allocation7 + $0x78] sm:$0xff] }
  0x56   : > { %v781_v44 = vld [vmem:[#allocation7 + $0x20] sm:$0xff]  ;;  %v782_v46 = vld [vmem:[#allocation7 + $0x28] sm:$0xff]  ;;  %v783_v48 = vld [vmem:[#allocation7 + $0x30] sm:$0xff] }
  0x57   : > { %v864_v45 = vld [vmem:[#allocation7 + $0x60] sm:$0xff]  ;;  %v865_v47 = vld [vmem:[#allocation7 + $0x68] sm:$0xff]  ;;  %v784_v49 = vld [vmem:[#allocation7 + $0x38] sm:$0xff] }
  0x58   : > { %v1073_v50 = vld [vmem:[#allocation7 + $0x80] sm:$0xff]  ;;  %v1074_v51 = vld [vmem:[#allocation7 + $0x88] sm:$0xff]  ;;  %v1075_v52 = vld [vmem:[#allocation7 + $0x90] sm:$0xff] }
  0x59   : > { %v1076_v53 = vld [vmem:[#allocation7 + $0x98] sm:$0xff]  ;;  %v857_v55 = vld [vmem:[#allocation4 + $0x30] sm:$0xff]  ;;  %v856_v56 = vld [vmem:[#allocation4 + $0x28] sm:$0xff] }
  0x5a   : > { %v858_v54 = vld [vmem:[#allocation4 + $0x38] sm:$0xff]  ;;  %v1077_v57 = vld [vmem:[#allocation7 + $0xa0] sm:$0xff]  ;;  %v1078_v60 = vld [vmem:[#allocation7 + $0xa8] sm:$0xff] }
  0x5b   : > { %1039 = vmatpush.msrb.mxu0 %v858_v54  ;;  %v855_v58 = vld [vmem:[#allocation4 + $0x20] sm:$0xff]  ;;  %v854_v59 = vld [vmem:[#allocation4 + $0x18] sm:$0xff]  ;;  %v853_v61 = vld [vmem:[#allocation4 + $0x10] sm:$0xff] }
  0x5c   : > { %3301 = vmatmul.msk.f32.gmra.mxu0 %vm711_vm0, %v699_v2  ;;  %v852_v62 = vld [vmem:[#allocation4 + $0x8] sm:$0xff]  ;;  %v851_v63 = vld [vmem:[#allocation4] sm:$0xff]  ;;  %v1079_v0 = vld [vmem:[#allocation7 + $0xb0] sm:$0xff] }
  0x5d   : > { %1040 = vmatpush.msrb.mxu0 %v857_v55  ;;  %v1080_v1 = vld [vmem:[#allocation7 + $0xb8] sm:$0xff]  ;;  %v1541_v54 = vld [vmem:[#allocation7 + $0x140] sm:$0xff] }
  0x5e   : > { %v1701_v55 = vld [vmem:[#allocation7 + $0x1a0] sm:$0xff] }
  0x5f   : > { %1041 = vmatpush.msrb.mxu0 %v856_v56 }
  0x61   : > { %1042 = vmatpush.msrb.mxu0 %v855_v58  ;;  %v1702_v58 = vld [vmem:[#allocation7 + $0x1a8] sm:$0xff] }
  0x63   : > { %1043 = vmatpush.msrb.mxu0 %v854_v59 }
  0x64   : > { %3302 = vmatmul.msk.f32.gmra.mxu0 %vm711_vm0, %v700_v3  ;;  %v1385_v3 = vld [vmem:[#allocation7 + $0x100] sm:$0xff] }
  0x65   : > { %1044 = vmatpush.msrb.mxu0 %v853_v61  ;;  %v1466_v61 = vld [vmem:[#allocation4 + $0x138] sm:$0xff] }
  0x67   : > { %1045 = vmatpush.msrb.mxu0 %v852_v62  ;;  %v1703_v62 = vld [vmem:[#allocation7 + $0x1b0] sm:$0xff] }
  0x69   : > { %1046 = vmatpush.msrb.mxu0 %v851_v63 }
  0x6c   : > { %3303 = vmatmul.msk.f32.gmra.mxu0 %vm711_vm0, %v701_v4 }
  0x74   : > { %3304 = vmatmul.msk.f32.gmra.mxu0 %vm711_vm0, %v702_v5 }
  0x7c   : > { %3305 = vmatmul.msk.f32.gmra.mxu0 %vm711_vm0, %v703_v6 }
  0x84   : > { %3306 = vmatmul.msk.f32.gmra.mxu0 %vm711_vm0, %v704_v7 }
  0x8c   : > { %3307 = vmatmul.msk.f32.gmra.mxu0 %vm711_vm0, %v705_v8  ;;  %v1154_v8 = vld [vmem:[#allocation4 + $0xb8] sm:$0xff] }
  0xd1   : > { %v753_v9 = vpop.f32.mrf.mxu0 }
  0xd2   : > { %v4218_v25 = vadd.f32 %v3614_v16, %v753_v9  ;;  %v1153_v9 = vld [vmem:[#allocation4 + $0xb0] sm:$0xff] }
  0xd9   : > { %v756_v10 = vpop.f32.mrf.mxu0 }
  0xda   : > { %v4213_v24 = vadd.f32 %v3614_v16, %v756_v10  ;;  %v1152_v10 = vld [vmem:[#allocation4 + $0xa8] sm:$0xff] }
  0xe1   : > { %v759_v11 = vpop.f32.mrf.mxu0 }
  0xe2   : > { %v4208_v23 = vadd.f32 %v3614_v16, %v759_v11 }
  0xe9   : > { %v762_v12 = vpop.f32.mrf.mxu0 }
  0xea   : > { %v4203_v22 = vadd.f32 %v3614_v16, %v762_v12 }
  0xf1   : > { %v765_v13 = vpop.f32.mrf.mxu0 }
  0xf2   : > { %v4198_v21 = vadd.f32 %v3614_v16, %v765_v13  ;;  %v1151_v13 = vld [vmem:[#allocation4 + $0xa0] sm:$0xff] }
  0xf9   : > { %v768_v14 = vpop.f32.mrf.mxu0 }
  0xfa   : > { %v4193_v20 = vadd.f32 %v3614_v16, %v768_v14  ;;  %v1150_v14 = vld [vmem:[#allocation4 + $0x98] sm:$0xff] }
 0x101   : > { %v771_v15 = vpop.f32.mrf.mxu0 }
 0x102   : > { %v4188_v19 = vadd.f32 %v3614_v16, %v771_v15  ;;  %v1149_v15 = vld [vmem:[#allocation4 + $0x90] sm:$0xff] }
 0x109   : > { %v774_v17 = vpop.f32.mrf.mxu0 }
 0x10a   : > { %v4186_v18 = vadd.f32 %v3614_v16, %v774_v17  ;;  %v1148_v16 = vld [vmem:[#allocation4 + $0x88] sm:$0xff] }
 0x10c   : > { %818 = vmatpush.msra.mxu1 %v4186_v18  ;;  %900 = vmatpush.msra.mxu2 %v4186_v18 }
 0x10d   : > { %3500 = vmatpush.msra.mxu3 %v4186_v18 }
 0x10e   : > { %819 = vmatpush.msra.mxu1 %v4188_v19  ;;  %901 = vmatpush.msra.mxu2 %v4188_v19 }
 0x10f   : > { %3501 = vmatpush.msra.mxu3 %v4188_v19 }
 0x110   : > { %820 = vmatpush.msra.mxu1 %v4193_v20  ;;  %902 = vmatpush.msra.mxu2 %v4193_v20 }
 0x111   : > { %3502 = vmatpush.msra.mxu3 %v4193_v20 }
 0x112   : > { %821 = vmatpush.msra.mxu1 %v4198_v21  ;;  %903 = vmatpush.msra.mxu2 %v4198_v21 }
 0x113   : > { %3503 = vmatpush.msra.mxu3 %v4198_v21 }
 0x114   : > { %822 = vmatpush.msra.mxu1 %v4203_v22  ;;  %904 = vmatpush.msra.mxu2 %v4203_v22 }
 0x115   : > { %3504 = vmatpush.msra.mxu3 %v4203_v22 }
 0x116   : > { %823 = vmatpush.msra.mxu1 %v4208_v23  ;;  %905 = vmatpush.msra.mxu2 %v4208_v23 }
 0x117   : > { %3505 = vmatpush.msra.mxu3 %v4208_v23 }
 0x118   : > { %824 = vmatpush.msra.mxu1 %v4213_v24  ;;  %906 = vmatpush.msra.mxu2 %v4213_v24 }
 0x119   : > { %3506 = vmatpush.msra.mxu3 %v4213_v24 }
 0x11a   : > { %825 = vmatpush.msra.mxu1 %v4218_v25  ;;  %907 = vmatpush.msra.mxu2 %v4218_v25 }
 0x11b   : > { %3507 = vmatpush.msra.mxu3 %v4218_v25  ;;  %3308 = vmatmul.msk.f32.vlgmr.msra.gmra.mxu1 %vm785_vm1, %v777_v26 }
 0x11c   : > { %3316 = vmatmul.msk.f32.vlgmr.msra.gmra.mxu2 %vm785_vm1, %v860_v27  ;;  %1113 = vmatpush.msrb.mxu1 %v4186_v18  ;;  %v1147_v27 = vld [vmem:[#allocation4 + $0x80] sm:$0xff] }
 0x11d   : > { %974 = vmatpush.msrb.mxu3 %v941_v28  ;;  %1187 = vmatpush.msrb.mxu2 %v1154_v8  ;;  %v1704_v8 = vld [vmem:[#allocation7 + $0x1b8] sm:$0xff] }
 0x11e   : > { %3322 = vmatmul.msk.f32.vlgmr.msra.gmra.mxu3 %vm785_vm1, %v866_v29  ;;  %1114 = vmatpush.msrb.mxu1 %v4188_v19 }
 0x11f   : > { %975 = vmatpush.msrb.mxu3 %v940_v30  ;;  %1188 = vmatpush.msrb.mxu2 %v1153_v9 }
 0x120   : > { %1115 = vmatpush.msrb.mxu1 %v4193_v20 }
 0x121   : > { %976 = vmatpush.msrb.mxu3 %v939_v31  ;;  %1189 = vmatpush.msrb.mxu2 %v1152_v10  ;;  %v1307_v10 = vld [vmem:[#allocation4 + $0xe0] sm:$0xff] }
 0x122   : > { %1116 = vmatpush.msrb.mxu1 %v4198_v21 }
 0x123   : > { %977 = vmatpush.msrb.mxu3 %v938_v32  ;;  %3309 = vmatmul.msk.f32.gmra.mxu1 %vm785_vm1, %v778_v33  ;;  %v1386_v32 = vld [vmem:[#allocation7 + $0x108] sm:$0xff] }
 0x124   : > { %3317 = vmatmul.msk.f32.gmra.mxu2 %vm785_vm1, %v861_v34  ;;  %1117 = vmatpush.msrb.mxu1 %v4203_v22 }
 0x125   : > { %978 = vmatpush.msrb.mxu3 %v937_v35  ;;  %1190 = vmatpush.msrb.mxu2 %v1151_v13  ;;  %v1387_v35 = vld [vmem:[#allocation7 + $0x110] sm:$0xff]  ;;  %v1306_v13 = vld [vmem:[#allocation4 + $0xd8] sm:$0xff] }
 0x126   : > { %1118 = vmatpush.msrb.mxu1 %v4208_v23  ;;  %3323 = vmatmul.msk.f32.gmra.mxu3 %vm785_vm1, %v867_v43 }
 0x127   : > { %979 = vmatpush.msrb.mxu3 %v936_v36  ;;  %1191 = vmatpush.msrb.mxu2 %v1150_v14  ;;  %v1460_v14 = vld [vmem:[#allocation4 + $0x108] sm:$0xff] }
 0x128   : > { %1119 = vmatpush.msrb.mxu1 %v4213_v24 }
 0x129   : > { %980 = vmatpush.msrb.mxu3 %v935_v37  ;;  %1192 = vmatpush.msrb.mxu2 %v1149_v15  ;;  %v1305_v15 = vld [vmem:[#allocation4 + $0xd0] sm:$0xff] }
 0x12a   : > { %1120 = vmatpush.msrb.mxu1 %v4218_v25 }
 0x12b   : > { %981 = vmatpush.msrb.mxu3 %v934_v38  ;;  %3310 = vmatmul.msk.f32.gmra.mxu1 %vm785_vm1, %v779_v39  ;;  %v1388_v38 = vld [vmem:[#allocation7 + $0x118] sm:$0xff]  ;;  %v1229_v39 = vld [vmem:[#allocation7 + $0xc0] sm:$0xff] }
 0x12c   : > { %1425 = vmatpush.msra.mxu1 %v4186_v18  ;;  %3318 = vmatmul.msk.f32.gmra.mxu2 %vm785_vm1, %v862_v40 }
 0x12d   : > { %1269 = vmatpush.msra.mxu3 %v4186_v18  ;;  %1193 = vmatpush.msrb.mxu2 %v1148_v16 }
 0x12e   : > { %1426 = vmatpush.msra.mxu1 %v4188_v19 }
 0x12f   : > { %1270 = vmatpush.msra.mxu3 %v4188_v19  ;;  %1194 = vmatpush.msrb.mxu2 %v1147_v27  ;;  %v2009_v27 = vld [vmem:[#allocation7 + $0x200] sm:$0xff] }
 0x130   : > { %1427 = vmatpush.msra.mxu1 %v4193_v20 }
 0x131   : > { %1271 = vmatpush.msra.mxu3 %v4193_v20  ;;  %1499 = vmatpush.msra.mxu2 %v1466_v61  ;;  %v1619_v61 = vld [vmem:[#allocation4 + $0x160] sm:$0xff] }
 0x132   : > { %1428 = vmatpush.msra.mxu1 %v4198_v21 }
 0x133   : > { %1272 = vmatpush.msra.mxu3 %v4198_v21  ;;  %3311 = vmatmul.msk.f32.gmra.mxu1 %vm785_vm1, %v780_v41  ;;  %v1389_v41 = vld [vmem:[#allocation7 + $0x120] sm:$0xff] }
 0x134   : > { %1429 = vmatpush.msra.mxu1 %v4203_v22  ;;  %3319 = vmatmul.msk.f32.gmra.mxu2 %vm785_vm1, %v863_v42  ;;  %v1230_v42 = vld [vmem:[#allocation7 + $0xc8] sm:$0xff] }
 0x135   : > { %1273 = vmatpush.msra.mxu3 %v4203_v22 }
 0x136   : > { %1430 = vmatpush.msra.mxu1 %v4208_v23 }
 0x137   : > { %1274 = vmatpush.msra.mxu3 %v4208_v23 }
 0x138   : > { %1431 = vmatpush.msra.mxu1 %v4213_v24 }
 0x139   : > { %1275 = vmatpush.msra.mxu3 %v4213_v24 }
 0x13a   : > { %1432 = vmatpush.msra.mxu1 %v4218_v25 }
 0x13b   : > { %1276 = vmatpush.msra.mxu3 %v4218_v25  ;;  %3312 = vmatmul.msk.f32.gmra.mxu1 %vm785_vm1, %v781_v44  ;;  %v1392_v44 = vld [vmem:[#allocation7 + $0x138] sm:$0xff] }
 0x13c   : > { %3320 = vmatmul.msk.f32.gmra.mxu2 %vm785_vm1, %v864_v45 }
 0x143   : > { %3313 = vmatmul.msk.f32.gmra.mxu1 %vm785_vm1, %v782_v46  ;;  %v1234_v46 = vld [vmem:[#allocation7 + $0xe8] sm:$0xff] }
 0x144   : > { %3321 = vmatmul.msk.f32.gmra.mxu2 %vm785_vm1, %v865_v47  ;;  %v1698_v47 = vld [vmem:[#allocation7 + $0x188] sm:$0xff] }
 0x14b   : > { %3314 = vmatmul.msk.f32.gmra.mxu1 %vm785_vm1, %v783_v48 }
 0x153   : > { %3315 = vmatmul.msk.f32.gmra.mxu1 %vm785_vm1, %v784_v49  ;;  %v1235_v49 = vld [vmem:[#allocation7 + $0xf0] sm:$0xff] }
 0x15b   : > { %3340 = vmatmul.msk.f32.vlgmr.msrb.gmra.mxu1 %vm785_vm1, %v1073_v50  ;;  %v1699_v50 = vld [vmem:[#allocation7 + $0x190] sm:$0xff] }
 0x15c   : > { %1737 = vmatpush.msrb.mxu1 %v4186_v18 }
 0x15e   : > { %1738 = vmatpush.msrb.mxu1 %v4188_v19 }
 0x160   : > { %1739 = vmatpush.msrb.mxu1 %v4193_v20 }
 0x162   : > { %1740 = vmatpush.msrb.mxu1 %v4198_v21 }
 0x163   : > { %3341 = vmatmul.msk.f32.gmra.mxu1 %vm785_vm1, %v1074_v51 }
 0x164   : > { %1741 = vmatpush.msrb.mxu1 %v4203_v22 }
 0x166   : > { %1742 = vmatpush.msrb.mxu1 %v4208_v23 }
 0x168   : > { %1743 = vmatpush.msrb.mxu1 %v4213_v24 }
 0x16a   : > { %1744 = vmatpush.msrb.mxu1 %v4218_v25 }
 0x16b   : > { %3342 = vmatmul.msk.f32.gmra.mxu1 %vm785_vm1, %v1075_v52  ;;  %v1236_v52 = vld [vmem:[#allocation7 + $0xf8] sm:$0xff] }
 0x173   : > { %3343 = vmatmul.msk.f32.gmra.mxu1 %vm785_vm1, %v1076_v53  ;;  %v1700_v53 = vld [vmem:[#allocation7 + $0x198] sm:$0xff] }
 0x17b   : > { %3344 = vmatmul.msk.f32.gmra.mxu1 %vm785_vm1, %v1077_v57  ;;  %v1542_v57 = vld [vmem:[#allocation7 + $0x148] sm:$0xff] }
 0x183   : > { %3345 = vmatmul.msk.f32.gmra.mxu1 %vm785_vm1, %v1078_v60  ;;  %v1543_v60 = vld [vmem:[#allocation7 + $0x150] sm:$0xff] }
 0x18b   : > { %3346 = vmatmul.msk.f32.gmra.mxu1 %vm785_vm1, %v1079_v0  ;;  %v1465_v0 = vld [vmem:[#allocation4 + $0x130] sm:$0xff] }
 0x18c   : > { %1500 = vmatpush.msra.mxu2 %v1465_v0  ;;  %v1618_v0 = vld [vmem:[#allocation4 + $0x158] sm:$0xff] }
 0x193   : > { %3347 = vmatmul.msk.f32.gmra.mxu1 %vm785_vm1, %v1080_v1  ;;  %v1310_v1 = vld [vmem:[#allocation4 + $0xf8] sm:$0xff] }
 0x194   : > { %1343 = vmatpush.msra.mxu0 %v1310_v1  ;;  %v1772_v1 = vld [vmem:[#allocation4 + $0x188] sm:$0xff] }
 0x198   : > { %v827_v2 = vpop.f32.mrf.mxu1 }
 0x199   : > { %3332 = vmatmul.msk.f32.vlgmr.msrb.gmra.mxu0 %vm785_vm1, %v827_v2  ;;  %v1464_v2 = vld [vmem:[#allocation4 + $0x128] sm:$0xff] }
 0x19a   : > { %1501 = vmatpush.msra.mxu2 %v1464_v2  ;;  %v1857_v2 = vld [vmem:[#allocation7 + $0x1e0] sm:$0xff] }
 0x19b   : > { %3372 = vmatmul.msk.f32.vlgmr.msra.gmra.mxu1 %vm785_vm1, %v1385_v3  ;;  %v1309_v3 = vld [vmem:[#allocation4 + $0xf0] sm:$0xff] }
 0x19c   : > { %2049 = vmatpush.msra.mxu1 %v4186_v18  ;;  %1344 = vmatpush.msra.mxu0 %v1309_v3  ;;  %v1617_v3 = vld [vmem:[#allocation4 + $0x150] sm:$0xff] }
 0x19e   : > { %2050 = vmatpush.msra.mxu1 %v4188_v19 }
 0x19f   : > { %v909_v4 = vpop.f32.mrf.mxu2 }
 0x1a0   : > { %3324 = vmatmul.msk.f32.vlgmr.msrb.gmra.mxu3 %vm785_vm1, %v909_v4  ;;  %v830_v5 = vpop.f32.mrf.mxu1  ;;  %2051 = vmatpush.msra.mxu1 %v4193_v20  ;;  %v1544_v4 = vld [vmem:[#allocation7 + $0x158] sm:$0xff] }
 0x1a1   : > { %1581 = vmatpush.msrb.mxu3 %v4186_v18  ;;  %3333 = vmatmul.msk.f32.gmra.mxu0 %vm785_vm1, %v830_v5  ;;  %v927_v33 = vpop.f32.mrf.mxu3  ;;  %v1463_v5 = vld [vmem:[#allocation4 + $0x120] sm:$0xff] }
 0x1a2   : > { %2052 = vmatpush.msra.mxu1 %v4198_v21  ;;  %1502 = vmatpush.msra.mxu2 %v1463_v5 }
 0x1a3   : > { %1582 = vmatpush.msrb.mxu3 %v4188_v19  ;;  %3373 = vmatmul.msk.f32.gmra.mxu1 %vm785_vm1, %v1386_v32  ;;  %v2010_v32 = vld [vmem:[#allocation7 + $0x208] sm:$0xff] }
 0x1a4   : > { %2053 = vmatpush.msra.mxu1 %v4203_v22 }
 0x1a5   : > { %1583 = vmatpush.msrb.mxu3 %v4193_v20 }
 0x1a6   : > { %2054 = vmatpush.msra.mxu1 %v4208_v23 }
 0x1a7   : > { %1584 = vmatpush.msrb.mxu3 %v4198_v21  ;;  %v912_v6 = vpop.f32.mrf.mxu2 }
 0x1a8   : > { %3325 = vmatmul.msk.f32.gmra.mxu3 %vm785_vm1, %v912_v6  ;;  %2055 = vmatpush.msra.mxu1 %v4213_v24  ;;  %v833_v7 = vpop.f32.mrf.mxu1  ;;  %v1308_v6 = vld [vmem:[#allocation4 + $0xe8] sm:$0xff] }
 0x1a9   : > { %1585 = vmatpush.msrb.mxu3 %v4203_v22  ;;  %3334 = vmatmul.msk.f32.gmra.mxu0 %vm785_vm1, %v833_v7  ;;  %v930_v36 = vpop.f32.mrf.mxu3  ;;  %v1462_v7 = vld [vmem:[#allocation4 + $0x118] sm:$0xff] }
 0x1aa   : > { %2056 = vmatpush.msra.mxu1 %v4218_v25  ;;  %1345 = vmatpush.msra.mxu0 %v1308_v6  ;;  %v1616_v6 = vld [vmem:[#allocation4 + $0x148] sm:$0xff] }
 0x1ab   : > { %1586 = vmatpush.msrb.mxu3 %v4208_v23  ;;  %3374 = vmatmul.msk.f32.gmra.mxu1 %vm785_vm1, %v1387_v35 }
 0x1ac   : > { %1503 = vmatpush.msra.mxu2 %v1462_v7  ;;  %1346 = vmatpush.msra.mxu0 %v1307_v10  ;;  %v1615_v10 = vld [vmem:[#allocation4 + $0x140] sm:$0xff] }
 0x1ad   : > { %1587 = vmatpush.msrb.mxu3 %v4213_v24 }
 0x1ae   : > { %1347 = vmatpush.msra.mxu0 %v1306_v13 }
 0x1af   : > { %1588 = vmatpush.msrb.mxu3 %v4218_v25  ;;  %v915_v11 = vpop.f32.mrf.mxu2 }
 0x1b0   : > { %3326 = vmatmul.msk.f32.gmra.mxu3 %vm785_vm1, %v915_v11  ;;  %v836_v12 = vpop.f32.mrf.mxu1  ;;  %v1461_v11 = vld [vmem:[#allocation4 + $0x110] sm:$0xff]  ;;  %1348 = vmatpush.msra.mxu0 %v1305_v15 }
 0x1b1   : > { %3335 = vmatmul.msk.f32.gmra.mxu0 %vm785_vm1, %v836_v12  ;;  %1504 = vmatpush.msra.mxu2 %v1461_v11  ;;  %v1545_v12 = vld [vmem:[#allocation7 + $0x160] sm:$0xff]  ;;  %v1858_v11 = vld [vmem:[#allocation7 + $0x1e8] sm:$0xff]  ;;  %v1859_v15 = vld [vmem:[#allocation7 + $0x1f0] sm:$0xff] }
 0x1b3   : > { %3375 = vmatmul.msk.f32.gmra.mxu1 %vm785_vm1, %v1388_v38  ;;  %1505 = vmatpush.msra.mxu2 %v1460_v14  ;;  %v1548_v38 = vld [vmem:[#allocation7 + $0x178] sm:$0xff] }
 0x1b7   : > { %v918_v17 = vpop.f32.mrf.mxu2 }
 0x1b8   : > { %3327 = vmatmul.msk.f32.gmra.mxu3 %vm785_vm1, %v918_v17  ;;  %v839_v26 = vpop.f32.mrf.mxu1  ;;  %v1459_v17 = vld [vmem:[#allocation4 + $0x100] sm:$0xff] }
 0x1b9   : > { %3336 = vmatmul.msk.f32.gmra.mxu0 %vm785_vm1, %v839_v26  ;;  %v1304_v26 = vld [vmem:[#allocation4 + $0xc8] sm:$0xff]  ;;  %1506 = vmatpush.msra.mxu2 %v1459_v17 }
 0x1ba   : > { %1349 = vmatpush.msra.mxu0 %v1304_v26 }
 0x1bb   : > { %3376 = vmatmul.msk.f32.gmra.mxu1 %vm785_vm1, %v1389_v41 }
 0x1bf   : > { %v921_v28 = vpop.f32.mrf.mxu2 }
 0x1c0   : > { %3328 = vmatmul.msk.f32.gmra.mxu3 %vm785_vm1, %v921_v28  ;;  %v842_v29 = vpop.f32.mrf.mxu1 }
 0x1c1   : > { %3337 = vmatmul.msk.f32.gmra.mxu0 %vm785_vm1, %v842_v29  ;;  %v1303_v29 = vld [vmem:[#allocation4 + $0xc0] sm:$0xff] }
 0x1c2   : > { %1350 = vmatpush.msra.mxu0 %v1303_v29  ;;  %v1860_v29 = vld [vmem:[#allocation7 + $0x1f8] sm:$0xff] }
 0x1c7   : > { %v924_v30 = vpop.f32.mrf.mxu2 }
 0x1c8   : > { %3329 = vmatmul.msk.f32.gmra.mxu3 %vm785_vm1, %v924_v30  ;;  %v845_v31 = vpop.f32.mrf.mxu1  ;;  %v1546_v30 = vld [vmem:[#allocation7 + $0x168] sm:$0xff] }
 0x1c9   : > { %3338 = vmatmul.msk.f32.gmra.mxu0 %vm785_vm1, %v845_v31 }
 0x1d0   : > { %3330 = vmatmul.msk.f32.gmra.mxu3 %vm785_vm1, %v927_v33  ;;  %v848_v34 = vpop.f32.mrf.mxu1 }
 0x1d1   : > { %3339 = vmatmul.msk.f32.gmra.mxu0 %vm785_vm1, %v848_v34  ;;  %v1547_v34 = vld [vmem:[#allocation7 + $0x170] sm:$0xff] }
 0x1d8   : > { %3331 = vmatmul.msk.f32.gmra.mxu3 %vm785_vm1, %v930_v36  ;;  %v1122_v37 = vpop.f32.mrf.mxu1  ;;  %v2011_v36 = vld [vmem:[#allocation7 + $0x210] sm:$0xff] }
 0x1d9   : > { %3348 = vmatmul.msk.f32.vlgmr.msrb.gmra.mxu2 %vm785_vm1, %v1122_v37 }
 0x1e0   : > { %3356 = vmatmul.msk.f32.vlgmr.msra.gmra.mxu3 %vm785_vm1, %v1229_v39  ;;  %v1125_v40 = vpop.f32.mrf.mxu1 }
 0x1e1   : > { %1893 = vmatpush.msra.mxu3 %v4186_v18  ;;  %3349 = vmatmul.msk.f32.gmra.mxu2 %vm785_vm1, %v1125_v40  ;;  %v1390_v18 = vld [vmem:[#allocation7 + $0x128] sm:$0xff]  ;;  %v2012_v40 = vld [vmem:[#allocation7 + $0x218] sm:$0xff] }
 0x1e2   : > { %3377 = vmatmul.msk.f32.gmra.mxu1 %vm785_vm1, %v1390_v18  ;;  %v2013_v18 = vld [vmem:[#allocation7 + $0x220] sm:$0xff] }
 0x1e3   : > { %1894 = vmatpush.msra.mxu3 %v4188_v19  ;;  %v1231_v19 = vld [vmem:[#allocation7 + $0xd0] sm:$0xff] }
 0x1e5   : > { %1895 = vmatpush.msra.mxu3 %v4193_v20 }
 0x1e7   : > { %1896 = vmatpush.msra.mxu3 %v4198_v21  ;;  %v1391_v21 = vld [vmem:[#allocation7 + $0x130] sm:$0xff] }
 0x1e8   : > { %3357 = vmatmul.msk.f32.gmra.mxu3 %vm785_vm1, %v1230_v42  ;;  %v1128_v43 = vpop.f32.mrf.mxu1  ;;  %v1853_v42 = vld [vmem:[#allocation7 + $0x1c0] sm:$0xff] }
 0x1e9   : > { %1897 = vmatpush.msra.mxu3 %v4203_v22  ;;  %3350 = vmatmul.msk.f32.gmra.mxu2 %vm785_vm1, %v1128_v43  ;;  %v1232_v22 = vld [vmem:[#allocation7 + $0xd8] sm:$0xff] }
 0x1ea   : > { %3378 = vmatmul.msk.f32.gmra.mxu1 %vm785_vm1, %v1391_v21 }
 0x1eb   : > { %1898 = vmatpush.msra.mxu3 %v4208_v23 }
 0x1ed   : > { %1899 = vmatpush.msra.mxu3 %v4213_v24  ;;  %v1233_v24 = vld [vmem:[#allocation7 + $0xe0] sm:$0xff] }
 0x1ef   : > { %1900 = vmatpush.msra.mxu3 %v4218_v25  ;;  %v1697_v25 = vld [vmem:[#allocation7 + $0x180] sm:$0xff] }
 0x1f0   : > { %3358 = vmatmul.msk.f32.gmra.mxu3 %vm785_vm1, %v1231_v19  ;;  %v1131_v20 = vpop.f32.mrf.mxu1 }
 0x1f1   : > { %3351 = vmatmul.msk.f32.gmra.mxu2 %vm785_vm1, %v1131_v20  ;;  %v1854_v20 = vld [vmem:[#allocation7 + $0x1c8] sm:$0xff] }
 0x1f2   : > { %3379 = vmatmul.msk.f32.gmra.mxu1 %vm785_vm1, %v1392_v44 }
 0x1f8   : > { %3359 = vmatmul.msk.f32.gmra.mxu3 %vm785_vm1, %v1232_v22  ;;  %v1134_v23 = vpop.f32.mrf.mxu1  ;;  %v2014_v22 = vld [vmem:[#allocation7 + $0x228] sm:$0xff] }
 0x1f9   : > { %3352 = vmatmul.msk.f32.gmra.mxu2 %vm785_vm1, %v1134_v23  ;;  %v1855_v23 = vld [vmem:[#allocation7 + $0x1d0] sm:$0xff] }
 0x1fa   : > { %3404 = vmatmul.msk.f32.vlgmr.msrb.gmra.mxu1 %vm785_vm1, %v1697_v25  ;;  %v1778_v25 = vld [vmem:[#allocation4 + $0x1b8] sm:$0xff] }
 0x1fb   : > { %1811 = vmatpush.msrb.mxu2 %v1778_v25  ;;  %v2087_v25 = vld [vmem:[#allocation4 + $0x220] sm:$0xff] }
 0x200   : > { %3360 = vmatmul.msk.f32.gmra.mxu3 %vm785_vm1, %v1233_v24  ;;  %v1137_v45 = vpop.f32.mrf.mxu1 }
 0x201   : > { %3353 = vmatmul.msk.f32.gmra.mxu2 %vm785_vm1, %v1137_v45  ;;  %v2015_v45 = vld [vmem:[#allocation7 + $0x230] sm:$0xff] }
 0x202   : > { %3405 = vmatmul.msk.f32.gmra.mxu1 %vm785_vm1, %v1698_v47  ;;  %v1777_v47 = vld [vmem:[#allocation4 + $0x1b0] sm:$0xff] }
 0x203   : > { %1812 = vmatpush.msrb.mxu2 %v1777_v47  ;;  %v2086_v47 = vld [vmem:[#allocation4 + $0x218] sm:$0xff] }
 0x208   : > { %3361 = vmatmul.msk.f32.gmra.mxu3 %vm785_vm1, %v1234_v46  ;;  %v1140_v48 = vpop.f32.mrf.mxu1 }
 0x209   : > { %3354 = vmatmul.msk.f32.gmra.mxu2 %vm785_vm1, %v1140_v48  ;;  %v1856_v48 = vld [vmem:[#allocation7 + $0x1d8] sm:$0xff] }
 0x20a   : > { %3406 = vmatmul.msk.f32.gmra.mxu1 %vm785_vm1, %v1699_v50  ;;  %v1776_v50 = vld [vmem:[#allocation4 + $0x1a8] sm:$0xff] }
 0x20b   : > { %1813 = vmatpush.msrb.mxu2 %v1776_v50  ;;  %v1931_v50 = vld [vmem:[#allocation4 + $0x1e0] sm:$0xff] }
 0x210   : > { %3362 = vmatmul.msk.f32.gmra.mxu3 %vm785_vm1, %v1235_v49  ;;  %v1143_v51 = vpop.f32.mrf.mxu1  ;;  %v1622_v49 = vld [vmem:[#allocation4 + $0x178] sm:$0xff] }
 0x211   : > { %3355 = vmatmul.msk.f32.gmra.mxu2 %vm785_vm1, %v1143_v51  ;;  %1655 = vmatpush.msrb.mxu0 %v1622_v49  ;;  %v1621_v51 = vld [vmem:[#allocation4 + $0x170] sm:$0xff] }
 0x212   : > { %3407 = vmatmul.msk.f32.gmra.mxu1 %vm785_vm1, %v1700_v53 }
 0x213   : > { %1656 = vmatpush.msrb.mxu0 %v1621_v51  ;;  %v2085_v51 = vld [vmem:[#allocation4 + $0x210] sm:$0xff] }
 0x216   : > { %v4416_v17 = vpop.f32.mrf.mxu0 }
 0x218   : > { %3363 = vmatmul.msk.f32.gmra.mxu3 %vm785_vm1, %v1236_v52  ;;  %v1434_v16 = vpop.f32.mrf.mxu1  ;;  %v1775_v52 = vld [vmem:[#allocation4 + $0x1a0] sm:$0xff] }
 0x219   : > { %3380 = vmatmul.msk.f32.vlgmr.msra.gmra.mxu2 %vm785_vm1, %v1434_v16 }
 0x21a   : > { %3408 = vmatmul.msk.f32.gmra.mxu1 %vm785_vm1, %v1701_v55  ;;  %v1620_v55 = vld [vmem:[#allocation4 + $0x168] sm:$0xff]  ;;  %1814 = vmatpush.msrb.mxu2 %v1775_v52  ;;  %v1930_v52 = vld [vmem:[#allocation4 + $0x1d8] sm:$0xff] }
 0x21b   : > { %1657 = vmatpush.msrb.mxu0 %v1620_v55 }
 0x21d   : > { %1658 = vmatpush.msrb.mxu0 %v1619_v61  ;;  %v1928_v61 = vld [vmem:[#allocation4 + $0x1c8] sm:$0xff] }
 0x21f   : > { %1659 = vmatpush.msrb.mxu0 %v1618_v0  ;;  %v1927_v0 = vld [vmem:[#allocation4 + $0x1c0] sm:$0xff] }
 0x220   : > { %3388 = vmatmul.msk.f32.vlgmr.msrb.gmra.mxu3 %vm785_vm1, %v1541_v54  ;;  %v1437_v31 = vpop.f32.mrf.mxu1 }
 0x221   : > { %3381 = vmatmul.msk.f32.gmra.mxu2 %vm785_vm1, %v1437_v31  ;;  %1660 = vmatpush.msrb.mxu0 %v1617_v3 }
 0x222   : > { %3409 = vmatmul.msk.f32.gmra.mxu1 %vm785_vm1, %v1702_v58  ;;  %v2016_v58 = vld [vmem:[#allocation7 + $0x238] sm:$0xff] }
 0x223   : > { %v4351_v56 = vpop.f32.mrf.mxu3  ;;  %1661 = vmatpush.msrb.mxu0 %v1616_v6 }
 0x225   : > { %1662 = vmatpush.msrb.mxu0 %v1615_v10 }
 0x228   : > { %3389 = vmatmul.msk.f32.gmra.mxu3 %vm785_vm1, %v1542_v57  ;;  %v1440_v35 = vpop.f32.mrf.mxu1  ;;  %v1774_v57 = vld [vmem:[#allocation4 + $0x198] sm:$0xff] }
 0x229   : > { %3382 = vmatmul.msk.f32.gmra.mxu2 %vm785_vm1, %v1440_v35 }
 0x22a   : > { %3410 = vmatmul.msk.f32.gmra.mxu1 %vm785_vm1, %v1703_v62  ;;  %1815 = vmatpush.msrb.mxu2 %v1774_v57  ;;  %v1773_v62 = vld [vmem:[#allocation4 + $0x190] sm:$0xff] }
 0x22b   : > { %v4355_v59 = vpop.f32.mrf.mxu3  ;;  %v1929_v57 = vld [vmem:[#allocation4 + $0x1d0] sm:$0xff] }
 0x22c   : > { %1816 = vmatpush.msrb.mxu2 %v1773_v62 }
 0x22e   : > { %1817 = vmatpush.msrb.mxu2 %v1772_v1 }
 0x230   : > { %3390 = vmatmul.msk.f32.gmra.mxu3 %vm785_vm1, %v1543_v60  ;;  %v1443_v39 = vpop.f32.mrf.mxu1 }
 0x231   : > { %3383 = vmatmul.msk.f32.gmra.mxu2 %vm785_vm1, %v1443_v39 }
 0x232   : > { %3411 = vmatmul.msk.f32.gmra.mxu1 %vm785_vm1, %v1704_v8 }
 0x233   : > { %v4359_v63 = vpop.f32.mrf.mxu3 }
 0x238   : > { %3391 = vmatmul.msk.f32.gmra.mxu3 %vm785_vm1, %v1544_v4  ;;  %v1446_v43 = vpop.f32.mrf.mxu1  ;;  %v1771_v4 = vld [vmem:[#allocation4 + $0x180] sm:$0xff] }
 0x239   : > { %3384 = vmatmul.msk.f32.gmra.mxu2 %vm785_vm1, %v1446_v43  ;;  %v2090_v43 = vld [vmem:[#allocation4 + $0x238] sm:$0xff] }
 0x23a   : > { %3436 = vmatmul.msk.f32.vlgmr.msra.gmra.mxu1 %vm785_vm1, %v2009_v27  ;;  %1818 = vmatpush.msrb.mxu2 %v1771_v4 }
 0x23b   : > { %v4363_v9 = vpop.f32.mrf.mxu3 }
 0x23c   : > { %2123 = vmatpush.msra.mxu2 %v2090_v43 }
 0x240   : > { %3392 = vmatmul.msk.f32.gmra.mxu3 %vm785_vm1, %v1545_v12 }
 0x242   : > { %3437 = vmatmul.msk.f32.gmra.mxu1 %vm785_vm1, %v2010_v32  ;;  %v4424_v32 = vpop.f32.mrf.mxu0 }
 0x243   : > { %v4368_v28 = vpop.f32.mrf.mxu3 }
 0x248   : > { %3393 = vmatmul.msk.f32.gmra.mxu3 %vm785_vm1, %v1546_v30 }
 0x24a   : > { %3438 = vmatmul.msk.f32.gmra.mxu1 %vm785_vm1, %v2011_v36 }
 0x24b   : > { %v4373_v33 = vpop.f32.mrf.mxu3 }
 0x250   : > { %3394 = vmatmul.msk.f32.gmra.mxu3 %vm785_vm1, %v1547_v34 }
 0x252   : > { %3439 = vmatmul.msk.f32.gmra.mxu1 %vm785_vm1, %v2012_v40 }
 0x253   : > { %v4378_v37 = vpop.f32.mrf.mxu3 }
 0x258   : > { %3395 = vmatmul.msk.f32.gmra.mxu3 %vm785_vm1, %v1548_v38  ;;  %v4430_v38 = vpop.f32.mrf.mxu0 }
 0x25a   : > { %3440 = vmatmul.msk.f32.gmra.mxu1 %vm785_vm1, %v2013_v18 }
 0x25b   : > { %v4383_v41 = vpop.f32.mrf.mxu3 }
 0x25c   : > { %v4398_v53 = vpop.f32.mrf.mxu2 }
 0x25f   : > { %v1449_v21 = vpop.f32.mrf.mxu1 }
 0x260   : > { %3420 = vmatmul.msk.f32.vlgmr.msra.gmra.mxu3 %vm785_vm1, %v1853_v42  ;;  %3385 = vmatmul.msk.f32.gmra.mxu2 %vm785_vm1, %v1449_v21 }
 0x262   : > { %3441 = vmatmul.msk.f32.gmra.mxu1 %vm785_vm1, %v2014_v22  ;;  %v2089_v22 = vld [vmem:[#allocation4 + $0x230] sm:$0xff] }
 0x263   : > { %v1278_v19 = vpop.f32.mrf.mxu3  ;;  %2124 = vmatpush.msra.mxu2 %v2089_v22 }
 0x264   : > { %3364 = vmatmul.msk.f32.vlgmr.msra.gmra.mxu0 %vm785_vm1, %v1278_v19  ;;  %v4405_v7 = vpop.f32.mrf.mxu2  ;;  %v4436_v19 = vpop.f32.mrf.mxu0 }
 0x267   : > { %v1452_v24 = vpop.f32.mrf.mxu1 }
 0x268   : > { %3421 = vmatmul.msk.f32.gmra.mxu3 %vm785_vm1, %v1854_v20  ;;  %3386 = vmatmul.msk.f32.gmra.mxu2 %vm785_vm1, %v1452_v24  ;;  %v1933_v24 = vld [vmem:[#allocation4 + $0x1f0] sm:$0xff] }
 0x26a   : > { %3442 = vmatmul.msk.f32.gmra.mxu1 %vm785_vm1, %v2015_v45  ;;  %v1932_v45 = vld [vmem:[#allocation4 + $0x1e8] sm:$0xff] }
 0x26b   : > { %v1281_v44 = vpop.f32.mrf.mxu3 }
 0x26c   : > { %3365 = vmatmul.msk.f32.gmra.mxu0 %vm785_vm1, %v1281_v44  ;;  %v4411_v13 = vpop.f32.mrf.mxu2  ;;  %v1934_v44 = vld [vmem:[#allocation4 + $0x1f8] sm:$0xff] }
 0x26d   : > { %1967 = vmatpush.msra.mxu0 %v1934_v44 }
 0x26f   : > { %v1455_v54 = vpop.f32.mrf.mxu1  ;;  %1968 = vmatpush.msra.mxu0 %v1933_v24 }
 0x270   : > { %3422 = vmatmul.msk.f32.gmra.mxu3 %vm785_vm1, %v1855_v23  ;;  %3387 = vmatmul.msk.f32.gmra.mxu2 %vm785_vm1, %v1455_v54  ;;  %v2088_v23 = vld [vmem:[#allocation4 + $0x228] sm:$0xff] }
 0x271   : > { %2125 = vmatpush.msra.mxu2 %v2088_v23  ;;  %1969 = vmatpush.msra.mxu0 %v1932_v45  ;;  %v2084_v54 = vld [vmem:[#allocation4 + $0x208] sm:$0xff] }
 0x272   : > { %3443 = vmatmul.msk.f32.gmra.mxu1 %vm785_vm1, %v2016_v58  ;;  %v2083_v58 = vld [vmem:[#allocation4 + $0x200] sm:$0xff] }
 0x273   : > { %v1284_v46 = vpop.f32.mrf.mxu3  ;;  %2126 = vmatpush.msra.mxu2 %v2087_v25  ;;  %1970 = vmatpush.msra.mxu0 %v1931_v50 }
 0x274   : > { %3366 = vmatmul.msk.f32.gmra.mxu0 %vm785_vm1, %v1284_v46  ;;  %v4419_v27 = vpop.f32.mrf.mxu2 }
 0x275   : > { %2127 = vmatpush.msra.mxu2 %v2086_v47  ;;  %1971 = vmatpush.msra.mxu0 %v1930_v52 }
 0x277   : > { %v1746_v5 = vpop.f32.mrf.mxu1  ;;  %2128 = vmatpush.msra.mxu2 %v2085_v51  ;;  %1972 = vmatpush.msra.mxu0 %v1929_v57 }
 0x278   : > { %3423 = vmatmul.msk.f32.gmra.mxu3 %vm785_vm1, %v1856_v48  ;;  %3412 = vmatmul.msk.f32.vlgmr.msrb.gmra.mxu2 %vm785_vm1, %v1746_v5  ;;  %v4443_v48 = vpop.f32.mrf.mxu0 }
 0x279   : > { %2129 = vmatpush.msra.mxu2 %v2084_v54  ;;  %1973 = vmatpush.msra.mxu0 %v1928_v61 }
 0x27b   : > { %v1287_v60 = vpop.f32.mrf.mxu3  ;;  %2130 = vmatpush.msra.mxu2 %v2083_v58  ;;  %1974 = vmatpush.msra.mxu0 %v1927_v0 }
 0x27c   : > { %3367 = vmatmul.msk.f32.gmra.mxu0 %vm785_vm1, %v1287_v60  ;;  %v4426_v34 = vpop.f32.mrf.mxu2 }
 0x27f   : > { %v1749_v12 = vpop.f32.mrf.mxu1 }
 0x280   : > { %3424 = vmatmul.msk.f32.gmra.mxu3 %vm785_vm1, %v1857_v2  ;;  %3413 = vmatmul.msk.f32.gmra.mxu2 %vm785_vm1, %v1749_v12  ;;  %v4450_v1 = vpop.f32.mrf.mxu0 }
 0x283   : > { %v1290_v8 = vpop.f32.mrf.mxu3 }
 0x284   : > { %3368 = vmatmul.msk.f32.gmra.mxu0 %vm785_vm1, %v1290_v8  ;;  %v4432_v40 = vpop.f32.mrf.mxu2 }
 0x287   : > { %v1752_v16 = vpop.f32.mrf.mxu1 }
 0x288   : > { %3425 = vmatmul.msk.f32.gmra.mxu3 %vm785_vm1, %v1858_v11  ;;  %3414 = vmatmul.msk.f32.gmra.mxu2 %vm785_vm1, %v1752_v16  ;;  %v4458_v6 = vpop.f32.mrf.mxu0 }
 0x28b   : > { %v1293_v14 = vpop.f32.mrf.mxu3 }
 0x28c   : > { %3369 = vmatmul.msk.f32.gmra.mxu0 %vm785_vm1, %v1293_v14  ;;  %v4439_v20 = vpop.f32.mrf.mxu2 }
 0x28f   : > { %v1755_v30 = vpop.f32.mrf.mxu1 }
 0x290   : > { %3426 = vmatmul.msk.f32.gmra.mxu3 %vm785_vm1, %v1859_v15  ;;  %3415 = vmatmul.msk.f32.gmra.mxu2 %vm785_vm1, %v1755_v30  ;;  %v4464_v14 = vpop.f32.mrf.mxu0 }
 0x293   : > { %v1296_v26 = vpop.f32.mrf.mxu3 }
 0x294   : > { %3370 = vmatmul.msk.f32.gmra.mxu0 %vm785_vm1, %v1296_v26  ;;  %v4446_v55 = vpop.f32.mrf.mxu2 }
 0x297   : > { %v1758_v35 = vpop.f32.mrf.mxu1 }
 0x298   : > { %3427 = vmatmul.msk.f32.gmra.mxu3 %vm785_vm1, %v1860_v29  ;;  %3416 = vmatmul.msk.f32.gmra.mxu2 %vm785_vm1, %v1758_v35 }
 0x29b   : > { %v1299_v31 = vpop.f32.mrf.mxu3 }
 0x29c   : > { %3371 = vmatmul.msk.f32.gmra.mxu0 %vm785_vm1, %v1299_v31  ;;  %v4452_v2 = vpop.f32.mrf.mxu2 }
 0x29f   : > { %v1761_v39 = vpop.f32.mrf.mxu1 }
 0x2a0   : > { %3417 = vmatmul.msk.f32.gmra.mxu2 %vm785_vm1, %v1761_v39 }
 0x2a3   : > { %v1590_v36 = vpop.f32.mrf.mxu3 }
 0x2a4   : > { %3396 = vmatmul.msk.f32.vlgmr.msrb.gmra.mxu0 %vm785_vm1, %v1590_v36  ;;  %v4456_v5 = vpop.f32.mrf.mxu2 }
 0x2a7   : > { %v1764_v18 = vpop.f32.mrf.mxu1 }
 0x2a8   : > { %3418 = vmatmul.msk.f32.gmra.mxu2 %vm785_vm1, %v1764_v18 }
 0x2ab   : > { %v1593_v42 = vpop.f32.mrf.mxu3 }
 0x2ac   : > { %3397 = vmatmul.msk.f32.gmra.mxu0 %vm785_vm1, %v1593_v42  ;;  %v4462_v11 = vpop.f32.mrf.mxu2 }
 0x2af   : > { %v1767_v46 = vpop.f32.mrf.mxu1 }
 0x2b0   : > { %3419 = vmatmul.msk.f32.gmra.mxu2 %vm785_vm1, %v1767_v46  ;;  %v2329_v46 = vld [vmem:[#allocation10 + $0x8] sm:$0xff] }
 0x2b1   : > { %2354 = vmatpush.msrb.mxu0 %v2329_v46  ;;  %v2187_v46 = vld [vmem:[#allocation6 + $0x18] sm:$0xff] }
 0x2b3   : > { %v1596_v21 = vpop.f32.mrf.mxu3 }
 0x2b4   : > { %3398 = vmatmul.msk.f32.gmra.mxu0 %vm785_vm1, %v1596_v21  ;;  %v4468_v16 = vpop.f32.mrf.mxu2 }
 0x2b7   : > { %v2058_v60 = vpop.f32.mrf.mxu1 }
 0x2b8   : > { %3444 = vmatmul.msk.f32.vlgmr.msra.gmra.mxu2 %vm785_vm1, %v2058_v60 }
 0x2bb   : > { %v1599_v49 = vpop.f32.mrf.mxu3 }
 0x2bc   : > { %3399 = vmatmul.msk.f32.gmra.mxu0 %vm785_vm1, %v1599_v49  ;;  %v4474_v31 = vpop.f32.mrf.mxu2  ;;  %v2328_v49 = vld [vmem:[#allocation10] sm:$0xff] }
 0x2bd   : > { %2355 = vmatpush.msrb.mxu0 %v2328_v49  ;;  %v2185_v49 = vld [vmem:[#allocation6 + $0x8] sm:$0xff] }
 0x2bf   : > { %v2061_v3 = vpop.f32.mrf.mxu1 }
 0x2c0   : > { %3445 = vmatmul.msk.f32.gmra.mxu2 %vm785_vm1, %v2061_v3  ;;  %v2326_v3 = vld [vmem:[%s611_s12] sm:$0xff] }
 0x2c3   : > { %v1602_v62 = vpop.f32.mrf.mxu3 }
 0x2c4   : > { %3400 = vmatmul.msk.f32.gmra.mxu0 %vm785_vm1, %v1602_v62 }
 0x2c7   : > { %v2064_v8 = vpop.f32.mrf.mxu1 }
 0x2c8   : > { %3446 = vmatmul.msk.f32.gmra.mxu2 %vm785_vm1, %v2064_v8 }
 0x2cb   : > { %v1605_v4 = vpop.f32.mrf.mxu3 }
 0x2cc   : > { %3401 = vmatmul.msk.f32.gmra.mxu0 %vm785_vm1, %v1605_v4 }
 0x2cf   : > { %v2067_v12 = vpop.f32.mrf.mxu1 }
 0x2d0   : > { %3447 = vmatmul.msk.f32.gmra.mxu2 %vm785_vm1, %v2067_v12 }
 0x2d3   : > { %v1608_v10 = vpop.f32.mrf.mxu3 }
 0x2d4   : > { %3402 = vmatmul.msk.f32.gmra.mxu0 %vm785_vm1, %v1608_v10  ;;  %v2327_v10 = vld [vmem:[%s611_s12 + $0x8] sm:$0xff]  ;;  %s4910_s12 = sld [smem:[#allocation28_spill]] }
 0x2d7   : > { %v2070_v26 = vpop.f32.mrf.mxu1 }
 0x2d8   : > { %3448 = vmatmul.msk.f32.gmra.mxu2 %vm785_vm1, %v2070_v26 }
 0x2da   : > { %s4732_s28 = scalar_lea.vmem %s4910_s12, %s3508_s22 }
 0x2db   : > { %v1611_v15 = vpop.f32.mrf.mxu3 }
 0x2dc   : > { %3403 = vmatmul.msk.f32.gmra.mxu0 %vm785_vm1, %v1611_v15 }
 0x2df   : > { %v2073_v35 = vpop.f32.mrf.mxu1 }
 0x2e0   : > { %3449 = vmatmul.msk.f32.gmra.mxu2 %vm785_vm1, %v2073_v35  ;;  %v2191_v35 = vld [vmem:[#allocation6 + $0x38] sm:$0xff] }
 0x2e1   : > { %v4470_v29 = vpop.f32.mrf.mxu0  ;;  %2228 = vmatpush.msrb.mxu3 %v2191_v35 }
 0x2e3   : > { %v1902_v30 = vpop.f32.mrf.mxu3  ;;  %v4480_v42 = vpop.f32.mrf.mxu2 }
 0x2e4   : > { %3428 = vmatmul.msk.f32.vlgmr.msra.gmra.mxu0 %vm785_vm1, %v1902_v30 }
 0x2e7   : > { %v2076_v43 = vpop.f32.mrf.mxu1 }
 0x2e8   : > { %3450 = vmatmul.msk.f32.gmra.mxu2 %vm785_vm1, %v2076_v43  ;;  %v2189_v43 = vld [vmem:[#allocation6 + $0x28] sm:$0xff] }
 0x2e9   : > { %v4476_v36 = vpop.f32.mrf.mxu0 }
 0x2eb   : > { %v1905_v39 = vpop.f32.mrf.mxu3  ;;  %v4486_v22 = vpop.f32.mrf.mxu2 }
 0x2ec   : > { %3429 = vmatmul.msk.f32.gmra.mxu0 %vm785_vm1, %v1905_v39  ;;  %v2190_v39 = vld [vmem:[#allocation6 + $0x30] sm:$0xff] }
 0x2ed   : > { %2229 = vmatpush.msrb.mxu3 %v2190_v39 }
 0x2ef   : > { %v2079_v44 = vpop.f32.mrf.mxu1  ;;  %2230 = vmatpush.msrb.mxu3 %v2189_v43 }
 0x2f0   : > { %3451 = vmatmul.msk.f32.gmra.mxu2 %vm785_vm1, %v2079_v44 }
 0x2f1   : > { %v4482_v18 = vpop.f32.mrf.mxu0 }
 0x2f3   : > { %v1908_v21 = vpop.f32.mrf.mxu3  ;;  %v4492_v25 = vpop.f32.mrf.mxu2 }
 0x2f4   : > { %3430 = vmatmul.msk.f32.gmra.mxu0 %vm785_vm1, %v1908_v21  ;;  %4904 = vst [vmem:[#allocation18_spill] sm:$0xff] %v4492_v25 }
 0x2f9   : > { %v4488_v23 = vpop.f32.mrf.mxu0 }
 0x2fb   : > { %v1911_v24 = vpop.f32.mrf.mxu3  ;;  %v1820_v50 = vpop.f32.mrf.mxu2 }
 0x2fc   : > { %3431 = vmatmul.msk.f32.gmra.mxu0 %vm785_vm1, %v1911_v24  ;;  %v2188_v24 = vld [vmem:[#allocation6 + $0x20] sm:$0xff] }
 0x2fd   : > { %2231 = vmatpush.msrb.mxu3 %v2188_v24 }
 0x2ff   : > { %2232 = vmatpush.msrb.mxu3 %v2187_v46  ;;  %v1052_v46 = vadd.f32 %v4424_v32, %v4355_v59  ;;  %v4551_v59 = vld [vmem:[%s4869_s4] ss:$0 sm:$0xff] }
 0x301   : > { %v4494_v45 = vpop.f32.mrf.mxu0 }
 0x303   : > { %v1914_v47 = vpop.f32.mrf.mxu3  ;;  %v4500_v54 = vpop.f32.mrf.mxu2 }
 0x304   : > { %3432 = vmatmul.msk.f32.gmra.mxu0 %vm785_vm1, %v1914_v47  ;;  %v2186_v47 = vld [vmem:[#allocation6 + $0x10] sm:$0xff] }
 0x305   : > { %2233 = vmatpush.msrb.mxu3 %v2186_v47 }
 0x307   : > { %2234 = vmatpush.msrb.mxu3 %v2185_v49  ;;  %v1221_v49 = vadd.f32 %v4405_v7, %v1052_v46 }
 0x309   : > { %v4497_v51 = vpop.f32.mrf.mxu0  ;;  %v1377_v25 = vadd.f32 %v4476_v36, %v1221_v49  ;;  %v1061_v49 = vadd.f32 %v4443_v48, %v4368_v28  ;;  %v2453_v28 = vld [vmem:[#allocation11 + $0xd0] sm:$0xff] }
 0x30b   : > { %v1917_v52 = vpop.f32.mrf.mxu3  ;;  %v4505_v60 = vpop.f32.mrf.mxu2 }
 0x30c   : > { %3433 = vmatmul.msk.f32.gmra.mxu0 %vm785_vm1, %v1917_v52 }
 0x311   : > { %v4502_v57 = vpop.f32.mrf.mxu0 }
 0x313   : > { %v1920_v58 = vpop.f32.mrf.mxu3  ;;  %v4512_v4 = vpop.f32.mrf.mxu2 }
 0x314   : > { %3434 = vmatmul.msk.f32.gmra.mxu0 %vm785_vm1, %v1920_v58 }
 0x319   : > { %v4507_v61 = vpop.f32.mrf.mxu0 }
 0x31b   : > { %v1923_v62 = vpop.f32.mrf.mxu3  ;;  %v4517_v12 = vpop.f32.mrf.mxu2 }
 0x31c   : > { %3435 = vmatmul.msk.f32.gmra.mxu0 %vm785_vm1, %v1923_v62  ;;  %v2184_v62 = vld [vmem:[#allocation6] sm:$0xff] }
 0x31d   : > { %2235 = vmatpush.msrb.mxu3 %v2184_v62 }
 0x321   : > { %v1664_v0 = vpop.f32.mrf.mxu0 }
 0x323   : > { %v4520_v26 = vpop.f32.mrf.mxu2 }
 0x324   : > { %3460 = vmatmul.msk.f32.vlgmr.msrb.gmra.mxu0 %vm2261_vm2, %v2326_v3 }
 0x329   : > { %v1667_v8 = vpop.f32.mrf.mxu0 }
 0x32b   : > { %v4524_v21 = vpop.f32.mrf.mxu2 }
 0x32c   : > { %3461 = vmatmul.msk.f32.gmra.mxu0 %vm2261_vm2, %v2327_v10  ;;  %4905 = vst [vmem:[#allocation19_spill] sm:$0xff] %v4524_v21  ;;  %v1049_v10 = vadd.f32 %v4416_v17, %v4351_v56  ;;  %v1533_v17 = vadd.f32 %v4456_v5, %v1377_v25  ;;  %v1058_v5 = vadd.f32 %v4436_v19, %v4363_v9 }
 0x32e   : > { %v1220_v39 = vadd.f32 %v4398_v53, %v1049_v10  ;;  %v1055_v53 = vadd.f32 %v4430_v38, %v4359_v63  ;;  %v1689_v7 = vadd.f32 %v1667_v8, %v1533_v17 }
 0x330   : > { %v1376_v43 = vadd.f32 %v4470_v29, %v1220_v39  ;;  %v1222_v32 = vadd.f32 %v4411_v13, %v1055_v53  ;;  %v1845_v10 = vadd.f32 %v4500_v54, %v1689_v7  ;;  %v1223_v13 = vadd.f32 %v4419_v27, %v1058_v5  ;;  %v2457_v54 = vld [vmem:[#allocation11 + $0xf0] sm:$0xff]  ;;  %v2448_v5 = vld [vmem:[#allocation11 + $0xa8] sm:$0xff] }
 0x331   : > { %v1670_v15 = vpop.f32.mrf.mxu0 }
 0x332   : > { %v1532_v47 = vadd.f32 %v4452_v2, %v1376_v43  ;;  %v1379_v39 = vadd.f32 %v4488_v23, %v1223_v13  ;;  %v2455_v23 = vld [vmem:[#allocation11 + $0xe0] sm:$0xff] }
 0x333   : > { %v4530_v58 = vpop.f32.mrf.mxu2 }
 0x334   : > { %4906 = vst [vmem:[#allocation20_spill] sm:$0xff] %v4530_v58  ;;  %v1688_v62 = vadd.f32 %v1664_v0, %v1532_v47  ;;  %v1378_v0 = vadd.f32 %v4482_v18, %v1222_v32  ;;  %v2458_v18 = vld [vmem:[#allocation11 + $0xf8] sm:$0xff]  ;;  %v1535_v27 = vadd.f32 %v4468_v16, %v1379_v39  ;;  %v2452_v32 = vld [vmem:[#allocation11 + $0xc8] sm:$0xff] }
 0x335   : > { %2459 = vmatpush.msra.mxu3 %v2458_v18 }
 0x336   : > { %v1844_v21 = vadd.f32 %v1820_v50, %v1688_v62  ;;  %v1534_v25 = vadd.f32 %v4462_v11, %v1378_v0  ;;  %v2456_v11 = vld [vmem:[#allocation11 + $0xe8] sm:$0xff] }
 0x337   : > { %2460 = vmatpush.msra.mxu3 %v2457_v54  ;;  %v2444_v54 = vld [vmem:[#allocation11 + $0x88] sm:$0xff] }
 0x338   : > { %v1690_v8 = vadd.f32 %v1670_v15, %v1534_v25 }
 0x339   : > { %v4522_v30 = vpop.f32.mrf.mxu0  ;;  %2461 = vmatpush.msra.mxu3 %v2456_v11 }
 0x33a   : > { %v1846_v46 = vadd.f32 %v4505_v60, %v1690_v8  ;;  %v1691_v62 = vadd.f32 %v4522_v30, %v1535_v27  ;;  %v4907_v27 = vld [vmem:[#allocation19_spill] sm:$0xff] }
 0x33b   : > { %v2132_v35 = vpop.f32.mrf.mxu2  ;;  %2462 = vmatpush.msra.mxu3 %v2455_v23 }
 0x33c   : > { %v1847_v48 = vadd.f32 %v4512_v4, %v1691_v62 }
 0x341   : > { %v4526_v44 = vpop.f32.mrf.mxu0 }
 0x343   : > { %v2135_v58 = vpop.f32.mrf.mxu2 }
 0x349   : > { %v4528_v52 = vpop.f32.mrf.mxu0 }
 0x34b   : > { %v2138_v50 = vpop.f32.mrf.mxu2 }
 0x351   : > { %v4532_v3 = vpop.f32.mrf.mxu0 }
 0x353   : > { %v2141_v19 = vpop.f32.mrf.mxu2 }
 0x359   : > { %v4538_v24 = vpop.f32.mrf.mxu0 }
 0x361   : > { %v1976_v56 = vpop.f32.mrf.mxu0 }
 0x362   : > { %v2000_v29 = vadd.f32 %v1976_v56, %v1844_v21  ;;  %v2454_v56 = vld [vmem:[#allocation11 + $0xd8] sm:$0xff] }
 0x363   : > { %2463 = vmatpush.msra.mxu3 %v2454_v56 }
 0x364   : > { %v2156_v2 = vadd.f32 %v2132_v35, %v2000_v29 }
 0x365   : > { %2464 = vmatpush.msra.mxu3 %v2453_v28 }
 0x366   : > { %v2168_v36 = vadd.f32 %v4551_v59, %v2156_v2  ;;  %v2144_v2 = vpop.f32.mrf.mxu2 }
 0x367   : > { %2465 = vmatpush.msra.mxu3 %v2452_v32 }
 0x368   : > { %v2176_v63 = vmax.f32 %v2168_v36, 0.0 }
 0x369   : > { %v1979_v38 = vpop.f32.mrf.mxu0 }
 0x36a   : > { %v2001_v21 = vadd.f32 %v1979_v38, %v1845_v10  ;;  %3452 = vmatmul.msk.f32.vlgmr.msrb.gmra.mxu3 %vm785_vm1, %v2176_v63 }
 0x36c   : > { %v2157_v35 = vadd.f32 %v2135_v58, %v2001_v21  ;;  %v1224_v58 = vadd.f32 %v4426_v34, %v1061_v49  ;;  %v1064_v34 = vadd.f32 %v4450_v1, %v4373_v33  ;;  %v2449_v33 = vld [vmem:[#allocation11 + $0xb0] sm:$0xff]  ;;  %v2447_v21 = vld [vmem:[#allocation11 + $0xa0] sm:$0xff] }
 0x36e   : > { %v2169_v43 = vadd.f32 %v4551_v59, %v2157_v35  ;;  %v1380_v53 = vadd.f32 %v4494_v45, %v1224_v58  ;;  %v2451_v45 = vld [vmem:[#allocation11 + $0xc0] sm:$0xff]  ;;  %v1225_v0 = vadd.f32 %v4432_v40, %v1064_v34  ;;  %v1067_v40 = vadd.f32 %v4458_v6, %v4378_v37  ;;  %v2147_v35 = vpop.f32.mrf.mxu2  ;;  %v2445_v37 = vld [vmem:[#allocation11 + $0x90] sm:$0xff] }
 0x36f   : > { %2466 = vmatpush.msra.mxu3 %v2451_v45  ;;  %v2553_v45 = vld [vmem:[#allocation11 + $0x178] sm:$0xff] }
 0x370   : > { %v2177_v47 = vmax.f32 %v2169_v43, 0.0  ;;  %v1536_v30 = vadd.f32 %v4474_v31, %v1380_v53  ;;  %v1381_v10 = vadd.f32 %v4497_v51, %v1225_v0  ;;  %v1226_v51 = vadd.f32 %v4439_v20, %v1067_v40  ;;  %v2552_v0 = vld [vmem:[#allocation11 + $0x170] sm:$0xff]  ;;  %v2623_v40 = vld [vmem:[#allocation11 + $0x1d8] sm:$0xff] }
 0x371   : > { %v1982_v9 = vpop.f32.mrf.mxu0  ;;  %v1070_v20 = vadd.f32 %v4464_v14, %v4383_v41 }
 0x372   : > { %v2002_v15 = vadd.f32 %v1982_v9, %v1846_v46  ;;  %3453 = vmatmul.msk.f32.gmra.mxu3 %vm785_vm1, %v2177_v47  ;;  %v1692_v36 = vadd.f32 %v4526_v44, %v1536_v30  ;;  %v1537_v44 = vadd.f32 %v4480_v42, %v1381_v10  ;;  %v1382_v18 = vadd.f32 %v4502_v57, %v1226_v51  ;;  %v2443_v47 = vld [vmem:[#allocation11 + $0x80] sm:$0xff]  ;;  %v2621_v51 = vld [vmem:[#allocation11 + $0x1c8] sm:$0xff] }
 0x373   : > { %v1227_v57 = vadd.f32 %v4446_v55, %v1070_v20  ;;  %v2550_v10 = vld [vmem:[#allocation11 + $0x160] sm:$0xff] }
 0x374   : > { %v2158_v60 = vadd.f32 %v2138_v50, %v2002_v15  ;;  %v2450_v50 = vld [vmem:[#allocation11 + $0xb8] sm:$0xff]  ;;  %v1848_v1 = vadd.f32 %v4517_v12, %v1692_v36  ;;  %v1693_v13 = vadd.f32 %v4528_v52, %v1537_v44  ;;  %v1538_v52 = vadd.f32 %v4486_v22, %v1382_v18  ;;  %v4908_v15 = vld [vmem:[#allocation18_spill] sm:$0xff]  ;;  %v2547_v44 = vld [vmem:[#allocation11 + $0x148] sm:$0xff] }
 0x375   : > { %2467 = vmatpush.msra.mxu3 %v2450_v50  ;;  %v2446_v12 = vld [vmem:[#allocation11 + $0x98] sm:$0xff]  ;;  %v2626_v50 = vld [vmem:[#allocation11 + $0x1f0] sm:$0xff]  ;;  %v2616_v20 = vld [vmem:[#allocation11 + $0x1a0] sm:$0xff] }
 0x376   : > { %v2170_v17 = vadd.f32 %v4551_v59, %v2158_v60  ;;  %v1849_v6 = vadd.f32 %v4520_v26, %v1693_v13  ;;  %v1694_v9 = vadd.f32 %v4532_v3, %v1538_v52  ;;  %v1383_v26 = vadd.f32 %v4507_v61, %v1227_v57  ;;  %v2150_v49 = vpop.f32.mrf.mxu2  ;;  %v4909_v60 = vld [vmem:[#allocation20_spill] sm:$0xff]  ;;  %v2627_v36 = vld [vmem:[#allocation11 + $0x1f8] sm:$0xff]  ;;  %v3468_v13 = vld [vmem:[%s4880_s15 + $0x20] sm:$0xff] }
 0x377   : > { %2468 = vmatpush.msra.mxu3 %v2449_v33  ;;  %v3465_v33 = vld [vmem:[%s4880_s15 + $0x18] sm:$0xff]  ;;  %v2619_v18 = vld [vmem:[#allocation11 + $0x1b8] sm:$0xff]  ;;  %v2540_v52 = vld [vmem:[#allocation11 + $0x110] sm:$0xff] }
 0x378   : > { %v2178_v16 = vmax.f32 %v2170_v17, 0.0  ;;  %v1850_v41 = vadd.f32 %v4907_v27, %v1694_v9  ;;  %v1539_v23 = vadd.f32 %v4908_v15, %v1383_v26  ;;  %v2614_v57 = vld [vmem:[#allocation11 + $0x190] sm:$0xff]  ;;  %v2538_v9 = vld [vmem:[#allocation11 + $0x100] sm:$0xff]  ;;  %v2407_v27 = vld [vmem:[#allocation11 + $0x68] sm:$0xff] }
 0x379   : > { %v1985_v29 = vpop.f32.mrf.mxu0  ;;  %2469 = vmatpush.msra.mxu3 %v2448_v5  ;;  %v2548_v5 = vld [vmem:[#allocation11 + $0x150] sm:$0xff]  ;;  %v2612_v26 = vld [vmem:[#allocation11 + $0x180] sm:$0xff]  ;;  %v2403_v15 = vld [vmem:[#allocation11 + $0x48] sm:$0xff] }
 0x37a   : > { %v2003_v7 = vadd.f32 %v1985_v29, %v1847_v48  ;;  %3454 = vmatmul.msk.f32.gmra.mxu3 %vm785_vm1, %v2178_v16  ;;  %v1695_v55 = vadd.f32 %v4538_v24, %v1539_v23  ;;  %v3616_v24 = vld [vmem:[%s4875_s10] ss:$0 sm:$0xff]  ;;  %v2402_v23 = vld [vmem:[#allocation11 + $0x40] sm:$0xff] }
 0x37b   : > { %2470 = vmatpush.msra.mxu3 %v2447_v21  ;;  %v2546_v21 = vld [vmem:[#allocation11 + $0x140] sm:$0xff] }
 0x37c   : > { %v2159_v4 = vadd.f32 %v2141_v19, %v2003_v7  ;;  %v1851_v56 = vadd.f32 %v4909_v60, %v1695_v55  ;;  %v2400_v55 = vld [vmem:[#allocation11 + $0x30] sm:$0xff]  ;;  %v2397_v60 = vld [vmem:[#allocation11 + $0x18] sm:$0xff] }
 0x37d   : > { %2471 = vmatpush.msra.mxu3 %v2446_v12  ;;  %v2620_v12 = vld [vmem:[#allocation11 + $0x1c0] sm:$0xff] }
 0x37e   : > { %v2171_v63 = vadd.f32 %v4551_v59, %v2159_v4  ;;  %v2153_v17 = vpop.f32.mrf.mxu2  ;;  %v2551_v4 = vld [vmem:[#allocation11 + $0x168] sm:$0xff] }
 0x37f   : > { %2472 = vmatpush.msra.mxu3 %v2445_v37  ;;  %v2618_v37 = vld [vmem:[#allocation11 + $0x1b0] sm:$0xff] }
 0x380   : > { %v2179_v31 = vmax.f32 %v2171_v63, 0.0  ;;  %v2625_v63 = vld [vmem:[#allocation11 + $0x1e8] sm:$0xff] }
 0x381   : > { %v1988_v38 = vpop.f32.mrf.mxu0  ;;  %2473 = vmatpush.msra.mxu3 %v2444_v54  ;;  %v2541_v54 = vld [vmem:[#allocation11 + $0x118] sm:$0xff] }
 0x382   : > { %v2004_v25 = vadd.f32 %v1988_v38, %v1848_v1  ;;  %3455 = vmatmul.msk.f32.gmra.mxu3 %vm785_vm1, %v2179_v31  ;;  %v2364_v1 = vld [vmem:[%s4880_s15 + $0x8] sm:$0xff]  ;;  %v2549_v31 = vld [vmem:[#allocation11 + $0x158] sm:$0xff]  ;;  %v2624_v38 = vld [vmem:[#allocation11 + $0x1e0] sm:$0xff] }
 0x383   : > { %2474 = vmatpush.msra.mxu3 %v2443_v47  ;;  %v2539_v47 = vld [vmem:[#allocation11 + $0x108] sm:$0xff] }
 0x384   : > { %v2160_v8 = vadd.f32 %v2144_v2, %v2004_v25  ;;  %v3464_v2 = vld [vmem:[%s4880_s15 + $0x10] sm:$0xff]  ;;  %v2622_v25 = vld [vmem:[#allocation11 + $0x1d0] sm:$0xff] }
 0x386   : > { %v2172_v39 = vadd.f32 %v4551_v59, %v2160_v8  ;;  %v2545_v8 = vld [vmem:[#allocation11 + $0x138] sm:$0xff] }
 0x388   : > { %v2180_v42 = vmax.f32 %v2172_v39, 0.0  ;;  %v2543_v39 = vld [vmem:[#allocation11 + $0x128] sm:$0xff] }
 0x389   : > { %v1991_v43 = vpop.f32.mrf.mxu0 }
 0x38a   : > { %v2005_v46 = vadd.f32 %v1991_v43, %v1849_v6  ;;  %3456 = vmatmul.msk.f32.gmra.mxu3 %vm785_vm1, %v2180_v42  ;;  %v2542_v6 = vld [vmem:[#allocation11 + $0x120] sm:$0xff]  ;;  %v2617_v42 = vld [vmem:[#allocation11 + $0x1a8] sm:$0xff]  ;;  %v3469_v43 = vld [vmem:[%s4880_s15 + $0x28] sm:$0xff] }
 0x38c   : > { %v2161_v19 = vadd.f32 %v2147_v35, %v2005_v46  ;;  %v2544_v35 = vld [vmem:[#allocation11 + $0x130] sm:$0xff]  ;;  %v2615_v46 = vld [vmem:[#allocation11 + $0x198] sm:$0xff] }
 0x38e   : > { %v2173_v11 = vadd.f32 %v4551_v59, %v2161_v19  ;;  %v2613_v19 = vld [vmem:[#allocation11 + $0x188] sm:$0xff] }
 0x390   : > { %v2181_v14 = vmax.f32 %v2173_v11, 0.0  ;;  %v2409_v11 = vld [vmem:[#allocation11 + $0x78] sm:$0xff] }
 0x391   : > { %v1994_v22 = vpop.f32.mrf.mxu0  ;;  %2482 = vmatpush.msra.mxu0 %v2409_v11 }
 0x392   : > { %v2006_v58 = vadd.f32 %v1994_v22, %v1850_v41  ;;  %3457 = vmatmul.msk.f32.gmra.mxu3 %vm785_vm1, %v2181_v14  ;;  %v2406_v41 = vld [vmem:[#allocation11 + $0x60] sm:$0xff]  ;;  %v2405_v14 = vld [vmem:[#allocation11 + $0x58] sm:$0xff]  ;;  %v2404_v22 = vld [vmem:[#allocation11 + $0x50] sm:$0xff] }
 0x394   : > { %v2162_v62 = vadd.f32 %v2150_v49, %v2006_v58  ;;  %v2408_v49 = vld [vmem:[#allocation11 + $0x70] sm:$0xff]  ;;  %v2401_v58 = vld [vmem:[#allocation11 + $0x38] sm:$0xff] }
 0x395   : > { %2483 = vmatpush.msra.mxu0 %v2408_v49 }
 0x396   : > { %v2174_v3 = vadd.f32 %v4551_v59, %v2162_v62  ;;  %v2399_v62 = vld [vmem:[#allocation11 + $0x28] sm:$0xff] }
 0x397   : > { %2484 = vmatpush.msra.mxu0 %v2407_v27 }
 0x398   : > { %v2182_v61 = vmax.f32 %v2174_v3, 0.0  ;;  %v2398_v3 = vld [vmem:[#allocation11 + $0x20] sm:$0xff] }
 0x399   : > { %v1997_v53 = vpop.f32.mrf.mxu0  ;;  %2485 = vmatpush.msra.mxu0 %v2406_v41 }
 0x39a   : > { %v2007_v28 = vadd.f32 %v1997_v53, %v1851_v56  ;;  %3458 = vmatmul.msk.f32.gmra.mxu3 %vm785_vm1, %v2182_v61  ;;  %v4656_v56 = vld [vmem:[%s4871_s6] ss:$0 sm:$0xff]  ;;  %v2396_v61 = vld [vmem:[#allocation11 + $0x10] sm:$0xff] }
 0x39b   : > { %2486 = vmatpush.msra.mxu0 %v2405_v14  ;;  %v2395_v53 = vld [vmem:[#allocation11 + $0x8] sm:$0xff] }
 0x39c   : > { %v2163_v48 = vadd.f32 %v2153_v17, %v2007_v28 }
 0x39d   : > { %2487 = vmatpush.msra.mxu0 %v2404_v22 }
 0x39e   : > { %v2175_v16 = vadd.f32 %v4551_v59, %v2163_v48  ;;  %v2363_v59 = vld [vmem:[%s4880_s15] sm:$0xff]  ;;  %v2394_v48 = vld [vmem:[#allocation11] sm:$0xff] }
 0x39f   : > { %2488 = vmatpush.msra.mxu0 %v2403_v15 }
 0x3a0   : > { %v2183_v29 = vmax.f32 %v2175_v16, 0.0  ;;  %v2701_v16 = vld [vmem:[#allocation11 + $0x278] sm:$0xff] }
 0x3a1   : > { %v2357_v32 = vpop.f32.mrf.mxu0  ;;  %2489 = vmatpush.msra.mxu0 %v2402_v23 }
 0x3a2   : > { %3459 = vmatmul.msk.f32.gmra.mxu3 %vm785_vm1, %v2183_v29  ;;  %v4614_v7 = vadd.f32 %v3616_v24, %v2357_v32  ;;  %v2700_v32 = vld [vmem:[#allocation11 + $0x270] sm:$0xff] }
 0x3a3   : > { %2490 = vmatpush.msra.mxu0 %v2401_v58  ;;  %v3472_v58 = vld [vmem:[%s4880_s15 + $0x30] sm:$0xff] }
 0x3a5   : > { %2491 = vmatpush.msra.mxu0 %v2400_v55  ;;  %v2775_v55 = vld [vmem:[#allocation11 + $0x2f8] sm:$0xff] }
 0x3a7   : > { %2492 = vmatpush.msra.mxu0 %v2399_v62  ;;  %v2774_v62 = vld [vmem:[#allocation11 + $0x2f0] sm:$0xff] }
 0x3a9   : > { %v2360_v34 = vpop.f32.mrf.mxu0  ;;  %2493 = vmatpush.msra.mxu0 %v2398_v3 }
 0x3aa   : > { %v4612_v30 = vadd.f32 %v3616_v24, %v2360_v34  ;;  %v2699_v24 = vld [vmem:[#allocation11 + $0x268] sm:$0xff]  ;;  %v2698_v34 = vld [vmem:[#allocation11 + $0x260] sm:$0xff] }
 0x3ab   : > { %2494 = vmatpush.msra.mxu0 %v2397_v60  ;;  %v2773_v60 = vld [vmem:[#allocation11 + $0x2e8] sm:$0xff] }
 0x3ac   : > { %2385 = vmatpush.msrb.mxu1 %v4612_v30  ;;  %2433 = vmatpush.msrb.mxu2 %v4612_v30 }
 0x3ad   : > { %2602 = vmatpush.msrb.mxu3 %v4612_v30  ;;  %2495 = vmatpush.msra.mxu0 %v2396_v61  ;;  %v3473_v61 = vld [vmem:[%s4880_s15 + $0x38] sm:$0xff] }
 0x3ae   : > { %2386 = vmatpush.msrb.mxu1 %v4614_v7  ;;  %2434 = vmatpush.msrb.mxu2 %v4614_v7 }
 0x3af   : > { %2603 = vmatpush.msrb.mxu3 %v4614_v7  ;;  %3462 = vmatmul.msk.f32.vlgmr.msrb.gmra.mxu1 %vm2261_vm2, %v2363_v59 }
 0x3b0   : > { %3466 = vmatmul.msk.f32.vlgmr.msrb.gmra.mxu2 %vm2261_vm2, %v3464_v2  ;;  %2528 = vmatpush.msra.mxu1 %v4612_v30 }
 0x3b1   : > { %2554 = vmatpush.msra.mxu2 %v2553_v45  ;;  %2496 = vmatpush.msra.mxu0 %v2395_v53  ;;  %v2697_v45 = vld [vmem:[#allocation11 + $0x258] sm:$0xff] }
 0x3b2   : > { %2529 = vmatpush.msra.mxu1 %v4614_v7  ;;  %v2771_v53 = vld [vmem:[#allocation11 + $0x2d8] sm:$0xff] }
 0x3b3   : > { %2555 = vmatpush.msra.mxu2 %v2552_v0  ;;  %2497 = vmatpush.msra.mxu0 %v2394_v48  ;;  %v2769_v48 = vld [vmem:[#allocation11 + $0x2c8] sm:$0xff] }
 0x3b4   : > { %2628 = vmatpush.msrb.mxu1 %v2627_v36 }
 0x3b5   : > { %2556 = vmatpush.msra.mxu2 %v2551_v4  ;;  %2702 = vmatpush.msrb.mxu0 %v2701_v16  ;;  %v2696_v4 = vld [vmem:[#allocation11 + $0x250] sm:$0xff]  ;;  %v2768_v16 = vld [vmem:[#allocation11 + $0x2c0] sm:$0xff] }
 0x3b6   : > { %2629 = vmatpush.msrb.mxu1 %v2626_v50  ;;  %v2695_v50 = vld [vmem:[#allocation11 + $0x248] sm:$0xff] }
 0x3b7   : > { %2557 = vmatpush.msra.mxu2 %v2550_v10  ;;  %3463 = vmatmul.msk.f32.gmra.mxu1 %vm2261_vm2, %v2364_v1  ;;  %v2694_v10 = vld [vmem:[#allocation11 + $0x240] sm:$0xff]  ;;  %v2693_v1 = vld [vmem:[#allocation11 + $0x238] sm:$0xff] }
 0x3b8   : > { %2630 = vmatpush.msrb.mxu1 %v2625_v63  ;;  %3467 = vmatmul.msk.f32.gmra.mxu2 %vm2261_vm2, %v3465_v33 }
 0x3b9   : > { %2558 = vmatpush.msra.mxu2 %v2549_v31  ;;  %2703 = vmatpush.msrb.mxu0 %v2700_v32  ;;  %v2767_v32 = vld [vmem:[#allocation11 + $0x2b8] sm:$0xff] }
 0x3ba   : > { %2631 = vmatpush.msrb.mxu1 %v2624_v38 }
 0x3bb   : > { %2559 = vmatpush.msra.mxu2 %v2548_v5  ;;  %2704 = vmatpush.msrb.mxu0 %v2699_v24  ;;  %v2692_v5 = vld [vmem:[#allocation11 + $0x230] sm:$0xff]  ;;  %v3481_v24 = vld [vmem:[%s4880_s15 + $0x58] sm:$0xff] }
 0x3bc   : > { %2632 = vmatpush.msrb.mxu1 %v2623_v40  ;;  %v2691_v40 = vld [vmem:[#allocation11 + $0x228] sm:$0xff] }
 0x3bd   : > { %2560 = vmatpush.msra.mxu2 %v2547_v44  ;;  %2705 = vmatpush.msrb.mxu0 %v2698_v34  ;;  %v2690_v44 = vld [vmem:[#allocation11 + $0x220] sm:$0xff]  ;;  %v2766_v34 = vld [vmem:[#allocation11 + $0x2b0] sm:$0xff] }
 0x3be   : > { %2633 = vmatpush.msrb.mxu1 %v2622_v25 }
 0x3bf   : > { %2561 = vmatpush.msra.mxu2 %v2546_v21  ;;  %3470 = vmatmul.msk.f32.vlgmr.msra.gmra.mxu1 %vm2261_vm2, %v3468_v13 }
 0x3c0   : > { %2634 = vmatpush.msrb.mxu1 %v2621_v51  ;;  %2706 = vmatpush.msrb.mxu0 %v2697_v45  ;;  %v2689_v51 = vld [vmem:[#allocation11 + $0x218] sm:$0xff]  ;;  %v3477_v45 = vld [vmem:[%s4880_s15 + $0x48] sm:$0xff] }
 0x3c1   : > { %2562 = vmatpush.msra.mxu2 %v2545_v8 }
 0x3c2   : > { %2635 = vmatpush.msrb.mxu1 %v2620_v12  ;;  %2707 = vmatpush.msrb.mxu0 %v2696_v4  ;;  %v2688_v12 = vld [vmem:[#allocation11 + $0x210] sm:$0xff]  ;;  %v2761_v4 = vld [vmem:[#allocation11 + $0x288] sm:$0xff] }
 0x3c3   : > { %2563 = vmatpush.msra.mxu2 %v2544_v35  ;;  %v2687_v35 = vld [vmem:[#allocation11 + $0x208] sm:$0xff] }
 0x3c4   : > { %2636 = vmatpush.msrb.mxu1 %v2619_v18  ;;  %2708 = vmatpush.msrb.mxu0 %v2695_v50  ;;  %v2686_v18 = vld [vmem:[#allocation11 + $0x200] sm:$0xff] }
 0x3c5   : > { %2564 = vmatpush.msra.mxu2 %v2543_v39  ;;  %v2760_v50 = vld [vmem:[#allocation11 + $0x280] sm:$0xff] }
 0x3c6   : > { %2637 = vmatpush.msrb.mxu1 %v2618_v37  ;;  %2709 = vmatpush.msrb.mxu0 %v2694_v10 }
 0x3c7   : > { %2565 = vmatpush.msra.mxu2 %v2542_v6  ;;  %3471 = vmatmul.msk.f32.gmra.mxu1 %vm2261_vm2, %v3469_v43 }
 0x3c8   : > { %2638 = vmatpush.msrb.mxu1 %v2617_v42  ;;  %2710 = vmatpush.msrb.mxu0 %v2693_v1 }
 0x3c9   : > { %2566 = vmatpush.msra.mxu2 %v2541_v54 }
 0x3ca   : > { %2639 = vmatpush.msrb.mxu1 %v2616_v20  ;;  %2711 = vmatpush.msrb.mxu0 %v2692_v5 }
 0x3cb   : > { %2567 = vmatpush.msra.mxu2 %v2540_v52 }
 0x3cc   : > { %2640 = vmatpush.msrb.mxu1 %v2615_v46  ;;  %2712 = vmatpush.msrb.mxu0 %v2691_v40 }
 0x3cd   : > { %2568 = vmatpush.msra.mxu2 %v2539_v47 }
 0x3ce   : > { %2641 = vmatpush.msrb.mxu1 %v2614_v57  ;;  %2713 = vmatpush.msrb.mxu0 %v2690_v44 }
 0x3cf   : > { %2569 = vmatpush.msra.mxu2 %v2538_v9 }
 0x3d0   : > { %2642 = vmatpush.msrb.mxu1 %v2613_v19  ;;  %2714 = vmatpush.msrb.mxu0 %v2689_v51 }
 0x3d1   : > { %2750 = vmatpush.msrb.mxu2 %v4612_v30 }
 0x3d2   : > { %2643 = vmatpush.msrb.mxu1 %v2612_v26  ;;  %2715 = vmatpush.msrb.mxu0 %v2688_v12 }
 0x3d3   : > { %2751 = vmatpush.msrb.mxu2 %v4614_v7 }
 0x3d4   : > { %2824 = vmatpush.msra.mxu1 %v4612_v30  ;;  %2716 = vmatpush.msrb.mxu0 %v2687_v35 }
 0x3d6   : > { %2825 = vmatpush.msra.mxu1 %v4614_v7  ;;  %2717 = vmatpush.msrb.mxu0 %v2686_v18 }
 0x3ed   : > { %v2237_v17 = vpop.f32.mrf.mxu3 }
 0x3ee   : > { %v2238_v28 = vadd.f32 %v4656_v56, %v2237_v17  ;;  %v3480_v17 = vld [vmem:[%s4880_s15 + $0x50] sm:$0xff] }
 0x3f0   : > { %2262 = vst.msk [vmem:[%s4663_s13] sm:$0xff] %vm2261_vm2, %v2238_v28  ;;  %v2270_v29 = vmul.f32 1.442695, %v2238_v28  ;;  %v2770_v28 = vld [vmem:[#allocation11 + $0x2d0] sm:$0xff] }
 0x3f2   : > { %3620 = vpow2.f32 %v2270_v29  ;;  %v3476_v29 = vld [vmem:[%s4880_s15 + $0x40] sm:$0xff] }
 0x3f5   : > { %v2240_v59 = vpop.f32.mrf.mxu3 }
 0x3f6   : > { %v2241_v2 = vadd.f32 %v4656_v56, %v2240_v59  ;;  %v2765_v59 = vld [vmem:[#allocation11 + $0x2a8] sm:$0xff] }
 0x3f8   : > { %v3621_v0 = vpop.eup %3620  ;;  %2263 = vst.msk [vmem:[%s4663_s13 + $0x8] sm:$0xff] %vm2261_vm2, %v2241_v2  ;;  %v2272_v36 = vmul.f32 1.442695, %v2241_v2  ;;  %v2764_v2 = vld [vmem:[#allocation11 + $0x2a0] sm:$0xff] }
 0x3f9   : > { %2294 = vrot.lane.b32.xlu0 %v3621_v0, %s3914_s17  ;;  %v2763_v0 = vld [vmem:[#allocation11 + $0x298] sm:$0xff] }
 0x3fa   : > { %3622 = vpow2.f32 %v2272_v36  ;;  %v2762_v36 = vld [vmem:[#allocation11 + $0x290] sm:$0xff] }
 0x3fd   : > { %v2243_v63 = vpop.f32.mrf.mxu3 }
 0x3fe   : > { %v2244_v33 = vadd.f32 %v4656_v56, %v2243_v63 }
 0x400   : > { %v3623_v31 = vpop.eup %3622  ;;  %2264 = vst.msk [vmem:[%s4663_s13 + $0x10] sm:$0xff] %vm2261_vm2, %v2244_v33  ;;  %v2274_v38 = vmul.f32 1.442695, %v2244_v33 }
 0x401   : > { %2296 = vrot.lane.b32.xlu0 %v3623_v31, %s3914_s17 }
 0x402   : > { %3624 = vpow2.f32 %v2274_v38 }
 0x405   : > { %v2246_v25 = vpop.f32.mrf.mxu3 }
 0x406   : > { %v2247_v21 = vadd.f32 %v4656_v56, %v2246_v25 }
 0x408   : > { %v3625_v13 = vpop.eup %3624  ;;  %2265 = vst.msk [vmem:[%s4663_s13 + $0x18] sm:$0xff] %vm2261_vm2, %v2247_v21  ;;  %v2276_v8 = vmul.f32 1.442695, %v2247_v21 }
 0x409   : > { %2298 = vrot.lane.b32.xlu1 %v3625_v13, %s3914_s17 }
 0x40a   : > { %3626 = vpow2.f32 %v2276_v8 }
 0x40d   : > { %v2249_v39 = vpop.f32.mrf.mxu3 }
 0x40e   : > { %v2250_v37 = vadd.f32 %v4656_v56, %v2249_v39 }
 0x410   : > { %v3627_v6 = vpop.eup %3626  ;;  %2266 = vst.msk [vmem:[%s4663_s13 + $0x20] sm:$0xff] %vm2261_vm2, %v2250_v37  ;;  %v2278_v42 = vmul.f32 1.442695, %v2250_v37  ;;  %v2849_v37 = vld [vmem:[#allocation11 + $0x378] sm:$0xff] }
 0x411   : > { %2300 = vrot.lane.b32.xlu1 %v3627_v6, %s3914_s17  ;;  %v2848_v6 = vld [vmem:[#allocation11 + $0x370] sm:$0xff] }
 0x412   : > { %3628 = vpow2.f32 %v2278_v42 }
 0x415   : > { %v2252_v43 = vpop.f32.mrf.mxu3 }
 0x416   : > { %v2253_v54 = vadd.f32 %v4656_v56, %v2252_v43  ;;  %v2847_v43 = vld [vmem:[#allocation11 + $0x368] sm:$0xff] }
 0x418   : > { %v3629_v20 = vpop.eup %3628  ;;  %2267 = vst.msk [vmem:[%s4663_s13 + $0x28] sm:$0xff] %vm2261_vm2, %v2253_v54  ;;  %v2280_v52 = vmul.f32 1.442695, %v2253_v54  ;;  %v2846_v54 = vld [vmem:[#allocation11 + $0x360] sm:$0xff] }
 0x419   : > { %2302 = vrot.lane.b32.xlu2 %v3629_v20, %s3914_s17  ;;  %v3484_v20 = vld [vmem:[%s4880_s15 + $0x60] sm:$0xff] }
 0x41a   : > { %3630 = vpow2.f32 %v2280_v52  ;;  %v2845_v52 = vld [vmem:[#allocation11 + $0x358] sm:$0xff] }
 0x41d   : > { %v2255_v46 = vpop.f32.mrf.mxu3 }
 0x41e   : > { %v2256_v47 = vadd.f32 %v4656_v56, %v2255_v46 }
 0x420   : > { %v3631_v57 = vpop.eup %3630  ;;  %2268 = vst.msk [vmem:[%s4663_s13 + $0x30] sm:$0xff] %vm2261_vm2, %v2256_v47  ;;  %v2282_v9 = vmul.f32 1.442695, %v2256_v47  ;;  %v2844_v47 = vld [vmem:[#allocation11 + $0x350] sm:$0xff] }
 0x421   : > { %2304 = vrot.lane.b32.xlu2 %v3631_v57, %s3914_s17 }
 0x422   : > { %3632 = vpow2.f32 %v2282_v9  ;;  %v2843_v9 = vld [vmem:[#allocation11 + $0x348] sm:$0xff] }
 0x425   : > { %v2258_v19 = vpop.f32.mrf.mxu3 }
 0x426   : > { %v2259_v26 = vadd.f32 %v4656_v56, %v2258_v19  ;;  %v2772_v56 = vld [vmem:[#allocation11 + $0x2e0] sm:$0xff]  ;;  %v3485_v19 = vld [vmem:[%s4880_s15 + $0x68] sm:$0xff] }
 0x428   : > { %v3633_v11 = vpop.eup %3632  ;;  %2269 = vst.msk [vmem:[%s4663_s13 + $0x38] sm:$0xff] %vm2261_vm2, %v2259_v26  ;;  %v2284_v49 = vmul.f32 1.442695, %v2259_v26 }
 0x429   : > { %2306 = vrot.lane.b32.xlu0 %v3633_v11, %s3914_s17  ;;  %v3492_v11 = vld [vmem:[%s4880_s15 + $0x80] sm:$0xff] }
 0x42a   : > { %3634 = vpow2.f32 %v2284_v49  ;;  %v3488_v49 = vld [vmem:[%s4880_s15 + $0x70] sm:$0xff] }
 0x42c   : > { %v2388_v27 = vpop.f32.mrf.mxu1 }
 0x42d   : > { %2498 = vmatmul.f32.vlgmr.msra.gmra.mxu0 %v2388_v27  ;;  %v3493_v27 = vld [vmem:[%s4880_s15 + $0x88] sm:$0xff] }
 0x42e   : > { %2898 = vmatpush.msra.mxu0 %v4612_v30 }
 0x430   : > { %v3635_v41 = vpop.eup %3634  ;;  %2899 = vmatpush.msra.mxu0 %v4614_v7 }
 0x431   : > { %2308 = vrot.lane.b32.xlu1 %v3635_v41, %s3914_s17  ;;  %v3489_v41 = vld [vmem:[%s4880_s15 + $0x78] sm:$0xff] }
 0x433   : > { %v2436_v14 = vpop.f32.mrf.mxu2 }
 0x434   : > { %2475 = vmatmul.f32.vlgmr.msra.gmra.mxu3 %v2436_v14  ;;  %v2391_v22 = vpop.f32.mrf.mxu1  ;;  %v2842_v14 = vld [vmem:[#allocation11 + $0x340] sm:$0xff] }
 0x435   : > { %2676 = vmatpush.msra.mxu3 %v4612_v30  ;;  %2501 = vmatmul.f32.gmra.mxu0 %v2391_v22  ;;  %v2841_v22 = vld [vmem:[#allocation11 + $0x338] sm:$0xff] }
 0x437   : > { %2677 = vmatpush.msra.mxu3 %v4614_v7 }
 0x43b   : > { %v2439_v15 = vpop.f32.mrf.mxu2 }
 0x43c   : > { %2478 = vmatmul.f32.gmra.mxu3 %v2439_v15  ;;  %v2531_v23 = vpop.f32.mrf.mxu1  ;;  %v2923_v15 = vld [vmem:[#allocation11 + $0x3f8] sm:$0xff] }
 0x43d   : > { %2570 = vmatmul.f32.vlgmr.msra.gmra.mxu2 %v2531_v23  ;;  %v2840_v23 = vld [vmem:[#allocation11 + $0x330] sm:$0xff] }
 0x43e   : > { %2850 = vmatpush.msra.mxu2 %v2849_v37  ;;  %v3046_v37 = vld [vmem:[%s4911_s30 + $0x78] sm:$0xff] }
 0x440   : > { %2851 = vmatpush.msra.mxu2 %v2848_v6  ;;  %v3045_v6 = vld [vmem:[%s4911_s30 + $0x70] sm:$0xff] }
 0x442   : > { %2852 = vmatpush.msra.mxu2 %v2847_v43 }
 0x444   : > { %3474 = vmatmul.msk.f32.vlgmr.msrb.gmra.mxu3 %vm2261_vm2, %v3472_v58  ;;  %v2534_v3 = vpop.f32.mrf.mxu1  ;;  %2853 = vmatpush.msra.mxu2 %v2846_v54  ;;  %v2922_v58 = vld [vmem:[#allocation11 + $0x3f0] sm:$0xff] }
 0x445   : > { %2776 = vmatpush.msrb.mxu3 %v2775_v55  ;;  %2573 = vmatmul.f32.gmra.mxu2 %v2534_v3  ;;  %v2997_v55 = vld [vmem:[#allocation11 + $0x478] sm:$0xff]  ;;  %v2996_v3 = vld [vmem:[#allocation11 + $0x470] sm:$0xff] }
 0x446   : > { %2854 = vmatpush.msra.mxu2 %v2845_v52  ;;  %v3042_v52 = vld [vmem:[%s4911_s30 + $0x58] sm:$0xff] }
 0x447   : > { %2777 = vmatpush.msrb.mxu3 %v2774_v62  ;;  %v2921_v62 = vld [vmem:[#allocation11 + $0x3e8] sm:$0xff] }
 0x448   : > { %2855 = vmatpush.msra.mxu2 %v2844_v47  ;;  %v3041_v47 = vld [vmem:[%s4911_s30 + $0x50] sm:$0xff] }
 0x449   : > { %2778 = vmatpush.msrb.mxu3 %v2773_v60  ;;  %v2839_v60 = vld [vmem:[#allocation11 + $0x328] sm:$0xff] }
 0x44a   : > { %2856 = vmatpush.msra.mxu2 %v2843_v9 }
 0x44b   : > { %2779 = vmatpush.msrb.mxu3 %v2772_v56  ;;  %v2838_v56 = vld [vmem:[#allocation11 + $0x320] sm:$0xff] }
 0x44c   : > { %3475 = vmatmul.msk.f32.gmra.mxu3 %vm2261_vm2, %v3473_v61  ;;  %2857 = vmatpush.msra.mxu2 %v2842_v14  ;;  %v2920_v61 = vld [vmem:[#allocation11 + $0x3e0] sm:$0xff] }
 0x44d   : > { %2780 = vmatpush.msrb.mxu3 %v2771_v53  ;;  %3482 = vmatmul.msk.f32.vlgmr.msrb.gmra.mxu2 %vm2261_vm2, %v3480_v17  ;;  %v2995_v53 = vld [vmem:[#allocation11 + $0x468] sm:$0xff]  ;;  %v2837_v17 = vld [vmem:[#allocation11 + $0x318] sm:$0xff] }
 0x44e   : > { %2858 = vmatpush.msra.mxu2 %v2841_v22  ;;  %v3040_v22 = vld [vmem:[%s4911_s30 + $0x48] sm:$0xff] }
 0x44f   : > { %2781 = vmatpush.msrb.mxu3 %v2770_v28  ;;  %v2919_v28 = vld [vmem:[#allocation11 + $0x3d8] sm:$0xff] }
 0x450   : > { %2859 = vmatpush.msra.mxu2 %v2840_v23  ;;  %v3038_v23 = vld [vmem:[%s4911_s30 + $0x38] sm:$0xff] }
 0x451   : > { %2782 = vmatpush.msrb.mxu3 %v2769_v48  ;;  %v2994_v48 = vld [vmem:[#allocation11 + $0x460] sm:$0xff] }
 0x452   : > { %2860 = vmatpush.msra.mxu2 %v2839_v60  ;;  %v3033_v60 = vld [vmem:[%s4911_s30 + $0x10] sm:$0xff] }
 0x453   : > { %2783 = vmatpush.msrb.mxu3 %v2768_v16  ;;  %v2836_v16 = vld [vmem:[#allocation11 + $0x310] sm:$0xff] }
 0x454   : > { %3478 = vmatmul.msk.f32.vlgmr.msra.gmra.mxu3 %vm2261_vm2, %v3476_v29  ;;  %2861 = vmatpush.msra.mxu2 %v2838_v56  ;;  %v2918_v29 = vld [vmem:[#allocation11 + $0x3d0] sm:$0xff] }
 0x455   : > { %2784 = vmatpush.msrb.mxu3 %v2767_v32  ;;  %3483 = vmatmul.msk.f32.gmra.mxu2 %vm2261_vm2, %v3481_v24  ;;  %v2993_v32 = vld [vmem:[#allocation11 + $0x458] sm:$0xff]  ;;  %v2835_v24 = vld [vmem:[#allocation11 + $0x308] sm:$0xff]  ;;  %v3032_v56 = vld [vmem:[%s4911_s30 + $0x8] sm:$0xff] }
 0x456   : > { %2862 = vmatpush.msra.mxu2 %v2837_v17 }
 0x457   : > { %2785 = vmatpush.msrb.mxu3 %v2766_v34  ;;  %v2917_v34 = vld [vmem:[#allocation11 + $0x3c8] sm:$0xff] }
 0x458   : > { %2863 = vmatpush.msra.mxu2 %v2836_v16 }
 0x459   : > { %2786 = vmatpush.msrb.mxu3 %v2765_v59  ;;  %v2992_v59 = vld [vmem:[#allocation11 + $0x450] sm:$0xff] }
 0x45a   : > { %2864 = vmatpush.msra.mxu2 %v2835_v24 }
 0x45b   : > { %2787 = vmatpush.msrb.mxu3 %v2764_v2  ;;  %v2834_v2 = vld [vmem:[#allocation11 + $0x300] sm:$0xff] }
 0x45c   : > { %3479 = vmatmul.msk.f32.gmra.mxu3 %vm2261_vm2, %v3477_v45  ;;  %v2916_v45 = vld [vmem:[#allocation11 + $0x3c0] sm:$0xff]  ;;  %2865 = vmatpush.msra.mxu2 %v2834_v2 }
 0x45d   : > { %2788 = vmatpush.msrb.mxu3 %v2763_v0  ;;  %v2991_v0 = vld [vmem:[#allocation11 + $0x448] sm:$0xff] }
 0x45e   : > { %3051 = vmatpush.msrb.mxu2 %v3046_v37 }
 0x45f   : > { %2789 = vmatpush.msrb.mxu3 %v2762_v36  ;;  %v2915_v36 = vld [vmem:[#allocation11 + $0x3b8] sm:$0xff] }
 0x460   : > { %3052 = vmatpush.msrb.mxu2 %v3045_v6 }
 0x461   : > { %2790 = vmatpush.msrb.mxu3 %v2761_v4  ;;  %v2990_v4 = vld [vmem:[#allocation11 + $0x440] sm:$0xff] }
 0x463   : > { %2791 = vmatpush.msrb.mxu3 %v2760_v50  ;;  %v2914_v50 = vld [vmem:[#allocation11 + $0x3b0] sm:$0xff] }
 0x465   : > { %2972 = vmatpush.msra.mxu3 %v4612_v30 }
 0x467   : > { %2973 = vmatpush.msra.mxu3 %v4614_v7 }
 0x46b   : > { %v2295_v10 = vpop.permute.xlu0 %2294 }
 0x46c   : > { %2318 = vst.msk [vmem:[%s4732_s28] sm:$0xff] %vm2261_vm2, %v2295_v10  ;;  %v2989_v10 = vld [vmem:[#allocation11 + $0x438] sm:$0xff] }
 0x473   : > { %v2297_v30 = vpop.permute.xlu0 %2296  ;;  %v2303_v63 = vpop.permute.xlu2 %2302 }
 0x474   : > { %2319 = vst.msk [vmem:[%s4732_s28 + $0x8] sm:$0xff] %vm2261_vm2, %v2297_v30  ;;  %v2913_v30 = vld [vmem:[#allocation11 + $0x3a8] sm:$0xff] }
 0x475   : > { %2322 = vst.msk [vmem:[%s4732_s28 + $0x20] sm:$0xff] %vm2261_vm2, %v2303_v63  ;;  %v2988_v63 = vld [vmem:[#allocation11 + $0x430] sm:$0xff] }
 0x47b   : > { %v2299_v7 = vpop.permute.xlu1 %2298  ;;  %v2305_v33 = vpop.permute.xlu2 %2304 }
 0x47c   : > { %2320 = vst.msk [vmem:[%s4732_s28 + $0x10] sm:$0xff] %vm2261_vm2, %v2299_v7  ;;  %v2912_v7 = vld [vmem:[#allocation11 + $0x3a0] sm:$0xff] }
 0x47d   : > { %2323 = vst.msk [vmem:[%s4732_s28 + $0x28] sm:$0xff] %vm2261_vm2, %v2305_v33  ;;  %v2987_v33 = vld [vmem:[#allocation11 + $0x428] sm:$0xff] }
 0x483   : > { %v2301_v1 = vpop.permute.xlu1 %2300 }
 0x484   : > { %2321 = vst.msk [vmem:[%s4732_s28 + $0x18] sm:$0xff] %vm2261_vm2, %v2301_v1  ;;  %v2911_v1 = vld [vmem:[#allocation11 + $0x398] sm:$0xff] }
 0x49b   : > { %v2307_v31 = vpop.permute.xlu0 %2306 }
 0x49c   : > { %2324 = vst.msk [vmem:[%s4732_s28 + $0x30] sm:$0xff] %vm2261_vm2, %v2307_v31  ;;  %v2986_v31 = vld [vmem:[#allocation11 + $0x420] sm:$0xff] }
 0x4a3   : > { %v2309_v38 = vpop.permute.xlu1 %2308 }
 0x4a4   : > { %2325 = vst.msk [vmem:[%s4732_s28 + $0x38] sm:$0xff] %vm2261_vm2, %v2309_v38  ;;  %v2910_v38 = vld [vmem:[#allocation11 + $0x390] sm:$0xff] }
 0x4aa   : > { %v2499_v40 = vpop.f32.mrf.mxu0 }
 0x4b2   : > { %v2502_v8 = vpop.f32.mrf.mxu0 }
 0x4b7   : > { %v2476_v5 = vpop.f32.mrf.mxu3 }
 0x4b8   : > { %v2500_v44 = vadd.f32 %v2499_v40, %v2476_v5  ;;  %v2985_v5 = vld [vmem:[#allocation11 + $0x418] sm:$0xff]  ;;  %v2909_v40 = vld [vmem:[#allocation11 + $0x388] sm:$0xff] }
 0x4bf   : > { %v2479_v25 = vpop.f32.mrf.mxu3 }
 0x4c0   : > { %v2571_v21 = vpop.f32.mrf.mxu2  ;;  %v2503_v12 = vadd.f32 %v2502_v8, %v2479_v25 }
 0x4c1   : > { %v4750_v51 = vadd.f32 %v2571_v21, %v2500_v44  ;;  %v2984_v44 = vld [vmem:[#allocation11 + $0x410] sm:$0xff]  ;;  %v2908_v21 = vld [vmem:[#allocation11 + $0x380] sm:$0xff] }
 0x4c7   : > { %v2605_v13 = vpop.f32.mrf.mxu3 }
 0x4c8   : > { %2644 = vmatmul.f32.vlgmr.msrb.gmra.mxu1 %v2605_v13  ;;  %v2574_v35 = vpop.f32.mrf.mxu2  ;;  %v2983_v13 = vld [vmem:[#allocation11 + $0x408] sm:$0xff] }
 0x4c9   : > { %v4752_v18 = vadd.f32 %v2574_v35, %v2503_v12  ;;  %2924 = vmatpush.msrb.mxu1 %v2923_v15  ;;  %v2982_v12 = vld [vmem:[#allocation11 + $0x400] sm:$0xff]  ;;  %v3039_v15 = vld [vmem:[%s4911_s30 + $0x40] sm:$0xff] }
 0x4cb   : > { %2925 = vmatpush.msrb.mxu1 %v2922_v58  ;;  %v3037_v58 = vld [vmem:[%s4911_s30 + $0x30] sm:$0xff] }
 0x4cd   : > { %2926 = vmatpush.msrb.mxu1 %v2921_v62  ;;  %v3035_v62 = vld [vmem:[%s4911_s30 + $0x20] sm:$0xff] }
 0x4cf   : > { %v2608_v39 = vpop.f32.mrf.mxu3  ;;  %2927 = vmatpush.msrb.mxu1 %v2920_v61  ;;  %v3031_v61 = vld [vmem:[%s4911_s30] sm:$0xff] }
 0x4d0   : > { %2647 = vmatmul.f32.gmra.mxu1 %v2608_v39  ;;  %v2753_v42 = vpop.f32.mrf.mxu2 }
 0x4d1   : > { %2792 = vmatmul.f32.vlgmr.msrb.gmra.mxu3 %v2753_v42  ;;  %2928 = vmatpush.msrb.mxu1 %v2919_v28  ;;  %v3043_v42 = vld [vmem:[%s4911_s30 + $0x60] sm:$0xff] }
 0x4d3   : > { %2929 = vmatpush.msrb.mxu1 %v2918_v29  ;;  %v3618_v29 = vld [vmem:[%s4912_s29] ss:$0 sm:$0xff] }
 0x4d5   : > { %2930 = vmatpush.msrb.mxu1 %v2917_v34 }
 0x4d7   : > { %v2679_v46 = vpop.f32.mrf.mxu3  ;;  %2931 = vmatpush.msrb.mxu1 %v2916_v45 }
 0x4d8   : > { %2718 = vmatmul.f32.vlgmr.msrb.gmra.mxu0 %v2679_v46  ;;  %3486 = vmatmul.msk.f32.vlgmr.msra.gmra.mxu1 %vm2261_vm2, %v3484_v20  ;;  %v2756_v57 = vpop.f32.mrf.mxu2 }
 0x4d9   : > { %2795 = vmatmul.f32.gmra.mxu3 %v2756_v57  ;;  %2998 = vmatpush.msrb.mxu0 %v2997_v55  ;;  %v3036_v55 = vld [vmem:[%s4911_s30 + $0x28] sm:$0xff] }
 0x4da   : > { %2932 = vmatpush.msrb.mxu1 %v2915_v36 }
 0x4db   : > { %2999 = vmatpush.msrb.mxu0 %v2996_v3  ;;  %v3034_v3 = vld [vmem:[%s4911_s30 + $0x18] sm:$0xff] }
 0x4dc   : > { %2933 = vmatpush.msrb.mxu1 %v2914_v50 }
 0x4dd   : > { %3000 = vmatpush.msrb.mxu0 %v2995_v53 }
 0x4de   : > { %2934 = vmatpush.msrb.mxu1 %v2913_v30  ;;  %v3619_v30 = vld [vmem:[%s4913_s14] ss:$0 sm:$0xff] }
 0x4df   : > { %v2682_v26 = vpop.f32.mrf.mxu3  ;;  %3001 = vmatpush.msrb.mxu0 %v2994_v48 }
 0x4e0   : > { %2721 = vmatmul.f32.gmra.mxu0 %v2682_v26  ;;  %3487 = vmatmul.msk.f32.gmra.mxu1 %vm2261_vm2, %v3485_v19 }
 0x4e1   : > { %3494 = vmatmul.msk.f32.vlgmr.msra.gmra.mxu3 %vm2261_vm2, %v3492_v11  ;;  %3002 = vmatpush.msrb.mxu0 %v2993_v32 }
 0x4e2   : > { %2935 = vmatpush.msrb.mxu1 %v2912_v7 }
 0x4e3   : > { %3003 = vmatpush.msrb.mxu0 %v2992_v59 }
 0x4e4   : > { %2936 = vmatpush.msrb.mxu1 %v2911_v1 }
 0x4e5   : > { %3004 = vmatpush.msrb.mxu0 %v2991_v0 }
 0x4e6   : > { %2937 = vmatpush.msrb.mxu1 %v2910_v38 }
 0x4e7   : > { %3005 = vmatpush.msrb.mxu0 %v2990_v4 }
 0x4e8   : > { %3490 = vmatmul.msk.f32.vlgmr.msra.gmra.mxu0 %vm2261_vm2, %v3488_v49  ;;  %2938 = vmatpush.msrb.mxu1 %v2909_v40 }
 0x4e9   : > { %3495 = vmatmul.msk.f32.gmra.mxu3 %vm2261_vm2, %v3493_v27  ;;  %3006 = vmatpush.msrb.mxu0 %v2989_v10 }
 0x4ea   : > { %2939 = vmatpush.msrb.mxu1 %v2908_v21 }
 0x4eb   : > { %3007 = vmatpush.msrb.mxu0 %v2988_v63 }
 0x4ed   : > { %3008 = vmatpush.msrb.mxu0 %v2987_v33 }
 0x4ef   : > { %3009 = vmatpush.msrb.mxu0 %v2986_v31 }
 0x4f0   : > { %3491 = vmatmul.msk.f32.gmra.mxu0 %vm2261_vm2, %v3489_v41 }
 0x4f1   : > { %3010 = vmatpush.msrb.mxu0 %v2985_v5 }
 0x4f3   : > { %3011 = vmatpush.msrb.mxu0 %v2984_v44 }
 0x4f5   : > { %3012 = vmatpush.msrb.mxu0 %v2983_v13 }
 0x4f7   : > { %3013 = vmatpush.msrb.mxu0 %v2982_v12 }
 0x545   : > { %v2645_v25 = vpop.f32.mrf.mxu1 }
 0x546   : > { %v2651_v8 = vadd.f32 %v2645_v25, %v4750_v51  ;;  %v3044_v51 = vld [vmem:[%s4911_s30 + $0x68] sm:$0xff] }
 0x547   : > { %3053 = vmatpush.msrb.mxu2 %v3044_v51 }
 0x549   : > { %3054 = vmatpush.msrb.mxu2 %v3043_v42 }
 0x54b   : > { %3055 = vmatpush.msrb.mxu2 %v3042_v52 }
 0x54d   : > { %v2648_v35 = vpop.f32.mrf.mxu1  ;;  %3056 = vmatpush.msrb.mxu2 %v3041_v47 }
 0x54e   : > { %v2652_v39 = vadd.f32 %v2648_v35, %v4752_v18 }
 0x54f   : > { %3057 = vmatpush.msrb.mxu2 %v3040_v22 }
 0x551   : > { %3058 = vmatpush.msrb.mxu2 %v3039_v15 }
 0x553   : > { %3059 = vmatpush.msrb.mxu2 %v3038_v23 }
 0x554   : > { %v2793_v20 = vpop.f32.mrf.mxu3 }
 0x555   : > { %v2719_v18 = vpop.f32.mrf.mxu0  ;;  %v2827_v43 = vpop.f32.mrf.mxu1  ;;  %3060 = vmatpush.msrb.mxu2 %v3037_v58 }
 0x556   : > { %v2725_v54 = vadd.f32 %v2719_v18, %v2651_v8  ;;  %2866 = vmatmul.f32.vlgmr.msra.gmra.mxu2 %v2827_v43 }
 0x557   : > { %3061 = vmatpush.msrb.mxu2 %v3036_v55 }
 0x558   : > { %v2799_v46 = vadd.f32 %v2793_v20, %v2725_v54 }
 0x559   : > { %3062 = vmatpush.msrb.mxu2 %v3035_v62 }
 0x55b   : > { %3063 = vmatpush.msrb.mxu2 %v3034_v3 }
 0x55c   : > { %v2796_v26 = vpop.f32.mrf.mxu3 }
 0x55d   : > { %v2722_v57 = vpop.f32.mrf.mxu0  ;;  %v2830_v9 = vpop.f32.mrf.mxu1  ;;  %3064 = vmatpush.msrb.mxu2 %v3033_v60 }
 0x55e   : > { %v2726_v19 = vadd.f32 %v2722_v57, %v2652_v39  ;;  %2869 = vmatmul.f32.gmra.mxu2 %v2830_v9 }
 0x55f   : > { %3065 = vmatpush.msrb.mxu2 %v3032_v56 }
 0x560   : > { %v2800_v11 = vadd.f32 %v2796_v26, %v2726_v19 }
 0x561   : > { %3066 = vmatpush.msrb.mxu2 %v3031_v61 }
 0x564   : > { %v2975_v27 = vpop.f32.mrf.mxu3 }
 0x565   : > { %v2901_v49 = vpop.f32.mrf.mxu0  ;;  %3014 = vmatmul.f32.vlgmr.msrb.gmra.mxu0 %v2975_v27 }
 0x566   : > { %2940 = vmatmul.f32.vlgmr.msrb.gmra.mxu1 %v2901_v49 }
 0x56c   : > { %v2978_v14 = vpop.f32.mrf.mxu3 }
 0x56d   : > { %v2904_v41 = vpop.f32.mrf.mxu0  ;;  %3017 = vmatmul.f32.gmra.mxu0 %v2978_v14 }
 0x56e   : > { %2943 = vmatmul.f32.gmra.mxu1 %v2904_v41 }
 0x5d9   : > { %v2867_v53 = vpop.f32.mrf.mxu2 }
 0x5da   : > { %v2873_v17 = vadd.f32 %v2867_v53, %v2799_v46 }
 0x5e1   : > { %v2870_v24 = vpop.f32.mrf.mxu2 }
 0x5e2   : > { %v3015_v16 = vpop.f32.mrf.mxu0  ;;  %v2874_v59 = vadd.f32 %v2870_v24, %v2800_v11 }
 0x5e3   : > { %v2941_v28 = vpop.f32.mrf.mxu1 }
 0x5e4   : > { %v2947_v48 = vadd.f32 %v2941_v28, %v2873_v17 }
 0x5e6   : > { %v3021_v32 = vadd.f32 %v3015_v16, %v2947_v48 }
 0x5e8   : > { %v3027_v34 = vadd.f32 %v3618_v29, %v3021_v32 }
 0x5ea   : > { %v3029_v2 = vmax.f32 %v3027_v34, 0.0  ;;  %v3018_v36 = vpop.f32.mrf.mxu0 }
 0x5eb   : > { %v2944_v45 = vpop.f32.mrf.mxu1 }
 0x5ec   : > { %v2948_v0 = vadd.f32 %v2944_v45, %v2874_v59  ;;  %3067 = vmatmul.f32.vlgmr.msrb.gmra.mxu2 %v3029_v2 }
 0x5ee   : > { %v3022_v4 = vadd.f32 %v3018_v36, %v2948_v0 }
 0x5f0   : > { %v3028_v50 = vadd.f32 %v3618_v29, %v3022_v4 }
 0x5f2   : > { %v3030_v10 = vmax.f32 %v3028_v50, 0.0 }
 0x5f4   : > { %3070 = vmatmul.f32.gmra.mxu2 %v3030_v10 }
 0x66f   : > { %v3068_v63 = vpop.f32.mrf.mxu2 }
 0x670   : > { %v3069_v7 = vadd.f32 %v3619_v30, %v3068_v63 }
 0x672   : > { %3074 = vst.msk [vmem:[%s4663_s13 + $0x40] sm:$0xff] %vm2261_vm2, %v3069_v7  ;;  %v3076_v33 = vmul.f32 1.442695, %v3069_v7  ;;  %3092 = vrot.lane.b32.xlu1 %v3069_v7, %s3915_s5 }
 0x674   : > { %3636 = vpow2.f32 %v3076_v33 }
 0x677   : > { %v3071_v1 = vpop.f32.mrf.mxu2 }
 0x678   : > { %v3072_v31 = vadd.f32 %v3619_v30, %v3071_v1 }
 0x67a   : > { %v3637_v38 = vpop.eup %3636  ;;  %3075 = vst.msk [vmem:[%s4663_s13 + $0x48] sm:$0xff] %vm2261_vm2, %v3072_v31  ;;  %v3078_v5 = vmul.f32 1.442695, %v3072_v31 }
 0x67b   : > { %3082 = vrot.lane.b32.xlu2 %v3637_v38, %s3914_s17 }
 0x67c   : > { %3638 = vpow2.f32 %v3078_v5 }
 0x682   : > { %v3639_v40 = vpop.eup %3638 }
 0x683   : > { %3094 = vrot.lane.b32.xlu2 %v3072_v31, %s3915_s5  ;;  %3084 = vrot.lane.b32.xlu0 %v3639_v40, %s3914_s17 }
 0x684   : > { %3102 = vrot.lane.b32.xlu1 %v3639_v40, %s3916_s18 }
 0x68b   : > { %3100 = vrot.lane.b32.xlu0 %v3637_v38, %s3916_s18 }
 0x6d5   : > { %v3083_v44 = vpop.permute.xlu2 %3082 }
 0x6d6   : > { %3088 = vst.msk [vmem:[%s4732_s28 + $0x40] sm:$0xff] %vm2261_vm2, %v3083_v44 }
 0x6dd   : > { %v3095_v25 = vpop.permute.xlu2 %3094 }
 0x6de   : > { %3099 = vst.msk [vmem:[%s4663_s13 + $0x58] sm:$0xff] %vm2261_vm2, %v3095_v25 }
 0x6e4   : > { %v3093_v21 = vpop.permute.xlu1 %3092 }
 0x6e5   : > { %3098 = vst.msk [vmem:[%s4663_s13 + $0x50] sm:$0xff] %vm2261_vm2, %v3093_v21 }
 0x6f5   : > { %v3085_v13 = vpop.permute.xlu0 %3084 }
 0x6f6   : > { %3089 = vst.msk [vmem:[%s4732_s28 + $0x48] sm:$0xff] %vm2261_vm2, %v3085_v13  ;;  %v3103_v8 = vpop.permute.xlu1 %3102 }
 0x6f7   : > { %3107 = vst.msk [vmem:[%s4732_s28 + $0x58] sm:$0xff] %vm2261_vm2, %v3103_v8 }
 0x6fd   : > { %v3101_v12 = vpop.permute.xlu0 %3100 }
 0x6fe   : > { %3106 = vst.msk [vmem:[%s4732_s28 + $0x50] sm:$0xff] %vm2261_vm2, %v3101_v12 }
 0x6ff PF: > { %p28_p1 = scmp.ge.s32.totalorder %s4091_s0, 4   ;;  %s4914_s24 = smov %s3896_s25 }
 0x700   : > { %s4915_s25 = smov %s3900_s26  ;;  %s4916_s26 = smov %s4103_s23 }
 0x701   : > { %s4917_s27 = smov %s4091_s0  ;;  %30 = sbr.rel (!%p28_p1) target bundleno = 13 (0xd), region = 194 }
 0x706   :  { %3145 = vsyncpa [#allocation3], 1 }
 0x707   :  { %3147 = vsyncpa [#allocation3 + $0x1], 1 }
 0x708   :  { %3148 = vsyncpa [#allocation5], 1 }
 0x709   :  { %3149 = vsyncpa [#allocation8], 1 }

</bundles_post_ra>
